<compile_context>
chip_gen: v5e
topology: v5e:2x2
jax: 0.10.0
libtpu: 0.0.40
codegen_flags: <defaults>
</compile_context>

<pallas_src>
import jax
import jax.numpy as jnp
from jax.experimental import pallas as pl
from jax.experimental.pallas import tpu as pltpu

IN_FEATS = 128
H0, H1, H2 = 256, 512, 1024
OUT_FEATS = 784          # 28 * 28
OUT_PAD = 896            # 7 * 128, lane-dense output width


def _round_up(x, m):
    return (x + m - 1) // m * m


def generator_kernel(x_ref,
                     w0_ref, b0_ref,
                     w1_ref, b1_ref,
                     w2_ref, b2_ref,
                     w3_ref, b3_ref,
                     o_ref):
    # Fused 4-layer MLP on one (TB, 128) batch tile. Weights are bf16 and
    # VMEM-resident across the batch grid (constant index_map). Matmuls run on
    # the MXU with f32 accumulation; bias / ReLU / tanh stay in f32 on VPU/EUP.
    x = x_ref[...].astype(jnp.bfloat16)

    h = jnp.dot(x, w0_ref[...], preferred_element_type=jnp.float32) + b0_ref[...]
    h = jnp.maximum(h, 0.0)

    h = jnp.dot(h.astype(jnp.bfloat16), w1_ref[...],
                preferred_element_type=jnp.float32) + b1_ref[...]
    h = jnp.maximum(h, 0.0)

    h = jnp.dot(h.astype(jnp.bfloat16), w2_ref[...],
                preferred_element_type=jnp.float32) + b2_ref[...]
    h = jnp.maximum(h, 0.0)

    h = jnp.dot(h.astype(jnp.bfloat16), w3_ref[...],
                preferred_element_type=jnp.float32) + b3_ref[...]
    o_ref[...] = jnp.tanh(h)


def init_linear_params(key, in_feats, out_feats):
    """Deterministic init mimicking torch.nn.Linear defaults:
    weight, bias ~ U(-1/sqrt(in_feats), 1/sqrt(in_feats)).
    Weight stored as (in_feats, out_feats) for x @ W."""
    kw, kb = jax.random.split(key)
    bound = 1.0 / jnp.sqrt(jnp.float32(in_feats))
    w = jax.random.uniform(kw, (in_feats, out_feats), jnp.float32, -bound, bound)
    b = jax.random.uniform(kb, (1, out_feats), jnp.float32, -bound, bound)
    return w, b


def make_generator_params(key):
    """Reference (f32, unpadded) parameters, torch-layout semantics."""
    k0, k1, k2, k3 = jax.random.split(key, 4)
    w0, b0 = init_linear_params(k0, IN_FEATS, H0)
    w1, b1 = init_linear_params(k1, H0, H1)
    w2, b2 = init_linear_params(k2, H1, H2)
    w3, b3 = init_linear_params(k3, H2, OUT_FEATS)
    return (w0, b0, w1, b1, w2, b2, w3, b3)


def pack_params_for_kernel(fparams):
    """bf16 weights, f32 biases; last layer zero-padded 784 -> 896 lanes."""
    w0, b0, w1, b1, w2, b2, w3, b3 = fparams
    w3p = jnp.pad(w3, ((0, 0), (0, OUT_PAD - OUT_FEATS)))
    b3p = jnp.pad(b3, ((0, 0), (0, OUT_PAD - OUT_FEATS)))
    return (w0.astype(jnp.bfloat16), b0,
            w1.astype(jnp.bfloat16), b1,
            w2.astype(jnp.bfloat16), b2,
            w3p.astype(jnp.bfloat16), b3p)


def generator_forward(x, kparams, *, tb=256):
    """x: (B, 128) f32 -> (B, 1, 28, 28) f32."""
    B = x.shape[0]
    # Batch-tile size: 256 rows fills the v6e/v7x MXU M dimension; clamp down
    # for tiny batches (must stay a multiple of 8 sublanes).
    TB = min(tb, _round_up(B, 8))
    Bp = _round_up(B, TB)
    if Bp != B:
        x = jnp.pad(x, ((0, Bp - B), (0, 0)))

    w0, b0, w1, b1, w2, b2, w3, b3 = kparams
    grid = (Bp // TB,)

    def resident(arr):
        # Weights / biases: same block every grid step -> stays in VMEM.
        return pl.BlockSpec(arr.shape, lambda i: (0, 0))

    in_specs = [
        pl.BlockSpec((TB, IN_FEATS), lambda i: (i, 0)),
        resident(w0), resident(b0),
        resident(w1), resident(b1),
        resident(w2), resident(b2),
        resident(w3), resident(b3),
    ]
    out_specs = pl.BlockSpec((TB, OUT_PAD), lambda i: (i, 0))

    weight_bytes = sum(int(a.size) * a.dtype.itemsize for a in kparams)
    cost = pl.CostEstimate(
        flops=2 * Bp * (IN_FEATS * H0 + H0 * H1 + H1 * H2 + H2 * OUT_PAD),
        transcendentals=Bp * OUT_PAD,
        bytes_accessed=weight_bytes + Bp * IN_FEATS * 4 + Bp * OUT_PAD * 4,
    )

    out = pl.pallas_call(
        generator_kernel,
        grid=grid,
        in_specs=in_specs,
        out_specs=out_specs,
        out_shape=jax.ShapeDtypeStruct((Bp, OUT_PAD), jnp.float32),
        compiler_params=pltpu.CompilerParams(
            dimension_semantics=("parallel",),     # v7x: shard batch tiles over 2 TCs
            vmem_limit_bytes=32 * 1024 * 1024,     # bf16 weights + double-buffered tiles
        ),
        cost_estimate=cost,
    )(x, *kparams)

    # strip batch padding + lane padding; match PyTorch x.view(-1, 1, 28, 28)
    return out[:B, :OUT_FEATS].reshape(B, 1, 28, 28)


def generator_ref_bf16(x, kparams):
    """Pure-JAX reference mirroring the kernel's bf16/f32 numerics."""
    w0, b0, w1, b1, w2, b2, w3, b3 = kparams

    def mm(a, w):
        return jnp.dot(a.astype(jnp.bfloat16), w,
                       preferred_element_type=jnp.float32)

    h = jnp.maximum(mm(x, w0) + b0, 0.0)
    h = jnp.maximum(mm(h, w1) + b1, 0.0)
    h = jnp.maximum(mm(h, w2) + b2, 0.0)
    h = jnp.tanh(mm(h, w3) + b3)
    return h[:, :OUT_FEATS].reshape(-1, 1, 28, 28)


def generator_ref_f32(x, fparams):
    """Pure-f32 reference matching the original PyTorch module exactly."""
    w0, b0, w1, b1, w2, b2, w3, b3 = fparams
    h = jnp.maximum(x @ w0 + b0, 0.0)
    h = jnp.maximum(h @ w1 + b1, 0.0)
    h = jnp.maximum(h @ w2 + b2, 0.0)
    h = jnp.tanh(h @ w3 + b3)
    return h.reshape(-1, 1, 28, 28)


if __name__ == "__main__":
    key = jax.random.PRNGKey(0)
    k_params, k_x1, k_x2 = jax.random.split(key, 3)

    fparams = make_generator_params(k_params)
    kparams = pack_params_for_kernel(fparams)

    # --- small batch (single tile) ---
    B1 = 8
    x1 = jax.random.normal(k_x1, (B1, IN_FEATS), jnp.float32)
    y1 = jax.block_until_ready(generator_forward(x1, kparams))
    assert y1.shape == (B1, 1, 28, 28), y1.shape
    y1_bf = generator_ref_bf16(x1, kparams)
    y1_f32 = generator_ref_f32(x1, fparams)
    assert jnp.allclose(y1, y1_bf, atol=1e-4, rtol=1e-4), "mismatch vs bf16 ref (B=8)"
    assert jnp.allclose(y1, y1_f32, atol=5e-2, rtol=0.0), "drift vs f32 ref (B=8)"

    # --- larger, non-aligned batch (exercises batch padding + multi-tile grid) ---
    B2 = 300
    x2 = jax.random.normal(k_x2, (B2, IN_FEATS), jnp.float32)
    y2 = jax.block_until_ready(generator_forward(x2, kparams))
    assert y2.shape == (B2, 1, 28, 28), y2.shape
    y2_bf = generator_ref_bf16(x2, kparams)
    assert jnp.allclose(y2, y2_bf, atol=1e-4, rtol=1e-4), "mismatch vs bf16 ref (B=300)"

    print("KERNEL_OK")
</pallas_src>

<mosaic_0001>
module attributes {stable_mosaic.version = 11 : i64} {
  func.func @generator_kernel(%arg0: i32, %arg1: memref<8x128xf32, #tpu.memory_space<vmem>>, %arg2: memref<128x256xbf16, #tpu.memory_space<vmem>>, %arg3: memref<1x256xf32, #tpu.memory_space<vmem>>, %arg4: memref<256x512xbf16, #tpu.memory_space<vmem>>, %arg5: memref<1x512xf32, #tpu.memory_space<vmem>>, %arg6: memref<512x1024xbf16, #tpu.memory_space<vmem>>, %arg7: memref<1x1024xf32, #tpu.memory_space<vmem>>, %arg8: memref<1024x896xbf16, #tpu.memory_space<vmem>>, %arg9: memref<1x896xf32, #tpu.memory_space<vmem>>, %arg10: memref<8x896xf32, #tpu.memory_space<vmem>>) attributes {dimension_semantics = [#tpu.dimension_semantics<parallel>], iteration_bounds = array<i64: 1>, scalar_prefetch = 0 : i64, scratch_operands = 0 : i64, tpu.core_type = #tpu.core_type<tc>, window_params = [{transform_indices = @transform_0, window_bounds = array<i64: 8, 128>}, {pipeline_mode = #tpu.pipeline_mode<synchronous>, transform_indices = @transform_1, window_bounds = array<i64: 128, 256>}, {pipeline_mode = #tpu.pipeline_mode<synchronous>, transform_indices = @transform_2, window_bounds = array<i64: 1, 256>}, {pipeline_mode = #tpu.pipeline_mode<synchronous>, transform_indices = @transform_3, window_bounds = array<i64: 256, 512>}, {pipeline_mode = #tpu.pipeline_mode<synchronous>, transform_indices = @transform_4, window_bounds = array<i64: 1, 512>}, {pipeline_mode = #tpu.pipeline_mode<synchronous>, transform_indices = @transform_5, window_bounds = array<i64: 512, 1024>}, {pipeline_mode = #tpu.pipeline_mode<synchronous>, transform_indices = @transform_6, window_bounds = array<i64: 1, 1024>}, {pipeline_mode = #tpu.pipeline_mode<synchronous>, transform_indices = @transform_7, window_bounds = array<i64: 1024, 896>}, {pipeline_mode = #tpu.pipeline_mode<synchronous>, transform_indices = @transform_8, window_bounds = array<i64: 1, 896>}, {transform_indices = @transform_9, window_bounds = array<i64: 8, 896>}]} {
    %c0 = arith.constant 0 : index
    %c0_0 = arith.constant 0 : index
    %0 = vector.load %arg1[%c0, %c0_0] : memref<8x128xf32, #tpu.memory_space<vmem>>, vector<8x128xf32>
    %1 = arith.truncf %0 : vector<8x128xf32> to vector<8x128xbf16>
    %c0_1 = arith.constant 0 : index
    %c0_2 = arith.constant 0 : index
    %2 = vector.load %arg2[%c0_1, %c0_2] : memref<128x256xbf16, #tpu.memory_space<vmem>>, vector<128x256xbf16>
    %cst = arith.constant dense<0.000000e+00> : vector<8x256xf32>
    %3 = tpu.matmul %1, %2, %cst {dimension_numbers = #tpu.dot_dimension_numbers<[1], [0], [0], [1], [0, 0, 1, 1], [], []>} : vector<8x128xbf16>, vector<128x256xbf16>, vector<8x256xf32> -> vector<8x256xf32>
    %c0_3 = arith.constant 0 : index
    %c0_4 = arith.constant 0 : index
    %4 = vector.load %arg3[%c0_3, %c0_4] : memref<1x256xf32, #tpu.memory_space<vmem>>, vector<1x256xf32>
    %5 = vector.broadcast %4 : vector<1x256xf32> to vector<8x256xf32>
    %6 = arith.addf %3, %5 : vector<8x256xf32>
    %cst_5 = arith.constant 0.000000e+00 : f32
    %7 = vector.broadcast %cst_5 : f32 to vector<8x256xf32>
    %8 = arith.maximumf %6, %7 : vector<8x256xf32>
    %9 = arith.truncf %8 : vector<8x256xf32> to vector<8x256xbf16>
    %c0_6 = arith.constant 0 : index
    %c0_7 = arith.constant 0 : index
    %10 = vector.load %arg4[%c0_6, %c0_7] : memref<256x512xbf16, #tpu.memory_space<vmem>>, vector<256x512xbf16>
    %cst_8 = arith.constant dense<0.000000e+00> : vector<8x512xf32>
    %11 = tpu.matmul %9, %10, %cst_8 {dimension_numbers = #tpu.dot_dimension_numbers<[1], [0], [0], [1], [0, 0, 1, 1], [], []>} : vector<8x256xbf16>, vector<256x512xbf16>, vector<8x512xf32> -> vector<8x512xf32>
    %c0_9 = arith.constant 0 : index
    %c0_10 = arith.constant 0 : index
    %12 = vector.load %arg5[%c0_9, %c0_10] : memref<1x512xf32, #tpu.memory_space<vmem>>, vector<1x512xf32>
    %13 = vector.broadcast %12 : vector<1x512xf32> to vector<8x512xf32>
    %14 = arith.addf %11, %13 : vector<8x512xf32>
    %cst_11 = arith.constant 0.000000e+00 : f32
    %15 = vector.broadcast %cst_11 : f32 to vector<8x512xf32>
    %16 = arith.maximumf %14, %15 : vector<8x512xf32>
    %17 = arith.truncf %16 : vector<8x512xf32> to vector<8x512xbf16>
    %c0_12 = arith.constant 0 : index
    %c0_13 = arith.constant 0 : index
    %18 = vector.load %arg6[%c0_12, %c0_13] : memref<512x1024xbf16, #tpu.memory_space<vmem>>, vector<512x1024xbf16>
    %cst_14 = arith.constant dense<0.000000e+00> : vector<8x1024xf32>
    %19 = tpu.matmul %17, %18, %cst_14 {dimension_numbers = #tpu.dot_dimension_numbers<[1], [0], [0], [1], [0, 0, 1, 1], [], []>} : vector<8x512xbf16>, vector<512x1024xbf16>, vector<8x1024xf32> -> vector<8x1024xf32>
    %c0_15 = arith.constant 0 : index
    %c0_16 = arith.constant 0 : index
    %20 = vector.load %arg7[%c0_15, %c0_16] : memref<1x1024xf32, #tpu.memory_space<vmem>>, vector<1x1024xf32>
    %21 = vector.broadcast %20 : vector<1x1024xf32> to vector<8x1024xf32>
    %22 = arith.addf %19, %21 : vector<8x1024xf32>
    %cst_17 = arith.constant 0.000000e+00 : f32
    %23 = vector.broadcast %cst_17 : f32 to vector<8x1024xf32>
    %24 = arith.maximumf %22, %23 : vector<8x1024xf32>
    %25 = arith.truncf %24 : vector<8x1024xf32> to vector<8x1024xbf16>
    %c0_18 = arith.constant 0 : index
    %c0_19 = arith.constant 0 : index
    %26 = vector.load %arg8[%c0_18, %c0_19] : memref<1024x896xbf16, #tpu.memory_space<vmem>>, vector<1024x896xbf16>
    %cst_20 = arith.constant dense<0.000000e+00> : vector<8x896xf32>
    %27 = tpu.matmul %25, %26, %cst_20 {dimension_numbers = #tpu.dot_dimension_numbers<[1], [0], [0], [1], [0, 0, 1, 1], [], []>} : vector<8x1024xbf16>, vector<1024x896xbf16>, vector<8x896xf32> -> vector<8x896xf32>
    %c0_21 = arith.constant 0 : index
    %c0_22 = arith.constant 0 : index
    %28 = vector.load %arg9[%c0_21, %c0_22] : memref<1x896xf32, #tpu.memory_space<vmem>>, vector<1x896xf32>
    %29 = vector.broadcast %28 : vector<1x896xf32> to vector<8x896xf32>
    %30 = arith.addf %27, %29 : vector<8x896xf32>
    %31 = math.tanh %30 : vector<8x896xf32>
    %c0_23 = arith.constant 0 : index
    %c0_24 = arith.constant 0 : index
    %32 = vector.load %arg10[%c0_23, %c0_24] : memref<8x896xf32, #tpu.memory_space<vmem>>, vector<8x896xf32>
    tpu.vector_store %arg10[%c0_23, %c0_24], %31 {strides = array<i32>} : memref<8x896xf32, #tpu.memory_space<vmem>>, vector<8x896xf32>,
    return
  }
  func.func @transform_0(%arg0: i32) -> (i32, i32) {
    %c0_i32 = arith.constant 0 : i32
    %c0_i32_0 = arith.constant 0 : i32
    return %arg0, %c0_i32 : i32, i32
  }
  func.func @transform_1(%arg0: i32) -> (i32, i32) {
    %c0_i32 = arith.constant 0 : i32
    %c0_i32_0 = arith.constant 0 : i32
    %c0_i32_1 = arith.constant 0 : i32
    return %c0_i32, %c0_i32_0 : i32, i32
  }
  func.func @transform_2(%arg0: i32) -> (i32, i32) {
    %c0_i32 = arith.constant 0 : i32
    %c0_i32_0 = arith.constant 0 : i32
    %c0_i32_1 = arith.constant 0 : i32
    return %c0_i32, %c0_i32_0 : i32, i32
  }
  func.func @transform_3(%arg0: i32) -> (i32, i32) {
    %c0_i32 = arith.constant 0 : i32
    %c0_i32_0 = arith.constant 0 : i32
    %c0_i32_1 = arith.constant 0 : i32
    return %c0_i32, %c0_i32_0 : i32, i32
  }
  func.func @transform_4(%arg0: i32) -> (i32, i32) {
    %c0_i32 = arith.constant 0 : i32
    %c0_i32_0 = arith.constant 0 : i32
    %c0_i32_1 = arith.constant 0 : i32
    return %c0_i32, %c0_i32_0 : i32, i32
  }
  func.func @transform_5(%arg0: i32) -> (i32, i32) {
    %c0_i32 = arith.constant 0 : i32
    %c0_i32_0 = arith.constant 0 : i32
    %c0_i32_1 = arith.constant 0 : i32
    return %c0_i32, %c0_i32_0 : i32, i32
  }
  func.func @transform_6(%arg0: i32) -> (i32, i32) {
    %c0_i32 = arith.constant 0 : i32
    %c0_i32_0 = arith.constant 0 : i32
    %c0_i32_1 = arith.constant 0 : i32
    return %c0_i32, %c0_i32_0 : i32, i32
  }
  func.func @transform_7(%arg0: i32) -> (i32, i32) {
    %c0_i32 = arith.constant 0 : i32
    %c0_i32_0 = arith.constant 0 : i32
    %c0_i32_1 = arith.constant 0 : i32
    return %c0_i32, %c0_i32_0 : i32, i32
  }
  func.func @transform_8(%arg0: i32) -> (i32, i32) {
    %c0_i32 = arith.constant 0 : i32
    %c0_i32_0 = arith.constant 0 : i32
    %c0_i32_1 = arith.constant 0 : i32
    return %c0_i32, %c0_i32_0 : i32, i32
  }
  func.func @transform_9(%arg0: i32) -> (i32, i32) {
    %c0_i32 = arith.constant 0 : i32
    %c0_i32_0 = arith.constant 0 : i32
    return %arg0, %c0_i32 : i32, i32
  }
}

</mosaic_0001>

<bundles_post_ra>
// kernel: tpu_custom_call.1
= control target key start
LH: loop header
LB: loop body
LE: loop exit
PB: predicated region body
PF: predicated region fallthrough
CT: control target
= control target key end

     0   :  { %14 = vsyncpa [#allocation3], 0  ;;  %s10958_s0 = inlined_call_operand.hbm [shape: f32[8,128], index: 0, kind: input, shape index: {}]   ;;  %s10959_s1 = inlined_call_operand.hbm [shape: bf16[128,256], index: 1, kind: input, shape index: {}]   ;;  %s10960_s2 = inlined_call_operand.hbm [shape: f32[1,256], index: 2, kind: input, shape index: {}]   ;;  %s10961_s3 = inlined_call_operand.hbm [shape: bf16[256,512], index: 3, kind: input, shape index: {}]   ;;  %s10962_s4 = inlined_call_operand.hbm [shape: f32[1,512], index: 4, kind: input, shape index: {}]   ;;  %s10963_s5 = inlined_call_operand.hbm [shape: bf16[512,1024], index: 5, kind: input, shape index: {}]   ;;  %s10964_s6 = inlined_call_operand.hbm [shape: f32[1,1024], index: 6, kind: input, shape index: {}]   ;;  %s10965_s7 = inlined_call_operand.hbm [shape: bf16[1024,896], index: 7, kind: input, shape index: {}]   ;;  %s10966_s8 = inlined_call_operand.hbm [shape: f32[1,896], index: 8, kind: input, shape index: {}]   ;;  %s10967_s9 = inlined_call_operand.hbm [shape: f32[8,896], index: 9, kind: output, shape index: {}]  }
   0x1   :  { %15 = vsyncpa [#allocation6], 0 }
   0x2   :  { %16 = vsyncpa [#allocation9], 0 }
   0x3   :  { %17 = vsyncpa [#allocation12], 0 }
   0x4   :  { %18 = vsyncpa [#allocation15], 0  ;;  %s35_s11 = sshll.u32 %s10959_s1, 4  ;;  %s36_s11 = int_to_ptr.hbm [resolvable:$true] %s35_s11 }
   0x5   :  { %19 = vsyncpa [#allocation4], 0  ;;  %s10591_s12 = smov [#allocation5]   ;;  %s59_s16 = sshll.u32 %s10961_s3, 4  ;;  %s60_s16 = int_to_ptr.hbm [resolvable:$true] %s59_s16 }
   0x6   :  { %s37_s13 = sshll.u32 %s10591_s12, 4  ;;  %s10592_s17 = smov 128   ;;  %s38_s13 = int_to_ptr.vmem [resolvable:$true] %s37_s13 }
   0x7   :  { %s10593_s18 = smov 8   ;;  %s10594_s19 = smov [#allocation8]  }
   0x8   :  { %43 = dma.hbm_to_vmem [thread:$0]  %s36_s11, 2048, %s38_s13, [#allocation6], %s10592_s17, %s10592_s17, %s10593_s18  }
   0x9   :  { %s61_s20 = sshll.u32 %s10594_s19, 4  ;;  %s10595_s21 = smov 256   ;;  %s62_s20 = int_to_ptr.vmem [resolvable:$true] %s61_s20 }
   0xa   :  { %s10596_s22 = smov 16   ;;  %s83_s24 = sshll.u32 %s10963_s5, 4  ;;  %s84_s24 = int_to_ptr.hbm [resolvable:$true] %s83_s24 }
   0xb   :  { %67 = dma.hbm_to_vmem [thread:$0]  %s60_s16, 8192, %s62_s20, [#allocation9], %s10595_s21, %s10595_s21, %s10596_s22  }
   0xc   :  { %s10597_s25 = smov [#allocation11]   ;;  %s107_s28 = sshll.u32 %s10965_s7, 4  ;;  %s108_s28 = int_to_ptr.hbm [resolvable:$true] %s107_s28 }
   0xd   :  { %s85_s26 = sshll.u32 %s10597_s25, 4  ;;  %s10598_s29 = smov 512   ;;  %s86_s26 = int_to_ptr.vmem [resolvable:$true] %s85_s26 }
   0xe   :  { %s10599_s30 = smov 32   ;;  %s10600_s10 = smov [#allocation14]  }
   0xf   :  { %91 = dma.hbm_to_vmem [thread:$0]  %s84_s24, 32768, %s86_s26, [#allocation12], %s10598_s29, %s10598_s29, %s10599_s30  }
  0x10   :  { %s109_s11 = sshll.u32 %s10600_s10, 4  ;;  %s10601_s12 = smov 448   ;;  %s110_s11 = int_to_ptr.vmem [resolvable:$true] %s109_s11 }
  0x11   :  { %s10602_s13 = smov 28   ;;  %s25_s15 = sshll.u32 %s10958_s0, 4  ;;  %s26_s15 = int_to_ptr.hbm [resolvable:$true] %s25_s15 }
  0x12   :  { %115 = dma.hbm_to_vmem [thread:$0]  %s108_s28, 57344, %s110_s11, [#allocation15], %s10601_s12, %s10601_s12, %s10602_s13  }
  0x13   :  { %s10603_s16 = smov [#allocation2]   ;;  %s49_s19 = sshll.u32 %s10960_s2, 4  ;;  %s50_s19 = int_to_ptr.hbm [resolvable:$true] %s49_s19 }
  0x14   :  { %s27_s17 = sshll.u32 %s10603_s16, 4  ;;  %s10604_s20 = smov [#allocation7]   ;;  %s28_s17 = int_to_ptr.vmem [resolvable:$true] %s27_s17 }
  0x15   :  { %30 = dma.hbm_to_vmem [thread:$0]  %s26_s15, 128, %s28_s17, [#allocation3]  }
  0x16   :  { %s51_s21 = sshll.u32 %s10604_s20, 4  ;;  %s73_s23 = sshll.u32 %s10962_s4, 4  ;;  %s52_s21 = int_to_ptr.vmem [resolvable:$true] %s51_s21  ;;  %s74_s23 = int_to_ptr.hbm [resolvable:$true] %s73_s23 }
  0x17   :  { %54 = dma.hbm_to_vmem [thread:$0]  %s50_s19, 32, %s52_s21, [#allocation6]  }
  0x18   :  { %s97_s25 = sshll.u32 %s10964_s6, 4  ;;  %s10605_s26 = smov [#allocation10]   ;;  %s98_s25 = int_to_ptr.hbm [resolvable:$true] %s97_s25 }
  0x19   :  { %s75_s27 = sshll.u32 %s10605_s26, 4  ;;  %s10606_s2 = smov [#allocation13]   ;;  %s76_s27 = int_to_ptr.vmem [resolvable:$true] %s75_s27 }
  0x1a   :  { %78 = dma.hbm_to_vmem [thread:$0]  %s74_s23, 64, %s76_s27, [#allocation9]  }
  0x1b   :  { %s99_s3 = sshll.u32 %s10606_s2, 4  ;;  %s121_s30 = sshll.u32 %s10966_s8, 4  ;;  %s100_s3 = int_to_ptr.vmem [resolvable:$true] %s99_s3  ;;  %s122_s30 = int_to_ptr.hbm [resolvable:$true] %s121_s30 }
  0x1c   :  { %102 = dma.hbm_to_vmem [thread:$0]  %s98_s25, 128, %s100_s3, [#allocation12]  }
  0x1d   :  { %s10607_s4 = smov [#allocation16]  }
  0x1e   :  { %s123_s10 = sshll.u32 %s10607_s4, 4  ;;  %s124_s10 = int_to_ptr.vmem [resolvable:$true] %s123_s10 }
  0x1f   :  { %126 = dma.hbm_to_vmem [thread:$0]  %s122_s30, 112, %s124_s10, [#allocation15]  }
  0x20   :  { %10579 = dma.done.wait [#allocation3], 128  }
  0x21   :  { %10580 = vsyncadd [#allocation3], 4294967168 }
  0x22   :  { %10581 = dma.done.wait [#allocation6], 2080  }
  0x23   :  { %10582 = vsyncadd [#allocation6], 4294965216 }
  0x24   :  { %10583 = dma.done.wait [#allocation9], 8256  }
  0x25   :  { %10584 = vsyncadd [#allocation9], 4294959040 }
  0x26   :  { %10585 = dma.done.wait [#allocation12], 32896  }
  0x27   :  { %10586 = vsyncadd [#allocation12], 4294934400 }
  0x28   :  { %10587 = dma.done.wait [#allocation15], 57456  }
  0x29   :  { %10588 = vsyncadd [#allocation15], 4294909840  ;;  %v6442_v0 = vld [vmem:[#allocation5 + $0x70] sm:$0xf]  ;;  %v9535_v1 = vld [vmem:[#allocation5 + $0x74] sm:$0xf0] }
  0x2a   :  { %v9534_v2 = vld [vmem:[#allocation5 + $0x74] sm:$0xf]  ;;  %v6443_v3 = vor.u32 %v9535_v1, %v6442_v0  ;;  %v6444_v4 = vld [vmem:[#allocation5 + $0x78] sm:$0xf0]  ;;  %v6434_v5 = vld [vmem:[#allocation5 + $0x60] sm:$0xf] }
  0x2b   :  { %v9533_v6 = vld [vmem:[#allocation5 + $0x64] sm:$0xf0]  ;;  %v6447_v7 = vor.u32 %v9534_v2, %v6444_v4  ;;  %v9532_v8 = vld [vmem:[#allocation5 + $0x64] sm:$0xf]  ;;  %v6436_v9 = vld [vmem:[#allocation5 + $0x68] sm:$0xf0] }
  0x2c   :  { %267 = vmatpush.bf16.msra.mxu0 %v6443_v3  ;;  %v6435_v10 = vor.u32 %v9533_v6, %v6434_v5  ;;  %v6439_v11 = vor.u32 %v9532_v8, %v6436_v9  ;;  %v6426_v12 = vld [vmem:[#allocation5 + $0x50] sm:$0xf]  ;;  %v9531_v13 = vld [vmem:[#allocation5 + $0x54] sm:$0xf0]  ;;  %v9530_v14 = vld [vmem:[#allocation5 + $0x54] sm:$0xf] }
  0x2d   :  { %280 = vmatpush.bf16.msra.mxu1 %v6447_v7  ;;  %v6428_v15 = vld [vmem:[#allocation5 + $0x58] sm:$0xf0]  ;;  %v6427_v16 = vor.u32 %v9531_v13, %v6426_v12  ;;  %v6418_v18 = vld [vmem:[#allocation5 + $0x40] sm:$0xf]  ;;  %v9529_v19 = vld [vmem:[#allocation5 + $0x44] sm:$0xf0] }
  0x2e   :  { %v6431_v17 = vor.u32 %v9530_v14, %v6428_v15  ;;  %v9528_v20 = vld [vmem:[#allocation5 + $0x44] sm:$0xf]  ;;  %v6420_v21 = vld [vmem:[#allocation5 + $0x48] sm:$0xf0]  ;;  %v6419_v22 = vor.u32 %v9529_v19, %v6418_v18  ;;  %v9566_v24 = vld [vmem:[#allocation8 + $0xec] sm:$0xf0] }
  0x2f   :  { %v6562_v23 = vld [vmem:[#allocation8 + $0xe0] sm:$0xf]  ;;  %v6423_v26 = vor.u32 %v9528_v20, %v6420_v21  ;;  %v6410_v27 = vld [vmem:[#allocation5 + $0x30] sm:$0xf]  ;;  %v9527_v28 = vld [vmem:[#allocation5 + $0x34] sm:$0xf0] }
  0x30   :  { %268 = vmatpush.bf16.msra.mxu0 %v6435_v10  ;;  %v6690_v25 = vld [vmem:[#allocation8 + $0x1e0] sm:$0xf]  ;;  %v6563_v29 = vor.u32 %v9566_v24, %v6562_v23  ;;  %v9598_v30 = vld [vmem:[#allocation8 + $0x1ec] sm:$0xf0]  ;;  %v6412_v32 = vld [vmem:[#allocation5 + $0x38] sm:$0xf0]  ;;  %v6411_v38 = vor.u32 %v9527_v28, %v6410_v27 }
  0x31   :  { %281 = vmatpush.bf16.msra.mxu1 %v6439_v11  ;;  %v9526_v31 = vld [vmem:[#allocation5 + $0x34] sm:$0xf]  ;;  %v6691_v33 = vor.u32 %v9598_v30, %v6690_v25  ;;  %v6546_v34 = vld [vmem:[#allocation8 + $0xc0] sm:$0xf]  ;;  %v9525_v40 = vld [vmem:[#allocation5 + $0x24] sm:$0xf0] }
  0x32   :  { %691 = vmatpush.bf16.msra.mxu2 %v6563_v29  ;;  %v9562_v35 = vld [vmem:[#allocation8 + $0xcc] sm:$0xf0]  ;;  %v6674_v36 = vld [vmem:[#allocation8 + $0x1c0] sm:$0xf]  ;;  %v6415_v43 = vor.u32 %v9526_v31, %v6412_v32  ;;  %v6404_v47 = vld [vmem:[#allocation5 + $0x28] sm:$0xf0] }
  0x33   :  { %v9594_v37 = vld [vmem:[#allocation8 + $0x1cc] sm:$0xf0]  ;;  %v6402_v39 = vld [vmem:[#allocation5 + $0x20] sm:$0xf]  ;;  %704 = vmatpush.bf16.msra.mxu3 %v6691_v33  ;;  %v6547_v41 = vor.u32 %v9562_v35, %v6546_v34  ;;  %v9524_v44 = vld [vmem:[#allocation5 + $0x24] sm:$0xf] }
  0x34   :  { %269 = vmatpush.bf16.msra.mxu0 %v6427_v16  ;;  %v6675_v42 = vor.u32 %v9594_v37, %v6674_v36  ;;  %v6530_v45 = vld [vmem:[#allocation8 + $0xa0] sm:$0xf]  ;;  %v9558_v46 = vld [vmem:[#allocation8 + $0xac] sm:$0xf0]  ;;  %v6403_v51 = vor.u32 %v9525_v40, %v6402_v39  ;;  %v6407_v56 = vor.u32 %v9524_v44, %v6404_v47  ;;  %v9523_v57 = vld [vmem:[#allocation5 + $0x14] sm:$0xf0] }
  0x35   :  { %282 = vmatpush.bf16.msra.mxu1 %v6431_v17  ;;  %v6658_v48 = vld [vmem:[#allocation8 + $0x1a0] sm:$0xf]  ;;  %v9590_v49 = vld [vmem:[#allocation8 + $0x1ac] sm:$0xf0]  ;;  %v6531_v50 = vor.u32 %v9558_v46, %v6530_v45  ;;  %v6396_v61 = vld [vmem:[#allocation5 + $0x18] sm:$0xf0] }
  0x36   :  { %692 = vmatpush.bf16.msra.mxu2 %v6547_v41  ;;  %v6394_v52 = vld [vmem:[#allocation5 + $0x10] sm:$0xf]  ;;  %v6659_v53 = vor.u32 %v9590_v49, %v6658_v48  ;;  %v6514_v54 = vld [vmem:[#allocation8 + $0x80] sm:$0xf]  ;;  %v9522_v60 = vld [vmem:[#allocation5 + $0x14] sm:$0xf] }
  0x37   :  { %705 = vmatpush.bf16.msra.mxu3 %v6675_v42  ;;  %v9554_v55 = vld [vmem:[#allocation8 + $0x8c] sm:$0xf0]  ;;  %v6642_v58 = vld [vmem:[#allocation8 + $0x180] sm:$0xf]  ;;  %v6395_v0 = vor.u32 %v9523_v57, %v6394_v52  ;;  %v9521_v1 = vld [vmem:[#allocation5 + $0x4] sm:$0xf0]  ;;  %v6399_v5 = vor.u32 %v9522_v60, %v6396_v61 }
  0x38   :  { %270 = vmatpush.bf16.msra.mxu0 %v6419_v22  ;;  %v9586_v59 = vld [vmem:[#allocation8 + $0x18c] sm:$0xf0]  ;;  %v6386_v62 = vld [vmem:[#allocation5] sm:$0xf]  ;;  %v6515_v63 = vor.u32 %v9554_v55, %v6514_v54  ;;  %v9520_v6 = vld [vmem:[#allocation5 + $0x4] sm:$0xf] }
  0x39   :  { %283 = vmatpush.bf16.msra.mxu1 %v6423_v26  ;;  %v6643_v2 = vor.u32 %v9586_v59, %v6642_v58  ;;  %v6498_v3 = vld [vmem:[#allocation8 + $0x60] sm:$0xf]  ;;  %v9550_v4 = vld [vmem:[#allocation8 + $0x6c] sm:$0xf0]  ;;  %v6388_v9 = vld [vmem:[#allocation5 + $0x8] sm:$0xf0]  ;;  %v6387_v15 = vor.u32 %v9521_v1, %v6386_v62 }
  0x3a   :  { %693 = vmatpush.bf16.msra.mxu2 %v6531_v50  ;;  %v6626_v7 = vld [vmem:[#allocation8 + $0x160] sm:$0xf]  ;;  %v9582_v8 = vld [vmem:[#allocation8 + $0x16c] sm:$0xf0]  ;;  %v9564_v10 = vld [vmem:[#allocation8 + $0xe4] sm:$0xf]  ;;  %v6499_v14 = vor.u32 %v9550_v4, %v6498_v3  ;;  %v6391_v20 = vor.u32 %v9520_v6, %v6388_v9 }
  0x3b   :  { %706 = vmatpush.bf16.msra.mxu3 %v6659_v53  ;;  %v6564_v11 = vld [vmem:[#allocation8 + $0xf0] sm:$0xf0]  ;;  %v9596_v12 = vld [vmem:[#allocation8 + $0x1e4] sm:$0xf]  ;;  %v6627_v17 = vor.u32 %v9582_v8, %v6626_v7  ;;  %v6482_v18 = vld [vmem:[#allocation8 + $0x40] sm:$0xf] }
  0x3c   :  { %271 = vmatpush.bf16.msra.mxu0 %v6411_v38  ;;  %v6692_v13 = vld [vmem:[#allocation8 + $0x1f0] sm:$0xf0]  ;;  %v9546_v19 = vld [vmem:[#allocation8 + $0x4c] sm:$0xf0]  ;;  %v6567_v21 = vor.u32 %v9564_v10, %v6564_v11  ;;  %v6610_v22 = vld [vmem:[#allocation8 + $0x140] sm:$0xf] }
  0x3d   :  { %284 = vmatpush.bf16.msra.mxu1 %v6415_v43  ;;  %v163_v16 = vld [vmem:[#allocation2] sm:$0xff]  ;;  %v9578_v23 = vld [vmem:[#allocation8 + $0x14c] sm:$0xf0]  ;;  %v6695_v24 = vor.u32 %v9596_v12, %v6692_v13  ;;  %v9560_v25 = vld [vmem:[#allocation8 + $0xc4] sm:$0xf]  ;;  %v6483_v30 = vor.u32 %v9546_v19, %v6482_v18  ;;  %s10608_s6 = smov [#allocation17]  }
  0x3e   :  { %694 = vmatpush.bf16.msra.mxu2 %v6515_v63  ;;  %v6548_v26 = vld [vmem:[#allocation8 + $0xd0] sm:$0xf0]  ;;  %v164_v27 = vpack.c.bf16 %v163_v16, %v163_v16  ;;  %v9592_v28 = vld [vmem:[#allocation8 + $0x1c4] sm:$0xf]  ;;  %v6611_v31 = vor.u32 %v9578_v23, %v6610_v22  ;;  %v6466_v32 = vld [vmem:[#allocation8 + $0x20] sm:$0xf] }
  0x3f   :  { %707 = vmatpush.bf16.msra.mxu3 %v6643_v2  ;;  %v6676_v29 = vld [vmem:[#allocation8 + $0x1d0] sm:$0xf0]  ;;  %v9542_v33 = vld [vmem:[#allocation8 + $0x2c] sm:$0xf0]  ;;  %v6551_v34 = vor.u32 %v9560_v25, %v6548_v26  ;;  %v6594_v35 = vld [vmem:[#allocation8 + $0x120] sm:$0xf] }
  0x40   :  { %272 = vmatpush.bf16.msra.mxu0 %v6403_v51  ;;  %v9574_v36 = vld [vmem:[#allocation8 + $0x12c] sm:$0xf0]  ;;  %v6679_v37 = vor.u32 %v9592_v28, %v6676_v29  ;;  %v9556_v38 = vld [vmem:[#allocation8 + $0xa4] sm:$0xf]  ;;  %v6532_v39 = vld [vmem:[#allocation8 + $0xb0] sm:$0xf0]  ;;  %v6467_v42 = vor.u32 %v9542_v33, %v6466_v32 }
  0x41   :  { %285 = vmatpush.bf16.msra.mxu1 %v6407_v56  ;;  %v9588_v40 = vld [vmem:[#allocation8 + $0x1a4] sm:$0xf]  ;;  %v6660_v41 = vld [vmem:[#allocation8 + $0x1b0] sm:$0xf0]  ;;  %v6595_v44 = vor.u32 %v9574_v36, %v6594_v35  ;;  %v6450_v45 = vld [vmem:[#allocation8] sm:$0xf]  ;;  %v6535_v48 = vor.u32 %v9556_v38, %v6532_v39 }
  0x42   :  { %695 = vmatpush.bf16.msra.mxu2 %v6499_v14  ;;  %v9552_v43 = vld [vmem:[#allocation8 + $0x84] sm:$0xf]  ;;  %v9538_v46 = vld [vmem:[#allocation8 + $0xc] sm:$0xf0]  ;;  %v6578_v47 = vld [vmem:[#allocation8 + $0x100] sm:$0xf]  ;;  %v6663_v52 = vor.u32 %v9588_v40, %v6660_v41 }
  0x43   :  { %708 = vmatpush.bf16.msra.mxu3 %v6627_v17  ;;  %v9570_v49 = vld [vmem:[#allocation8 + $0x10c] sm:$0xf0]  ;;  %v6570_v50 = vld [vmem:[#allocation8 + $0xe8] sm:$0xf]  ;;  %v9567_v51 = vld [vmem:[#allocation8 + $0xf4] sm:$0xf0]  ;;  %v6451_v58 = vor.u32 %v9538_v46, %v6450_v45 }
  0x44   :  { %273 = vmatpush.bf16.msra.mxu0 %v6395_v0  ;;  %v6516_v53 = vld [vmem:[#allocation8 + $0x90] sm:$0xf0]  ;;  %v6698_v54 = vld [vmem:[#allocation8 + $0x1e8] sm:$0xf]  ;;  %v9599_v55 = vld [vmem:[#allocation8 + $0x1f4] sm:$0xf0]  ;;  %v6579_v59 = vor.u32 %v9570_v49, %v6578_v47  ;;  %v6571_v60 = vor.u32 %v9567_v51, %v6570_v50 }
  0x45   :  { %286 = vmatpush.bf16.msra.mxu1 %v6399_v5  ;;  %v9584_v56 = vld [vmem:[#allocation8 + $0x184] sm:$0xf]  ;;  %v6644_v57 = vld [vmem:[#allocation8 + $0x190] sm:$0xf0]  ;;  %v6519_v61 = vor.u32 %v9552_v43, %v6516_v53  ;;  %v6699_v63 = vor.u32 %v9599_v55, %v6698_v54  ;;  %v6554_v0 = vld [vmem:[#allocation8 + $0xc8] sm:$0xf] }
  0x46   :  { %696 = vmatpush.bf16.msra.mxu2 %v6483_v30  ;;  %v9548_v62 = vld [vmem:[#allocation8 + $0x64] sm:$0xf]  ;;  %v9563_v1 = vld [vmem:[#allocation8 + $0xd4] sm:$0xf0]  ;;  %v6647_v2 = vor.u32 %v9584_v56, %v6644_v57  ;;  %v6500_v3 = vld [vmem:[#allocation8 + $0x70] sm:$0xf0] }
  0x47   :  { %709 = vmatpush.bf16.msra.mxu3 %v6611_v31  ;;  %v6682_v4 = vld [vmem:[#allocation8 + $0x1c8] sm:$0xf]  ;;  %v9595_v5 = vld [vmem:[#allocation8 + $0x1d4] sm:$0xf0]  ;;  %v9580_v6 = vld [vmem:[#allocation8 + $0x164] sm:$0xf]  ;;  %v6555_v8 = vor.u32 %v9563_v1, %v6554_v0  ;;  %v6503_v9 = vor.u32 %v9548_v62, %v6500_v3 }
  0x48   :  { %274 = vmatpush.bf16.msra.mxu0 %v6387_v15  ;;  %v6628_v7 = vld [vmem:[#allocation8 + $0x170] sm:$0xf0]  ;;  %v6683_v10 = vor.u32 %v9595_v5, %v6682_v4  ;;  %v9544_v12 = vld [vmem:[#allocation8 + $0x44] sm:$0xf]  ;;  %v9565_v28 = vld [vmem:[#allocation8 + $0xec] sm:$0xf] }
  0x49   :  { %287 = vmatpush.bf16.msra.mxu1 %v6391_v20  ;;  %v6631_v11 = vor.u32 %v9580_v6, %v6628_v7  ;;  %v6484_v13 = vld [vmem:[#allocation8 + $0x50] sm:$0xf0]  ;;  %v9576_v14 = vld [vmem:[#allocation8 + $0x144] sm:$0xf]  ;;  %v6572_v29 = vld [vmem:[#allocation8 + $0xf8] sm:$0xf0] }
  0x4a   :  { %697 = vmatpush.bf16.msra.mxu2 %v6467_v42  ;;  %v6612_v15 = vld [vmem:[#allocation8 + $0x150] sm:$0xf0]  ;;  %v6487_v16 = vor.u32 %v9544_v12, %v6484_v13  ;;  %v9540_v18 = vld [vmem:[#allocation8 + $0x24] sm:$0xf]  ;;  %v9597_v30 = vld [vmem:[#allocation8 + $0x1ec] sm:$0xf] }
  0x4b   :  { %275 = vmatmul.bf16.vlgmr.msra.gmra.mxu0 %v164_v27  ;;  %710 = vmatpush.bf16.msra.mxu3 %v6595_v44  ;;  %v6615_v17 = vor.u32 %v9576_v14, %v6612_v15  ;;  %v6468_v19 = vld [vmem:[#allocation8 + $0x30] sm:$0xf0]  ;;  %v9572_v20 = vld [vmem:[#allocation8 + $0x124] sm:$0xf]  ;;  %v6700_v31 = vld [vmem:[#allocation8 + $0x1f8] sm:$0xf0] }
  0x4c   :  { %717 = vmatpush.bf16.msrb.mxu0 %v6567_v21  ;;  %288 = vmatmul.bf16.vlgmr.msra.gmra.mxu1 %v164_v27  ;;  %v6596_v21 = vld [vmem:[#allocation8 + $0x130] sm:$0xf0]  ;;  %v6471_v22 = vor.u32 %v9540_v18, %v6468_v19  ;;  %v9568_v26 = vld [vmem:[#allocation8 + $0x104] sm:$0xf]  ;;  %v6703_v35 = vor.u32 %v9597_v30, %v6700_v31  ;;  %v9561_v36 = vld [vmem:[#allocation8 + $0xcc] sm:$0xf] }
  0x4d   :  { %730 = vmatpush.bf16.msrb.mxu1 %v6695_v24  ;;  %v6599_v23 = vor.u32 %v9572_v20, %v6596_v21  ;;  %v9536_v24 = vld [vmem:[#allocation8 + $0x4] sm:$0xf]  ;;  %v6452_v25 = vld [vmem:[#allocation8 + $0x10] sm:$0xf0]  ;;  %v9593_v38 = vld [vmem:[#allocation8 + $0x1cc] sm:$0xf] }
  0x4e   :  { %698 = vmatpush.bf16.msra.mxu2 %v6451_v58  ;;  %v6580_v27 = vld [vmem:[#allocation8 + $0x110] sm:$0xf0]  ;;  %v6455_v32 = vor.u32 %v9536_v24, %v6452_v25  ;;  %v6684_v39 = vld [vmem:[#allocation8 + $0x1d8] sm:$0xf0]  ;;  %v6538_v42 = vld [vmem:[#allocation8 + $0xa8] sm:$0xf] }
  0x4f   :  { %711 = vmatpush.bf16.msra.mxu3 %v6579_v59  ;;  %v6583_v33 = vor.u32 %v9568_v26, %v6580_v27  ;;  %v6687_v41 = vor.u32 %v9593_v38, %v6684_v39  ;;  %v9559_v43 = vld [vmem:[#allocation8 + $0xb4] sm:$0xf0]  ;;  %v6666_v44 = vld [vmem:[#allocation8 + $0x1a8] sm:$0xf]  ;;  %v9557_v47 = vld [vmem:[#allocation8 + $0xac] sm:$0xf] }
  0x50   :  { %718 = vmatpush.bf16.msrb.mxu0 %v6551_v34  ;;  %v6575_v34 = vor.u32 %v9565_v28, %v6572_v29  ;;  %v6539_v45 = vor.u32 %v9559_v43, %v6538_v42  ;;  %v9591_v46 = vld [vmem:[#allocation8 + $0x1b4] sm:$0xf0]  ;;  %v9589_v51 = vld [vmem:[#allocation8 + $0x1ac] sm:$0xf]  ;;  %v6522_v54 = vld [vmem:[#allocation8 + $0x88] sm:$0xf] }
  0x51   :  { %731 = vmatpush.bf16.msrb.mxu1 %v6679_v37  ;;  %v6556_v37 = vld [vmem:[#allocation8 + $0xd8] sm:$0xf0]  ;;  %v6667_v49 = vor.u32 %v9591_v46, %v6666_v44  ;;  %v9555_v55 = vld [vmem:[#allocation8 + $0x94] sm:$0xf0]  ;;  %v6650_v56 = vld [vmem:[#allocation8 + $0x188] sm:$0xf] }
  0x52   :  { %743 = vmatpush.bf16.msrb.mxu2 %v6571_v60  ;;  %v6559_v40 = vor.u32 %v9561_v36, %v6556_v37  ;;  %v6523_v57 = vor.u32 %v9555_v55, %v6522_v54  ;;  %v9587_v58 = vld [vmem:[#allocation8 + $0x194] sm:$0xf0]  ;;  %v9553_v59 = vld [vmem:[#allocation8 + $0x8c] sm:$0xf]  ;;  %v6524_v60 = vld [vmem:[#allocation8 + $0x98] sm:$0xf0] }
  0x53   :  { %756 = vmatpush.bf16.msrb.mxu3 %v6699_v63  ;;  %v6527_v62 = vor.u32 %v9553_v59, %v6524_v60  ;;  %v9585_v63 = vld [vmem:[#allocation8 + $0x18c] sm:$0xf]  ;;  %v6652_v0 = vld [vmem:[#allocation8 + $0x198] sm:$0xf0]  ;;  %v9551_v3 = vld [vmem:[#allocation8 + $0x74] sm:$0xf0] }
  0x54   :  { %719 = vmatpush.bf16.msrb.mxu0 %v6535_v48  ;;  %v6540_v48 = vld [vmem:[#allocation8 + $0xb8] sm:$0xf0]  ;;  %v6655_v1 = vor.u32 %v9585_v63, %v6652_v0  ;;  %v6634_v4 = vld [vmem:[#allocation8 + $0x168] sm:$0xf]  ;;  %v9583_v6 = vld [vmem:[#allocation8 + $0x174] sm:$0xf0] }
  0x55   :  { %732 = vmatpush.bf16.msrb.mxu1 %v6663_v52  ;;  %v6543_v50 = vor.u32 %v9557_v47, %v6540_v48  ;;  %v6668_v52 = vld [vmem:[#allocation8 + $0x1b8] sm:$0xf0]  ;;  %v9549_v7 = vld [vmem:[#allocation8 + $0x6c] sm:$0xf]  ;;  %v6490_v14 = vld [vmem:[#allocation8 + $0x48] sm:$0xf] }
  0x56   :  { %744 = vmatpush.bf16.msrb.mxu2 %v6555_v8  ;;  %v6671_v53 = vor.u32 %v9589_v51, %v6668_v52  ;;  %v6508_v8 = vld [vmem:[#allocation8 + $0x78] sm:$0xf0]  ;;  %v9547_v15 = vld [vmem:[#allocation8 + $0x54] sm:$0xf0]  ;;  %v9545_v19 = vld [vmem:[#allocation8 + $0x4c] sm:$0xf] }
  0x57   :  { %757 = vmatpush.bf16.msrb.mxu3 %v6683_v10  ;;  %v6511_v10 = vor.u32 %v9549_v7, %v6508_v8  ;;  %v6636_v12 = vld [vmem:[#allocation8 + $0x178] sm:$0xf0]  ;;  %v9579_v18 = vld [vmem:[#allocation8 + $0x154] sm:$0xf0]  ;;  %v6474_v25 = vld [vmem:[#allocation8 + $0x28] sm:$0xf] }
  0x58   :  { %720 = vmatpush.bf16.msrb.mxu0 %v6519_v61  ;;  %v6651_v61 = vor.u32 %v9587_v58, %v6650_v56  ;;  %v6492_v20 = vld [vmem:[#allocation8 + $0x58] sm:$0xf0]  ;;  %v9543_v27 = vld [vmem:[#allocation8 + $0x34] sm:$0xf0]  ;;  %v6602_v28 = vld [vmem:[#allocation8 + $0x128] sm:$0xf] }
  0x59   :  { %733 = vmatpush.bf16.msrb.mxu1 %v6647_v2  ;;  %v6506_v2 = vld [vmem:[#allocation8 + $0x68] sm:$0xf]  ;;  %v6620_v24 = vld [vmem:[#allocation8 + $0x158] sm:$0xf0]  ;;  %v9575_v29 = vld [vmem:[#allocation8 + $0x134] sm:$0xf0]  ;;  %v6475_v30 = vor.u32 %v9543_v27, %v6474_v25 }
  0x5a   :  { %745 = vmatpush.bf16.msrb.mxu2 %v6539_v45  ;;  %v6507_v5 = vor.u32 %v9551_v3, %v6506_v2  ;;  %v9541_v31 = vld [vmem:[#allocation8 + $0x2c] sm:$0xf]  ;;  %v6604_v36 = vld [vmem:[#allocation8 + $0x138] sm:$0xf0]  ;;  %v6458_v37 = vld [vmem:[#allocation8 + $0x8] sm:$0xf] }
  0x5b   :  { %758 = vmatpush.bf16.msrb.mxu3 %v6667_v49  ;;  %v9539_v38 = vld [vmem:[#allocation8 + $0x14] sm:$0xf0]  ;;  %v9537_v42 = vld [vmem:[#allocation8 + $0xc] sm:$0xf]  ;;  %v6460_v43 = vld [vmem:[#allocation8 + $0x18] sm:$0xf0] }
  0x5c   :  { %721 = vmatpush.bf16.msrb.mxu0 %v6503_v9  ;;  %v6635_v9 = vor.u32 %v9583_v6, %v6634_v4  ;;  %v9569_v44 = vld [vmem:[#allocation8 + $0x10c] sm:$0xf]  ;;  %v6588_v45 = vld [vmem:[#allocation8 + $0x118] sm:$0xf0]  ;;  %v6459_v46 = vor.u32 %v9539_v38, %v6458_v37  ;;  %v6463_v48 = vor.u32 %v9537_v42, %v6460_v43  ;;  %v7186_v56 = vld [vmem:[#allocation11 + $0x3c0] sm:$0xf] }
  0x5d   :  { %734 = vmatpush.bf16.msrb.mxu1 %v6631_v11  ;;  %v9581_v11 = vld [vmem:[#allocation8 + $0x16c] sm:$0xf]  ;;  %v6591_v49 = vor.u32 %v9569_v44, %v6588_v45  ;;  %v6930_v58 = vld [vmem:[#allocation11 + $0x1c0] sm:$0xf]  ;;  %s6368_s8 = sshll.u32 %s10608_s6, 4  ;;  %s6370_s13 = sshll.u32 %s10967_s9, 4  ;;  %s6369_s8 = int_to_ptr.vmem [resolvable:$true] %s6368_s8  ;;  %s6371_s13 = int_to_ptr.hbm [resolvable:$true] %s6370_s13 }
  0x5e   :  { %746 = vmatpush.bf16.msrb.mxu2 %v6523_v57  ;;  %v6639_v13 = vor.u32 %v9581_v11, %v6636_v12  ;;  %v9724_v57 = vld [vmem:[#allocation11 + $0x3dc] sm:$0xf0] }
  0x5f   :  { %759 = vmatpush.bf16.msrb.mxu3 %v6651_v61  ;;  %v9660_v60 = vld [vmem:[#allocation11 + $0x1dc] sm:$0xf0]  ;;  %v7187_v4 = vor.u32 %v9724_v57, %v7186_v56 }
  0x60   :  { %722 = vmatpush.bf16.msrb.mxu0 %v6487_v16  ;;  %v6618_v16 = vld [vmem:[#allocation8 + $0x148] sm:$0xf]  ;;  %v7698_v61 = vld [vmem:[#allocation11 + $0x7c0] sm:$0xf]  ;;  %v6931_v7 = vor.u32 %v9660_v60, %v6930_v58 }
  0x61   :  { %735 = vmatpush.bf16.msrb.mxu1 %v6615_v17  ;;  %v6491_v17 = vor.u32 %v9547_v15, %v6490_v14  ;;  %v6619_v21 = vor.u32 %v9579_v18, %v6618_v16  ;;  %v7442_v0 = vld [vmem:[#allocation11 + $0x5c0] sm:$0xf] }
  0x62   :  { %747 = vmatpush.bf16.msrb.mxu2 %v6507_v5  ;;  %v7154_v5 = vld [vmem:[#allocation11 + $0x380] sm:$0xf] }
  0x63   :  { %760 = vmatpush.bf16.msrb.mxu3 %v6635_v9  ;;  %v9716_v6 = vld [vmem:[#allocation11 + $0x39c] sm:$0xf0] }
  0x64   :  { %723 = vmatpush.bf16.msrb.mxu0 %v6471_v22  ;;  %v6495_v22 = vor.u32 %v9545_v19, %v6492_v20  ;;  %v6898_v9 = vld [vmem:[#allocation11 + $0x180] sm:$0xf]  ;;  %v7155_v19 = vor.u32 %v9716_v6, %v7154_v5 }
  0x65   :  { %736 = vmatpush.bf16.msrb.mxu1 %v6599_v23  ;;  %v9577_v23 = vld [vmem:[#allocation8 + $0x14c] sm:$0xf]  ;;  %v7666_v12 = vld [vmem:[#allocation11 + $0x780] sm:$0xf] }
  0x66   :  { %v6623_v26 = vor.u32 %v9577_v23, %v6620_v24  ;;  %748 = vmatpush.bf16.msrb.mxu2 %v6491_v17  ;;  %v9844_v14 = vld [vmem:[#allocation11 + $0x79c] sm:$0xf0] }
  0x67   :  { %761 = vmatpush.bf16.msrb.mxu3 %v6619_v21  ;;  %v7410_v15 = vld [vmem:[#allocation11 + $0x580] sm:$0xf]  ;;  %v7667_v25 = vor.u32 %v9844_v14, %v7666_v12 }
  0x68   :  { %724 = vmatpush.bf16.msrb.mxu0 %v6455_v32  ;;  %v6476_v32 = vld [vmem:[#allocation8 + $0x38] sm:$0xf0]  ;;  %v9780_v16 = vld [vmem:[#allocation11 + $0x59c] sm:$0xf0] }
  0x69   :  { %737 = vmatpush.bf16.msrb.mxu1 %v6583_v33  ;;  %v9573_v33 = vld [vmem:[#allocation8 + $0x12c] sm:$0xf]  ;;  %v7122_v20 = vld [vmem:[#allocation11 + $0x340] sm:$0xf]  ;;  %v7411_v27 = vor.u32 %v9780_v16, %v7410_v15 }
  0x6a   :  { %v6607_v39 = vor.u32 %v9573_v33, %v6604_v36  ;;  %749 = vmatpush.bf16.msrb.mxu2 %v6475_v30  ;;  %v9708_v21 = vld [vmem:[#allocation11 + $0x35c] sm:$0xf0] }
  0x6b   :  { %v6866_v23 = vld [vmem:[#allocation11 + $0x140] sm:$0xf] }
  0x6c   :  { %769 = vmatpush.bf16.msra.mxu0 %v6575_v34  ;;  %v6603_v34 = vor.u32 %v9575_v29, %v6602_v28  ;;  %v9644_v24 = vld [vmem:[#allocation11 + $0x15c] sm:$0xf0] }
  0x6d   :  { %782 = vmatpush.bf16.msra.mxu1 %v6703_v35  ;;  %v6479_v35 = vor.u32 %v9541_v31, %v6476_v32  ;;  %v9836_v28 = vld [vmem:[#allocation11 + $0x75c] sm:$0xf0]  ;;  %v7123_v31 = vor.u32 %v9708_v21, %v7122_v20 }
  0x6e   :  { %762 = vmatpush.bf16.msrb.mxu3 %v6603_v34  ;;  %750 = vmatpush.bf16.msrb.mxu2 %v6459_v46  ;;  %v7378_v29 = vld [vmem:[#allocation11 + $0x540] sm:$0xf]  ;;  %v6867_v34 = vor.u32 %v9644_v24, %v6866_v23  ;;  %v7188_v24 = vld [vmem:[#allocation11 + $0x3e0] sm:$0xf0] }
  0x6f   :  { %v9772_v30 = vld [vmem:[#allocation11 + $0x55c] sm:$0xf0] }
  0x70   :  { %770 = vmatpush.bf16.msra.mxu0 %v6559_v40  ;;  %v6586_v40 = vld [vmem:[#allocation8 + $0x108] sm:$0xf]  ;;  %v7090_v32 = vld [vmem:[#allocation11 + $0x300] sm:$0xf] }
  0x71   :  { %783 = vmatpush.bf16.msra.mxu1 %v6687_v41  ;;  %v9571_v41 = vld [vmem:[#allocation8 + $0x114] sm:$0xf0]  ;;  %v9700_v33 = vld [vmem:[#allocation11 + $0x31c] sm:$0xf0] }
  0x72   :  { %v6587_v47 = vor.u32 %v9571_v41, %v6586_v40  ;;  %v9636_v36 = vld [vmem:[#allocation11 + $0x11c] sm:$0xf0]  ;;  %v7091_v43 = vor.u32 %v9700_v33, %v7090_v32  ;;  %v7700_v32 = vld [vmem:[#allocation11 + $0x7e0] sm:$0xf0] }
  0x73   :  { %v7602_v38 = vld [vmem:[#allocation11 + $0x700] sm:$0xf] }
  0x74   :  { %771 = vmatpush.bf16.msra.mxu0 %v6543_v50  ;;  %763 = vmatpush.bf16.msrb.mxu3 %v6587_v47  ;;  %v181_v50 = vld [vmem:[#allocation7] sm:$0x3]  ;;  %v9828_v40 = vld [vmem:[#allocation11 + $0x71c] sm:$0xf0] }
  0x75   :  { %784 = vmatpush.bf16.msra.mxu1 %v6671_v53  ;;  %v183_v51 = vperm.slane %v181_v50, 0  ;;  %v184_v52 = vperm.slane %v181_v50, 1  ;;  %v7346_v41 = vld [vmem:[#allocation11 + $0x500] sm:$0xf] }
  0x76   :  { %v9764_v42 = vld [vmem:[#allocation11 + $0x51c] sm:$0xf0] }
  0x77   :  { %v7058_v44 = vld [vmem:[#allocation11 + $0x2c0] sm:$0xf] }
  0x78   :  { %772 = vmatpush.bf16.msra.mxu0 %v6527_v62  ;;  %v9852_v62 = vld [vmem:[#allocation11 + $0x7dc] sm:$0xf0] }
  0x79   :  { %785 = vmatpush.bf16.msra.mxu1 %v6655_v1  ;;  %v9788_v1 = vld [vmem:[#allocation11 + $0x5dc] sm:$0xf0]  ;;  %v7699_v11 = vor.u32 %v9852_v62, %v7698_v61 }
  0x7a   :  { %v9692_v45 = vld [vmem:[#allocation11 + $0x2dc] sm:$0xf0] }
  0x7b   :  { %v6802_v47 = vld [vmem:[#allocation11 + $0xc0] sm:$0xf] }
  0x7c   :  { %773 = vmatpush.bf16.msra.mxu0 %v6511_v10  ;;  %v9652_v10 = vld [vmem:[#allocation11 + $0x19c] sm:$0xf0] }
  0x7d   :  { %786 = vmatpush.bf16.msra.mxu1 %v6639_v13  ;;  %v7443_v13 = vor.u32 %v9788_v1, %v7442_v0  ;;  %v7570_v50 = vld [vmem:[#allocation11 + $0x6c0] sm:$0xf] }
  0x7e   :  { %v7026_v56 = vld [vmem:[#allocation11 + $0x280] sm:$0xf] }
  0x7f   :  { %v9684_v57 = vld [vmem:[#allocation11 + $0x29c] sm:$0xf0] }
  0x80   :  { %774 = vmatpush.bf16.msra.mxu0 %v6495_v22  ;;  %v6899_v22 = vor.u32 %v9652_v10, %v6898_v9  ;;  %v9620_v60 = vld [vmem:[#allocation11 + $0x9c] sm:$0xf0] }
  0x81   :  { %787 = vmatpush.bf16.msra.mxu1 %v6623_v26  ;;  %v7634_v26 = vld [vmem:[#allocation11 + $0x740] sm:$0xf] }
  0x82   :  { %v7635_v37 = vor.u32 %v9836_v28, %v7634_v26  ;;  %v7538_v62 = vld [vmem:[#allocation11 + $0x680] sm:$0xf]  ;;  %v6932_v26 = vld [vmem:[#allocation11 + $0x1e0] sm:$0xf0] }
  0x83   :  { %v9812_v0 = vld [vmem:[#allocation11 + $0x69c] sm:$0xf0] }
  0x84   :  { %775 = vmatpush.bf16.msra.mxu0 %v6479_v35  ;;  %v6834_v35 = vld [vmem:[#allocation11 + $0x100] sm:$0xf] }
  0x85   :  { %788 = vmatpush.bf16.msra.mxu1 %v6607_v39  ;;  %v7379_v39 = vor.u32 %v9772_v30, %v7378_v29  ;;  %v6835_v46 = vor.u32 %v9636_v36, %v6834_v35  ;;  %v7282_v1 = vld [vmem:[#allocation11 + $0x480] sm:$0xf]  ;;  %v7156_v36 = vld [vmem:[#allocation11 + $0x3a0] sm:$0xf0] }
  0x86   :  { %v6994_v5 = vld [vmem:[#allocation11 + $0x240] sm:$0xf] }
  0x87   :  { %v9676_v6 = vld [vmem:[#allocation11 + $0x25c] sm:$0xf0] }
  0x88   :  { %776 = vmatpush.bf16.msra.mxu0 %v6463_v48  ;;  %v9628_v48 = vld [vmem:[#allocation11 + $0xdc] sm:$0xf0]  ;;  %v6995_v16 = vor.u32 %v9676_v6, %v6994_v5  ;;  %v6804_v5 = vld [vmem:[#allocation11 + $0xe0] sm:$0xf0] }
  0x89   :  { %789 = vmatpush.bf16.msra.mxu1 %v6591_v49  ;;  %v7603_v49 = vor.u32 %v9828_v40, %v7602_v38  ;;  %v6803_v58 = vor.u32 %v9628_v48, %v6802_v47  ;;  %v6738_v9 = vld [vmem:[#allocation11 + $0x40] sm:$0xf]  ;;  %v6900_v38 = vld [vmem:[#allocation11 + $0x1a0] sm:$0xf0] }
  0x8a   :  { %v9612_v10 = vld [vmem:[#allocation11 + $0x5c] sm:$0xf0]  ;;  %v9696_v48 = vld [vmem:[#allocation11 + $0x304] sm:$0xf] }
  0x8b   :  { %v7506_v12 = vld [vmem:[#allocation11 + $0x640] sm:$0xf]  ;;  %v9784_v6 = vld [vmem:[#allocation11 + $0x5c4] sm:$0xf] }
  0x8c   :  { %v7250_v14 = vld [vmem:[#allocation11 + $0x440] sm:$0xf] }
  0x8d   :  { %v9740_v15 = vld [vmem:[#allocation11 + $0x45c] sm:$0xf0] }
  0x8e   :  { %v6706_v20 = vld [vmem:[#allocation11] sm:$0xf]  ;;  %v7251_v23 = vor.u32 %v9740_v15, %v7250_v14  ;;  %v7636_v14 = vld [vmem:[#allocation11 + $0x760] sm:$0xf0] }
  0x8f   :  { %v9604_v21 = vld [vmem:[#allocation11 + $0x1c] sm:$0xf0] }
  0x90   :  { %v9796_v28 = vld [vmem:[#allocation11 + $0x61c] sm:$0xf0]  ;;  %v6707_v30 = vor.u32 %v9604_v21, %v6706_v20  ;;  %v9664_v21 = vld [vmem:[#allocation11 + $0x204] sm:$0xf] }
  0xc8   :  { %v276_v53 = vpop.f32.mrf.mxu0 }
  0xc9   :  { %v277_v54 = vadd.f32 %v276_v53, %v183_v51  ;;  %v289_v55 = vpop.f32.mrf.mxu1  ;;  %v7347_v51 = vor.u32 %v9764_v42, %v7346_v41  ;;  %v7314_v53 = vld [vmem:[#allocation11 + $0x4c0] sm:$0xf]  ;;  %v9704_v42 = vld [vmem:[#allocation11 + $0x344] sm:$0xf] }
  0xca   :  { %v290_v59 = vadd.f32 %v289_v55, %v184_v52  ;;  %v9820_v52 = vld [vmem:[#allocation11 + $0x6dc] sm:$0xf0]  ;;  %v7059_v55 = vor.u32 %v9692_v45, %v7058_v44  ;;  %v7124_v44 = vld [vmem:[#allocation11 + $0x360] sm:$0xf0] }
  0xcb   :  { %v293_v63 = vmax.f32 %v277_v54, 0.0  ;;  %v9756_v54 = vld [vmem:[#allocation11 + $0x4dc] sm:$0xf0]  ;;  %v7571_v61 = vor.u32 %v9820_v52, %v7570_v50  ;;  %v9640_v45 = vld [vmem:[#allocation11 + $0x144] sm:$0xf]  ;;  %v7127_v47 = vor.u32 %v9704_v42, %v7124_v44 }
  0xcc   :  { %v294_v2 = vmax.f32 %v290_v59, 0.0  ;;  %v6770_v59 = vld [vmem:[#allocation11 + $0x80] sm:$0xf]  ;;  %v7092_v50 = vld [vmem:[#allocation11 + $0x320] sm:$0xf0] }
  0xcd   :  { %v10686_v3 = vpack.c.bf16 %v293_v63, %v293_v63  ;;  %v7315_v63 = vor.u32 %v9756_v54, %v7314_v53  ;;  %v6836_v52 = vld [vmem:[#allocation11 + $0x120] sm:$0xf0]  ;;  %v7095_v53 = vor.u32 %v9696_v48, %v7092_v50 }
  0xce   :  { %v10688_v8 = vpack.c.bf16 %v294_v2, %v294_v2  ;;  %v9748_v2 = vld [vmem:[#allocation11 + $0x49c] sm:$0xf0]  ;;  %v9808_v42 = vld [vmem:[#allocation11 + $0x684] sm:$0xf] }
  0xcf   :  { %699 = vmatmul.bf16.vlgmr.msra.gmra.mxu2 %v10686_v3  ;;  %725 = vmatmul.bf16.vlgmr.msrb.gmra.mxu0 %v10686_v3  ;;  %v9800_v48 = vld [vmem:[#allocation11 + $0x644] sm:$0xf] }
  0xd0   :  { %712 = vmatmul.bf16.vlgmr.msra.gmra.mxu3 %v10688_v8  ;;  %738 = vmatmul.bf16.vlgmr.msrb.gmra.mxu1 %v10688_v8  ;;  %v278_v17 = vpop.f32.mrf.mxu0 }
  0xd1   :  { %v291_v18 = vpop.f32.mrf.mxu1  ;;  %2370 = vmatpush.bf16.msra.mxu3 %v7187_v4  ;;  %2357 = vmatpush.bf16.msra.mxu2 %v6931_v7  ;;  %v7027_v4 = vor.u32 %v9684_v57, %v7026_v56  ;;  %v6771_v7 = vor.u32 %v9620_v60, %v6770_v59  ;;  %v9668_v17 = vld [vmem:[#allocation11 + $0x21c] sm:$0xf0]  ;;  %v7060_v56 = vld [vmem:[#allocation11 + $0x2e0] sm:$0xf0] }
  0xd2   :  { %2396 = vmatpush.bf16.msrb.mxu1 %v7699_v11  ;;  %2383 = vmatpush.bf16.msrb.mxu0 %v7443_v13  ;;  %v7539_v11 = vor.u32 %v9812_v0, %v7538_v62  ;;  %v9804_v13 = vld [vmem:[#allocation11 + $0x65c] sm:$0xf0]  ;;  %v6739_v18 = vor.u32 %v9612_v10, %v6738_v9  ;;  %v7028_v59 = vld [vmem:[#allocation11 + $0x2a0] sm:$0xf0] }
  0xd3   :  { %v9840_v60 = vld [vmem:[#allocation11 + $0x784] sm:$0xf]  ;;  %v9732_v0 = vld [vmem:[#allocation11 + $0x41c] sm:$0xf0] }
  0xd4   :  { %v7668_v62 = vld [vmem:[#allocation11 + $0x7a0] sm:$0xf0] }
  0xd5   :  { %2371 = vmatpush.bf16.msra.mxu3 %v7155_v19  ;;  %2358 = vmatpush.bf16.msra.mxu2 %v6899_v22  ;;  %v9720_v19 = vld [vmem:[#allocation11 + $0x3c4] sm:$0xf]  ;;  %v7507_v22 = vor.u32 %v9804_v13, %v7506_v12 }
  0xd6   :  { %2397 = vmatpush.bf16.msrb.mxu1 %v7667_v25  ;;  %2384 = vmatpush.bf16.msrb.mxu0 %v7411_v27  ;;  %v9656_v25 = vld [vmem:[#allocation11 + $0x1c4] sm:$0xf]  ;;  %v7474_v27 = vld [vmem:[#allocation11 + $0x600] sm:$0xf]  ;;  %v7191_v33 = vor.u32 %v9720_v19, %v7188_v24 }
  0xd7   :  { %v6935_v35 = vor.u32 %v9656_v25, %v6932_v26  ;;  %v7444_v9 = vld [vmem:[#allocation11 + $0x5e0] sm:$0xf0] }
  0xd8   :  { %v7447_v10 = vor.u32 %v9784_v6, %v7444_v9  ;;  %v6996_v12 = vld [vmem:[#allocation11 + $0x260] sm:$0xf0]  ;;  %v9725_v9 = vld [vmem:[#allocation11 + $0x3e4] sm:$0xf0] }
  0xd9   :  { %2372 = vmatpush.bf16.msra.mxu3 %v7123_v31  ;;  %2359 = vmatpush.bf16.msra.mxu2 %v6867_v34  ;;  %v9848_v31 = vld [vmem:[#allocation11 + $0x7c4] sm:$0xf] }
  0xda   :  { %2398 = vmatpush.bf16.msrb.mxu1 %v7635_v37  ;;  %2385 = vmatpush.bf16.msrb.mxu0 %v7379_v39  ;;  %v9712_v34 = vld [vmem:[#allocation11 + $0x384] sm:$0xf]  ;;  %v7475_v39 = vor.u32 %v9796_v28, %v7474_v27  ;;  %v7703_v40 = vor.u32 %v9848_v31, %v7700_v32 }
  0xdb   :  { %v9648_v37 = vld [vmem:[#allocation11 + $0x184] sm:$0xf]  ;;  %v7159_v41 = vor.u32 %v9712_v34, %v7156_v36 }
  0xdc   :  { %v7412_v19 = vld [vmem:[#allocation11 + $0x5a0] sm:$0xf0] }
  0xdd   :  { %2373 = vmatpush.bf16.msra.mxu3 %v7091_v43  ;;  %2360 = vmatpush.bf16.msra.mxu2 %v6835_v46  ;;  %v6903_v43 = vor.u32 %v9648_v37, %v6900_v38  ;;  %v6868_v46 = vld [vmem:[#allocation11 + $0x160] sm:$0xf0] }
  0xde   :  { %2399 = vmatpush.bf16.msrb.mxu1 %v7603_v49  ;;  %2386 = vmatpush.bf16.msrb.mxu0 %v7347_v51  ;;  %v6871_v49 = vor.u32 %v9640_v45, %v6868_v46  ;;  %v9632_v51 = vld [vmem:[#allocation11 + $0x104] sm:$0xf] }
  0xdf   :  { %751 = vmatmul.bf16.vlgmr.msrb.gmra.mxu2 %v10686_v3  ;;  %777 = vmatmul.bf16.vlgmr.msra.gmra.mxu0 %v10686_v3  ;;  %v7283_v3 = vor.u32 %v9748_v2, %v7282_v1  ;;  %v6839_v54 = vor.u32 %v9632_v51, %v6836_v52  ;;  %v7671_v1 = vor.u32 %v9840_v60, %v7668_v62  ;;  %v9824_v24 = vld [vmem:[#allocation11 + $0x704] sm:$0xf]  ;;  %v10698_v60 = vld [vmem:[#allocation10] sm:$0xf] }
  0xe0   :  { %764 = vmatmul.bf16.vlgmr.msrb.gmra.mxu3 %v10688_v8  ;;  %790 = vmatmul.bf16.vlgmr.msra.gmra.mxu1 %v10688_v8  ;;  %v6962_v8 = vld [vmem:[#allocation11 + $0x200] sm:$0xf]  ;;  %v7604_v25 = vld [vmem:[#allocation11 + $0x720] sm:$0xf0]  ;;  %v363_v6 = vperm.slane %v10698_v60, 0 }
  0xe1   :  { %2374 = vmatpush.bf16.msra.mxu3 %v7059_v55  ;;  %2361 = vmatpush.bf16.msra.mxu2 %v6803_v58  ;;  %v6963_v29 = vor.u32 %v9668_v17, %v6962_v8  ;;  %v9688_v55 = vld [vmem:[#allocation11 + $0x2c4] sm:$0xf]  ;;  %v7607_v26 = vor.u32 %v9824_v24, %v7604_v25  ;;  %v9709_v24 = vld [vmem:[#allocation11 + $0x364] sm:$0xf0] }
  0xe2   :  { %2400 = vmatpush.bf16.msrb.mxu1 %v7571_v61  ;;  %2387 = vmatpush.bf16.msrb.mxu0 %v7315_v63  ;;  %v7063_v57 = vor.u32 %v9688_v55, %v7060_v56  ;;  %v9680_v58 = vld [vmem:[#allocation11 + $0x284] sm:$0xf]  ;;  %v7218_v63 = vld [vmem:[#allocation11 + $0x400] sm:$0xf] }
  0xe3   :  { %v7031_v61 = vor.u32 %v9680_v58, %v7028_v59  ;;  %v7219_v2 = vor.u32 %v9732_v0, %v7218_v63  ;;  %v6772_v8 = vld [vmem:[#allocation11 + $0xa0] sm:$0xf0]  ;;  %v364_v63 = vperm.slane %v10698_v60, 1 }
  0xe4   :  { %v9776_v17 = vld [vmem:[#allocation11 + $0x584] sm:$0xf] }
  0xe5   :  { %2375 = vmatpush.bf16.msra.mxu3 %v7027_v4  ;;  %2362 = vmatpush.bf16.msra.mxu2 %v6771_v7  ;;  %v9624_v4 = vld [vmem:[#allocation11 + $0xc4] sm:$0xf]  ;;  %v7415_v20 = vor.u32 %v9776_v17, %v7412_v19  ;;  %v6938_v19 = vld [vmem:[#allocation11 + $0x1c8] sm:$0xf] }
  0xe6   :  { %2401 = vmatpush.bf16.msrb.mxu1 %v7539_v11  ;;  %2388 = vmatpush.bf16.msrb.mxu0 %v7283_v3  ;;  %v6807_v7 = vor.u32 %v9624_v4, %v6804_v5  ;;  %v9672_v11 = vld [vmem:[#allocation11 + $0x244] sm:$0xf] }
  0xe7   :  { %v9832_v3 = vld [vmem:[#allocation11 + $0x744] sm:$0xf]  ;;  %v6999_v13 = vor.u32 %v9672_v11, %v6996_v12 }
  0xe8   :  { %v7639_v15 = vor.u32 %v9832_v3, %v7636_v14  ;;  %v9608_v27 = vld [vmem:[#allocation11 + $0x44] sm:$0xf] }
  0xe9   :  { %2376 = vmatpush.bf16.msra.mxu3 %v6995_v16  ;;  %2363 = vmatpush.bf16.msra.mxu2 %v6739_v18  ;;  %v9616_v16 = vld [vmem:[#allocation11 + $0x84] sm:$0xf] }
  0xea   :  { %2402 = vmatpush.bf16.msrb.mxu1 %v7507_v22  ;;  %2389 = vmatpush.bf16.msrb.mxu0 %v7251_v23  ;;  %v6775_v18 = vor.u32 %v9616_v16, %v6772_v8  ;;  %v6964_v22 = vld [vmem:[#allocation11 + $0x220] sm:$0xf0]  ;;  %v9717_v16 = vld [vmem:[#allocation11 + $0x3a4] sm:$0xf0] }
  0xeb   :  { %v6967_v23 = vor.u32 %v9664_v21, %v6964_v22  ;;  %v6740_v28 = vld [vmem:[#allocation11 + $0x60] sm:$0xf0] }
  0xec   :  { %v7380_v31 = vld [vmem:[#allocation11 + $0x560] sm:$0xf0] }
  0xed   :  { %2377 = vmatpush.bf16.msra.mxu3 %v6963_v29  ;;  %2364 = vmatpush.bf16.msra.mxu2 %v6707_v30  ;;  %v6743_v29 = vor.u32 %v9608_v27, %v6740_v28  ;;  %v9768_v30 = vld [vmem:[#allocation11 + $0x544] sm:$0xf]  ;;  %v366_v27 = vperm.slane %v10698_v60, 3  ;;  %v6906_v28 = vld [vmem:[#allocation11 + $0x188] sm:$0xf] }
  0xee   :  { %2403 = vmatpush.bf16.msrb.mxu1 %v7475_v39  ;;  %2390 = vmatpush.bf16.msrb.mxu0 %v7219_v2  ;;  %v7383_v32 = vor.u32 %v9768_v30, %v7380_v31  ;;  %v7572_v34 = vld [vmem:[#allocation11 + $0x6e0] sm:$0xf0] }
  0xef   :  { %v9600_v36 = vld [vmem:[#allocation11 + $0x4] sm:$0xf] }
  0xf0   :  { %v6708_v37 = vld [vmem:[#allocation11 + $0x20] sm:$0xf0] }
  0xf1   :  { %2422 = vmatpush.bf16.msrb.mxu3 %v7191_v33  ;;  %2409 = vmatpush.bf16.msrb.mxu2 %v6935_v35  ;;  %v9816_v33 = vld [vmem:[#allocation11 + $0x6c4] sm:$0xf]  ;;  %v6711_v39 = vor.u32 %v9600_v36, %v6708_v37 }
  0xf2   :  { %2448 = vmatpush.bf16.msra.mxu1 %v7703_v40  ;;  %2435 = vmatpush.bf16.msra.mxu0 %v7447_v10  ;;  %v7575_v35 = vor.u32 %v9816_v33, %v7572_v34  ;;  %v9760_v38 = vld [vmem:[#allocation11 + $0x504] sm:$0xf]  ;;  %v7098_v33 = vld [vmem:[#allocation11 + $0x308] sm:$0xf] }
  0xf3   :  { %v7348_v40 = vld [vmem:[#allocation11 + $0x520] sm:$0xf0]  ;;  %v9701_v34 = vld [vmem:[#allocation11 + $0x324] sm:$0xf0] }
  0xf4   :  { %v9752_v45 = vld [vmem:[#allocation11 + $0x4c4] sm:$0xf] }
  0xf5   :  { %2423 = vmatpush.bf16.msrb.mxu3 %v7159_v41  ;;  %2410 = vmatpush.bf16.msrb.mxu2 %v6903_v43  ;;  %v7351_v41 = vor.u32 %v9760_v38, %v7348_v40  ;;  %v7540_v43 = vld [vmem:[#allocation11 + $0x6a0] sm:$0xf0]  ;;  %v9645_v40 = vld [vmem:[#allocation11 + $0x164] sm:$0xf0] }
  0xf6   :  { %2449 = vmatpush.bf16.msra.mxu1 %v7671_v1  ;;  %2436 = vmatpush.bf16.msra.mxu0 %v7415_v20  ;;  %v7543_v44 = vor.u32 %v9808_v42, %v7540_v43  ;;  %v7316_v46 = vld [vmem:[#allocation11 + $0x4e0] sm:$0xf0]  ;;  %v9661_v20 = vld [vmem:[#allocation11 + $0x1e4] sm:$0xf0]  ;;  %v365_v42 = vperm.slane %v10698_v60, 2 }
  0xf7   :  { %v9744_v51 = vld [vmem:[#allocation11 + $0x484] sm:$0xf]  ;;  %v6939_v25 = vor.u32 %v9661_v20, %v6938_v19  ;;  %v7066_v43 = vld [vmem:[#allocation11 + $0x2c8] sm:$0xf] }
  0xf8   :  { %v7284_v52 = vld [vmem:[#allocation11 + $0x4a0] sm:$0xf0]  ;;  %v7674_v60 = vld [vmem:[#allocation11 + $0x788] sm:$0xf] }
  0xf9   :  { %2424 = vmatpush.bf16.msrb.mxu3 %v7127_v47  ;;  %2411 = vmatpush.bf16.msrb.mxu2 %v6871_v49  ;;  %v7319_v47 = vor.u32 %v9752_v45, %v7316_v46  ;;  %v7508_v49 = vld [vmem:[#allocation11 + $0x660] sm:$0xf0]  ;;  %v9693_v45 = vld [vmem:[#allocation11 + $0x2e4] sm:$0xf0] }
  0xfa   :  { %2450 = vmatpush.bf16.msra.mxu1 %v7639_v15  ;;  %2437 = vmatpush.bf16.msra.mxu0 %v7383_v32  ;;  %v7511_v50 = vor.u32 %v9800_v48, %v7508_v49  ;;  %v7476_v55 = vld [vmem:[#allocation11 + $0x620] sm:$0xf0]  ;;  %v7162_v15 = vld [vmem:[#allocation11 + $0x388] sm:$0xf] }
  0xfb   :  { %v7252_v58 = vld [vmem:[#allocation11 + $0x460] sm:$0xf0]  ;;  %v7163_v21 = vor.u32 %v9717_v16, %v7162_v15  ;;  %v7706_v46 = vld [vmem:[#allocation11 + $0x7c8] sm:$0xf] }
  0xfc   :  { %v7220_v62 = vld [vmem:[#allocation11 + $0x420] sm:$0xf0]  ;;  %v7418_v19 = vld [vmem:[#allocation11 + $0x588] sm:$0xf] }
  0xfd   :  { %2425 = vmatpush.bf16.msrb.mxu3 %v7095_v53  ;;  %2412 = vmatpush.bf16.msrb.mxu2 %v6839_v54  ;;  %v7287_v53 = vor.u32 %v9744_v51, %v7284_v52  ;;  %v9792_v54 = vld [vmem:[#allocation11 + $0x604] sm:$0xf]  ;;  %v9637_v51 = vld [vmem:[#allocation11 + $0x124] sm:$0xf0] }
  0xfe   :  { %2451 = vmatpush.bf16.msra.mxu1 %v7607_v26  ;;  %2438 = vmatpush.bf16.msra.mxu0 %v7351_v41  ;;  %v7479_v56 = vor.u32 %v9792_v54, %v7476_v55  ;;  %v7099_v41 = vor.u32 %v9701_v34, %v7098_v33  ;;  %v7034_v55 = vld [vmem:[#allocation11 + $0x288] sm:$0xf]  ;;  %v7196_v33 = vld [vmem:[#allocation11 + $0x3e8] sm:$0xf0] }
  0xff   :  { %v9781_v20 = vld [vmem:[#allocation11 + $0x5a4] sm:$0xf0] }
 0x100   :  { %v6746_v34 = vld [vmem:[#allocation11 + $0x48] sm:$0xf] }
 0x101   :  { %2426 = vmatpush.bf16.msrb.mxu3 %v7063_v57  ;;  %2413 = vmatpush.bf16.msrb.mxu2 %v6807_v7  ;;  %v9736_v57 = vld [vmem:[#allocation11 + $0x444] sm:$0xf]  ;;  %v7194_v7 = vld [vmem:[#allocation11 + $0x3c8] sm:$0xf] }
 0x102   :  { %2452 = vmatpush.bf16.msra.mxu1 %v7575_v35  ;;  %2439 = vmatpush.bf16.msra.mxu0 %v7319_v47  ;;  %v7255_v59 = vor.u32 %v9736_v57, %v7252_v58  ;;  %v7195_v12 = vor.u32 %v9725_v9, %v7194_v7  ;;  %v9853_v47 = vld [vmem:[#allocation11 + $0x7e4] sm:$0xf0] }
 0x103   :  { %v7707_v54 = vor.u32 %v9853_v47, %v7706_v46  ;;  %v7164_v46 = vld [vmem:[#allocation11 + $0x3a8] sm:$0xf0]  ;;  %v6714_v47 = vld [vmem:[#allocation11 + $0x8] sm:$0xf] }
 0x105   :  { %2427 = vmatpush.bf16.msrb.mxu3 %v7031_v61  ;;  %2414 = vmatpush.bf16.msrb.mxu2 %v6775_v18  ;;  %v9728_v61 = vld [vmem:[#allocation11 + $0x404] sm:$0xf] }
 0x106   :  { %2453 = vmatpush.bf16.msra.mxu1 %v7543_v44  ;;  %2440 = vmatpush.bf16.msra.mxu0 %v7287_v53  ;;  %v7223_v0 = vor.u32 %v9728_v61, %v7220_v62  ;;  %v7067_v53 = vor.u32 %v9693_v45, %v7066_v43  ;;  %v9845_v61 = vld [vmem:[#allocation11 + $0x7a4] sm:$0xf0]  ;;  %v9713_v45 = vld [vmem:[#allocation11 + $0x38c] sm:$0xf] }
 0x107   :  { %v7675_v9 = vor.u32 %v9845_v61, %v7674_v60  ;;  %v9705_v60 = vld [vmem:[#allocation11 + $0x34c] sm:$0xf] }
 0x108   :  { %v7132_v61 = vld [vmem:[#allocation11 + $0x368] sm:$0xf0] }
 0x109   :  { %2428 = vmatpush.bf16.msrb.mxu3 %v6999_v13  ;;  %2415 = vmatpush.bf16.msrb.mxu2 %v6743_v29  ;;  %v9653_v29 = vld [vmem:[#allocation11 + $0x1a4] sm:$0xf0] }
 0x10a   :  { %2454 = vmatpush.bf16.msra.mxu1 %v7511_v50  ;;  %2441 = vmatpush.bf16.msra.mxu0 %v7255_v59  ;;  %v6907_v36 = vor.u32 %v9653_v29, %v6906_v28  ;;  %v6842_v50 = vld [vmem:[#allocation11 + $0x108] sm:$0xf] }
 0x10b   :  { %v9685_v59 = vld [vmem:[#allocation11 + $0x2a4] sm:$0xf0] }
 0x10c   :  { %v7035_v7 = vor.u32 %v9685_v59, %v7034_v55  ;;  %v7610_v28 = vld [vmem:[#allocation11 + $0x708] sm:$0xf] }
 0x10d   :  { %2429 = vmatpush.bf16.msrb.mxu3 %v6967_v23  ;;  %2416 = vmatpush.bf16.msrb.mxu2 %v6711_v39  ;;  %v7130_v23 = vld [vmem:[#allocation11 + $0x348] sm:$0xf] }
 0x10e   :  { %2455 = vmatpush.bf16.msra.mxu1 %v7479_v56  ;;  %2442 = vmatpush.bf16.msra.mxu0 %v7223_v0  ;;  %v7131_v31 = vor.u32 %v9709_v24, %v7130_v23  ;;  %v6874_v39 = vld [vmem:[#allocation11 + $0x148] sm:$0xf] }
 0x10f   :  { %v6875_v48 = vor.u32 %v9645_v40, %v6874_v39  ;;  %v6810_v0 = vld [vmem:[#allocation11 + $0xc8] sm:$0xf] }
 0x110   :  { %v6970_v24 = vld [vmem:[#allocation11 + $0x208] sm:$0xf] }
 0x111   :  { %v9829_v29 = vld [vmem:[#allocation11 + $0x724] sm:$0xf0] }
 0x112   :  { %v7611_v39 = vor.u32 %v9829_v29, %v7610_v28  ;;  %v7546_v55 = vld [vmem:[#allocation11 + $0x688] sm:$0xf] }
 0x113   :  { %v7258_v28 = vld [vmem:[#allocation11 + $0x448] sm:$0xf] }
 0x114   :  { %v9741_v29 = vld [vmem:[#allocation11 + $0x464] sm:$0xf0] }
 0x14c   :  { %v726_v1 = vpop.f32.mrf.mxu0 }
 0x14d   :  { %v727_v2 = vadd.f32 %v726_v1, %v364_v63  ;;  %v739_v4 = vpop.f32.mrf.mxu1  ;;  %v6843_v63 = vor.u32 %v9637_v51, %v6842_v50  ;;  %v9765_v50 = vld [vmem:[#allocation11 + $0x524] sm:$0xf0] }
 0x14f   :  { %v740_v5 = vadd.f32 %v739_v4, %v727_v2  ;;  %v9629_v4 = vld [vmem:[#allocation11 + $0xe4] sm:$0xf0] }
 0x150   :  { %v6811_v15 = vor.u32 %v9629_v4, %v6810_v0  ;;  %v9757_v0 = vld [vmem:[#allocation11 + $0x4e4] sm:$0xf0]  ;;  %v6908_v4 = vld [vmem:[#allocation11 + $0x1a8] sm:$0xf0] }
 0x151   :  { %v796_v10 = vmax.f32 %v740_v5, 0.0  ;;  %v7450_v5 = vld [vmem:[#allocation11 + $0x5c8] sm:$0xf] }
 0x152   :  { %v700_v11 = vpop.f32.mrf.mxu2 }
 0x153   :  { %v10702_v3 = vpack.c.bf16 %v796_v10, %v796_v10  ;;  %v701_v13 = vadd.f32 %v700_v11, %v363_v6  ;;  %v713_v14 = vpop.f32.mrf.mxu3  ;;  %v9789_v6 = vld [vmem:[#allocation11 + $0x5e4] sm:$0xf0] }
 0x154   :  { %v728_v8 = vpop.f32.mrf.mxu0  ;;  %v7002_v10 = vld [vmem:[#allocation11 + $0x248] sm:$0xf]  ;;  %v7451_v16 = vor.u32 %v9789_v6, %v7450_v5  ;;  %v7135_v5 = vor.u32 %v9705_v60, %v7132_v61  ;;  %v7420_v60 = vld [vmem:[#allocation11 + $0x5a8] sm:$0xf0] }
 0x155   :  { %v714_v17 = vadd.f32 %v713_v14, %v701_v13  ;;  %v741_v18 = vpop.f32.mrf.mxu1  ;;  %2378 = vmatmul.bf16.vlgmr.msra.gmra.mxu3 %v10702_v3  ;;  %v9677_v11 = vld [vmem:[#allocation11 + $0x264] sm:$0xf0] }
 0x156   :  { %2474 = vmatpush.bf16.msra.mxu3 %v7195_v12  ;;  %v7642_v13 = vld [vmem:[#allocation11 + $0x748] sm:$0xf] }
 0x157   :  { %v795_v22 = vmax.f32 %v714_v17, 0.0  ;;  %v9837_v14 = vld [vmem:[#allocation11 + $0x764] sm:$0xf0] }
 0x158   :  { %v6778_v8 = vld [vmem:[#allocation11 + $0x88] sm:$0xf]  ;;  %v7643_v23 = vor.u32 %v9837_v14, %v7642_v13 }
 0x159   :  { %v10705_v26 = vpack.c.bf16 %v795_v22, %v795_v22  ;;  %v9621_v18 = vld [vmem:[#allocation11 + $0xa4] sm:$0xf0]  ;;  %v7003_v22 = vor.u32 %v9677_v11, %v7002_v10  ;;  %v9697_v10 = vld [vmem:[#allocation11 + $0x30c] sm:$0xf] }
 0x15a   :  { %2475 = vmatpush.bf16.msra.mxu3 %v7163_v21  ;;  %v702_v30 = vpop.f32.mrf.mxu2  ;;  %v7514_v6 = vld [vmem:[#allocation11 + $0x648] sm:$0xf]  ;;  %v7100_v11 = vld [vmem:[#allocation11 + $0x328] sm:$0xf0] }
 0x15b   :  { %v715_v32 = vpop.f32.mrf.mxu3  ;;  %2365 = vmatmul.bf16.vlgmr.msra.gmra.mxu2 %v10705_v26  ;;  %v6779_v30 = vor.u32 %v9621_v18, %v6778_v8  ;;  %v7290_v13 = vld [vmem:[#allocation11 + $0x488] sm:$0xf]  ;;  %v6876_v8 = vld [vmem:[#allocation11 + $0x168] sm:$0xf0]  ;;  %v7103_v18 = vor.u32 %v9697_v10, %v7100_v11 }
 0x15c   :  { %2461 = vmatpush.bf16.msra.mxu2 %v6939_v25  ;;  %v778_v35 = vpop.f32.mrf.mxu0  ;;  %v9721_v32 = vld [vmem:[#allocation11 + $0x3cc] sm:$0xf]  ;;  %v9749_v14 = vld [vmem:[#allocation11 + $0x4a4] sm:$0xf0] }
 0x15d   :  { %v779_v37 = vadd.f32 %v778_v35, %v366_v27  ;;  %v791_v38 = vpop.f32.mrf.mxu1  ;;  %v9669_v27 = vld [vmem:[#allocation11 + $0x224] sm:$0xf0]  ;;  %v7199_v40 = vor.u32 %v9721_v32, %v7196_v33  ;;  %v6844_v32 = vld [vmem:[#allocation11 + $0x128] sm:$0xf0] }
 0x15e   :  { %2476 = vmatpush.bf16.msra.mxu3 %v7131_v31  ;;  %v7419_v31 = vor.u32 %v9781_v20, %v7418_v19  ;;  %v9613_v35 = vld [vmem:[#allocation11 + $0x64] sm:$0xf0]  ;;  %v6748_v10 = vld [vmem:[#allocation11 + $0x68] sm:$0xf0] }
 0x15f   :  { %v792_v44 = vadd.f32 %v791_v38, %v779_v37  ;;  %v9773_v37 = vld [vmem:[#allocation11 + $0x564] sm:$0xf0]  ;;  %v6971_v38 = vor.u32 %v9669_v27, %v6970_v24  ;;  %v6747_v43 = vor.u32 %v9613_v35, %v6746_v34  ;;  %v9849_v24 = vld [vmem:[#allocation11 + $0x7cc] sm:$0xf] }
 0x160   :  { %2462 = vmatpush.bf16.msra.mxu2 %v6907_v36  ;;  %v7386_v36 = vld [vmem:[#allocation11 + $0x548] sm:$0xf]  ;;  %v9681_v35 = vld [vmem:[#allocation11 + $0x28c] sm:$0xf] }
 0x161   :  { %v798_v49 = vmax.f32 %v792_v44, 0.0  ;;  %v7387_v44 = vor.u32 %v9773_v37, %v7386_v36  ;;  %v7482_v19 = vld [vmem:[#allocation11 + $0x608] sm:$0xf]  ;;  %v7259_v36 = vor.u32 %v9741_v29, %v7258_v28  ;;  %v7036_v37 = vld [vmem:[#allocation11 + $0x2a8] sm:$0xf0] }
 0x162   :  { %2477 = vmatpush.bf16.msra.mxu3 %v7099_v41  ;;  %v752_v52 = vpop.f32.mrf.mxu2  ;;  %v7578_v41 = vld [vmem:[#allocation11 + $0x6c8] sm:$0xf]  ;;  %v9769_v11 = vld [vmem:[#allocation11 + $0x54c] sm:$0xf]  ;;  %v6946_v28 = vld [vmem:[#allocation11 + $0x1d0] sm:$0xf] }
 0x163   :  { %v10710_v56 = vpack.c.bf16 %v798_v49, %v798_v49  ;;  %v753_v57 = vadd.f32 %v752_v52, %v365_v42  ;;  %v765_v58 = vpop.f32.mrf.mxu3  ;;  %v9821_v42 = vld [vmem:[#allocation11 + $0x6e4] sm:$0xf0]  ;;  %v9657_v52 = vld [vmem:[#allocation11 + $0x1cc] sm:$0xf]  ;;  %v9662_v29 = vld [vmem:[#allocation11 + $0x1ec] sm:$0xf0] }
 0x164   :  { %2463 = vmatpush.bf16.msra.mxu2 %v6875_v48  ;;  %v780_v62 = vpop.f32.mrf.mxu0  ;;  %v9605_v48 = vld [vmem:[#allocation11 + $0x24] sm:$0xf0]  ;;  %v7579_v51 = vor.u32 %v9821_v42, %v7578_v41 }
 0x165   :  { %v766_v1 = vadd.f32 %v765_v58, %v753_v57  ;;  %v793_v2 = vpop.f32.mrf.mxu1  ;;  %2404 = vmatmul.bf16.vlgmr.msrb.gmra.mxu1 %v10710_v56  ;;  %2430 = vmatmul.bf16.vlgmr.msrb.gmra.mxu3 %v10702_v3  ;;  %v7354_v49 = vld [vmem:[#allocation11 + $0x508] sm:$0xf]  ;;  %v6715_v58 = vor.u32 %v9605_v48, %v6714_v47  ;;  %v7039_v47 = vor.u32 %v9681_v35, %v7036_v37  ;;  %v7138_v35 = vld [vmem:[#allocation11 + $0x350] sm:$0xf] }
 0x166   :  { %2478 = vmatpush.bf16.msra.mxu3 %v7067_v53  ;;  %2500 = vmatpush.bf16.msrb.mxu1 %v7707_v54  ;;  %v6940_v53 = vld [vmem:[#allocation11 + $0x1e8] sm:$0xf0]  ;;  %v7167_v54 = vor.u32 %v9713_v45, %v7164_v46  ;;  %v9813_v57 = vld [vmem:[#allocation11 + $0x6a4] sm:$0xf0]  ;;  %v7355_v59 = vor.u32 %v9765_v50, %v7354_v49  ;;  %v6947_v37 = vor.u32 %v9662_v29, %v6946_v28 }
 0x167   :  { %v797_v12 = vmax.f32 %v766_v1, 0.0  ;;  %v6943_v62 = vor.u32 %v9657_v52, %v6940_v53  ;;  %v7547_v1 = vor.u32 %v9813_v57, %v7546_v55  ;;  %v9649_v2 = vld [vmem:[#allocation11 + $0x18c] sm:$0xf]  ;;  %v9797_v20 = vld [vmem:[#allocation11 + $0x624] sm:$0xf0] }
 0x168   :  { %2464 = vmatpush.bf16.msra.mxu2 %v6843_v63  ;;  %v7322_v63 = vld [vmem:[#allocation11 + $0x4c8] sm:$0xf]  ;;  %v9785_v45 = vld [vmem:[#allocation11 + $0x5cc] sm:$0xf] }
 0x169   :  { %v10714_v17 = vpack.c.bf16 %v797_v12, %v797_v12  ;;  %v6911_v12 = vor.u32 %v9649_v2, %v6908_v4  ;;  %v7226_v41 = vld [vmem:[#allocation11 + $0x408] sm:$0xf]  ;;  %v7452_v46 = vld [vmem:[#allocation11 + $0x5e8] sm:$0xf0] }
 0x16a   :  { %2479 = vmatpush.bf16.msra.mxu3 %v7035_v7  ;;  %2501 = vmatpush.bf16.msrb.mxu1 %v7675_v9  ;;  %v754_v21 = vpop.f32.mrf.mxu2  ;;  %v9805_v7 = vld [vmem:[#allocation11 + $0x664] sm:$0xf0]  ;;  %v7323_v9 = vor.u32 %v9757_v0, %v7322_v63  ;;  %v9673_v49 = vld [vmem:[#allocation11 + $0x24c] sm:$0xf]  ;;  %v7455_v55 = vor.u32 %v9785_v45, %v7452_v46 }
 0x16b   :  { %v767_v25 = vpop.f32.mrf.mxu3  ;;  %2391 = vmatmul.bf16.vlgmr.msrb.gmra.mxu0 %v10714_v17  ;;  %2417 = vmatmul.bf16.vlgmr.msrb.gmra.mxu2 %v10705_v26  ;;  %v9689_v21 = vld [vmem:[#allocation11 + $0x2cc] sm:$0xf]  ;;  %v9733_v42 = vld [vmem:[#allocation11 + $0x424] sm:$0xf0] }
 0x16c   :  { %2465 = vmatpush.bf16.msra.mxu2 %v6811_v15  ;;  %2487 = vmatpush.bf16.msrb.mxu0 %v7451_v16  ;;  %v7515_v15 = vor.u32 %v9805_v7, %v7514_v6  ;;  %v9641_v16 = vld [vmem:[#allocation11 + $0x14c] sm:$0xf]  ;;  %v7227_v50 = vor.u32 %v9733_v42, %v7226_v41  ;;  %v7202_v6 = vld [vmem:[#allocation11 + $0x3d0] sm:$0xf] }
 0x16d   :  { %v7708_v25 = vld [vmem:[#allocation11 + $0x7e8] sm:$0xf0]  ;;  %v6879_v27 = vor.u32 %v9641_v16, %v6876_v8  ;;  %v9726_v7 = vld [vmem:[#allocation11 + $0x3ec] sm:$0xf0] }
 0x16e   :  { %2480 = vmatpush.bf16.msra.mxu3 %v7003_v22  ;;  %2502 = vmatpush.bf16.msrb.mxu1 %v7643_v23  ;;  %v7291_v22 = vor.u32 %v9749_v14, %v7290_v13  ;;  %v7068_v23 = vld [vmem:[#allocation11 + $0x2e8] sm:$0xf0]  ;;  %v7711_v34 = vor.u32 %v9849_v24, %v7708_v25  ;;  %v6914_v41 = vld [vmem:[#allocation11 + $0x190] sm:$0xf] }
 0x16f   :  { %v7071_v33 = vor.u32 %v9689_v21, %v7068_v23  ;;  %v9833_v52 = vld [vmem:[#allocation11 + $0x74c] sm:$0xf]  ;;  %v9718_v21 = vld [vmem:[#allocation11 + $0x3ac] sm:$0xf0] }
 0x170   :  { %2466 = vmatpush.bf16.msra.mxu2 %v6779_v30  ;;  %2488 = vmatpush.bf16.msrb.mxu0 %v7419_v31  ;;  %v7483_v30 = vor.u32 %v9797_v20, %v7482_v19  ;;  %v9633_v31 = vld [vmem:[#allocation11 + $0x10c] sm:$0xf]  ;;  %v7170_v20 = vld [vmem:[#allocation11 + $0x390] sm:$0xf] }
 0x171   :  { %v7644_v53 = vld [vmem:[#allocation11 + $0x768] sm:$0xf0]  ;;  %v9654_v42 = vld [vmem:[#allocation11 + $0x1ac] sm:$0xf0] }
 0x172   :  { %2481 = vmatpush.bf16.msra.mxu3 %v6971_v38  ;;  %2503 = vmatpush.bf16.msrb.mxu1 %v7611_v39  ;;  %v9841_v38 = vld [vmem:[#allocation11 + $0x78c] sm:$0xf] }
 0x173   :  { %v7676_v39 = vld [vmem:[#allocation11 + $0x7a8] sm:$0xf0] }
 0x174   :  { %2467 = vmatpush.bf16.msra.mxu2 %v6747_v43  ;;  %2489 = vmatpush.bf16.msrb.mxu0 %v7387_v44  ;;  %v9625_v43 = vld [vmem:[#allocation11 + $0xcc] sm:$0xf]  ;;  %v7679_v48 = vor.u32 %v9841_v38, %v7676_v39 }
 0x175   :  { %2456 = vmatmul.bf16.vlgmr.msra.gmra.mxu1 %v10710_v56  ;;  %2482 = vmatmul.bf16.vlgmr.msra.gmra.mxu3 %v10702_v3  ;;  %v6812_v44 = vld [vmem:[#allocation11 + $0xe8] sm:$0xf0] }
 0x176   :  { %2526 = vmatpush.bf16.msrb.mxu3 %v7199_v40  ;;  %2504 = vmatpush.bf16.msrb.mxu1 %v7579_v51  ;;  %v6847_v40 = vor.u32 %v9633_v31, %v6844_v32  ;;  %v7004_v51 = vld [vmem:[#allocation11 + $0x268] sm:$0xf0] }
 0x177   :  { %v9617_v57 = vld [vmem:[#allocation11 + $0x8c] sm:$0xf]  ;;  %v7007_v61 = vor.u32 %v9673_v49, %v7004_v51  ;;  %v6915_v49 = vor.u32 %v9654_v42, %v6914_v41  ;;  %v9830_v41 = vld [vmem:[#allocation11 + $0x72c] sm:$0xf0] }
 0x178   :  { %2468 = vmatpush.bf16.msra.mxu2 %v6715_v58  ;;  %2490 = vmatpush.bf16.msrb.mxu0 %v7355_v59  ;;  %v6780_v58 = vld [vmem:[#allocation11 + $0xa8] sm:$0xf0] }
 0x179   :  { %v9777_v59 = vld [vmem:[#allocation11 + $0x58c] sm:$0xf]  ;;  %v6783_v4 = vor.u32 %v9617_v57, %v6780_v58 }
 0x17a   :  { %2527 = vmatpush.bf16.msrb.mxu3 %v7167_v54  ;;  %2505 = vmatpush.bf16.msrb.mxu1 %v7547_v1  ;;  %v6815_v54 = vor.u32 %v9625_v43, %v6812_v44  ;;  %v9665_v63 = vld [vmem:[#allocation11 + $0x20c] sm:$0xf] }
 0x17b   :  { %2443 = vmatmul.bf16.vlgmr.msra.gmra.mxu0 %v10714_v17  ;;  %2469 = vmatmul.bf16.vlgmr.msra.gmra.mxu2 %v10705_v26  ;;  %v6972_v0 = vld [vmem:[#allocation11 + $0x228] sm:$0xf0] }
 0x17c   :  { %2513 = vmatpush.bf16.msrb.mxu2 %v6943_v62  ;;  %2491 = vmatpush.bf16.msrb.mxu0 %v7323_v9  ;;  %v7647_v62 = vor.u32 %v9833_v52, %v7644_v53  ;;  %v9825_v1 = vld [vmem:[#allocation11 + $0x70c] sm:$0xf]  ;;  %v6975_v13 = vor.u32 %v9665_v63, %v6972_v0  ;;  %v6882_v53 = vld [vmem:[#allocation11 + $0x150] sm:$0xf] }
 0x17d   :  { %v7612_v2 = vld [vmem:[#allocation11 + $0x728] sm:$0xf0]  ;;  %v9854_v63 = vld [vmem:[#allocation11 + $0x7ec] sm:$0xf0] }
 0x17e   :  { %2528 = vmatpush.bf16.msrb.mxu3 %v7135_v5  ;;  %2506 = vmatpush.bf16.msrb.mxu1 %v7515_v15  ;;  %v7423_v5 = vor.u32 %v9777_v59, %v7420_v60  ;;  %v9609_v9 = vld [vmem:[#allocation11 + $0x4c] sm:$0xf]  ;;  %v7615_v14 = vor.u32 %v9825_v1, %v7612_v2  ;;  %v7203_v15 = vor.u32 %v9726_v7, %v7202_v6  ;;  %v7074_v59 = vld [vmem:[#allocation11 + $0x2d0] sm:$0xf] }
 0x17f   :  { %v9817_v16 = vld [vmem:[#allocation11 + $0x6cc] sm:$0xf]  ;;  %v9638_v6 = vld [vmem:[#allocation11 + $0x12c] sm:$0xf0] }
 0x180   :  { %2514 = vmatpush.bf16.msrb.mxu2 %v6911_v12  ;;  %2492 = vmatpush.bf16.msrb.mxu0 %v7291_v22  ;;  %v7388_v12 = vld [vmem:[#allocation11 + $0x568] sm:$0xf0] }
 0x181   :  { %v7580_v8 = vld [vmem:[#allocation11 + $0x6e8] sm:$0xf0]  ;;  %v7391_v19 = vor.u32 %v9769_v11, %v7388_v12  ;;  %v9686_v12 = vld [vmem:[#allocation11 + $0x2ac] sm:$0xf0] }
 0x182   :  { %2529 = vmatpush.bf16.msrb.mxu3 %v7103_v18  ;;  %2507 = vmatpush.bf16.msrb.mxu1 %v7483_v30  ;;  %v6751_v18 = vor.u32 %v9609_v9, %v6748_v10  ;;  %v9601_v22 = vld [vmem:[#allocation11 + $0xc] sm:$0xf]  ;;  %v7171_v30 = vor.u32 %v9718_v21, %v7170_v20  ;;  %v7042_v10 = vld [vmem:[#allocation11 + $0x290] sm:$0xf] }
 0x183   :  { %v6716_v23 = vld [vmem:[#allocation11 + $0x28] sm:$0xf0]  ;;  %v7458_v20 = vld [vmem:[#allocation11 + $0x5d0] sm:$0xf] }
 0x184   :  { %2515 = vmatpush.bf16.msrb.mxu2 %v6879_v27  ;;  %2493 = vmatpush.bf16.msrb.mxu0 %v7259_v36  ;;  %v9761_v24 = vld [vmem:[#allocation11 + $0x50c] sm:$0xf]  ;;  %v7583_v27 = vor.u32 %v9817_v16, %v7580_v8  ;;  %v9710_v36 = vld [vmem:[#allocation11 + $0x36c] sm:$0xf0] }
 0x185   :  { %2508 = vmatmul.bf16.vlgmr.msrb.gmra.mxu1 %v10710_v56  ;;  %v7356_v25 = vld [vmem:[#allocation11 + $0x528] sm:$0xf0]  ;;  %v7139_v43 = vor.u32 %v9710_v36, %v7138_v35  ;;  %v9790_v21 = vld [vmem:[#allocation11 + $0x5ec] sm:$0xf0] }
 0x186   :  { %2530 = vmatpush.bf16.msrb.mxu3 %v7071_v33  ;;  %2552 = vmatpush.bf16.msra.mxu1 %v7711_v34  ;;  %v9809_v31 = vld [vmem:[#allocation11 + $0x68c] sm:$0xf]  ;;  %v6719_v33 = vor.u32 %v9601_v22, %v6716_v23  ;;  %v7359_v34 = vor.u32 %v9761_v24, %v7356_v25  ;;  %v7043_v22 = vor.u32 %v9686_v12, %v7042_v10  ;;  %v7010_v25 = vld [vmem:[#allocation11 + $0x250] sm:$0xf]  ;;  %v9706_v10 = vld [vmem:[#allocation11 + $0x354] sm:$0xf] }
 0x187   :  { %v7548_v32 = vld [vmem:[#allocation11 + $0x6a8] sm:$0xf0]  ;;  %v7459_v29 = vor.u32 %v9790_v21, %v7458_v20  ;;  %v9782_v35 = vld [vmem:[#allocation11 + $0x5ac] sm:$0xf0]  ;;  %v7140_v12 = vld [vmem:[#allocation11 + $0x370] sm:$0xf0] }
 0x188   :  { %2516 = vmatpush.bf16.msrb.mxu2 %v6847_v40  ;;  %2494 = vmatpush.bf16.msrb.mxu0 %v7227_v50  ;;  %v9753_v38 = vld [vmem:[#allocation11 + $0x4cc] sm:$0xf]  ;;  %v7551_v40 = vor.u32 %v9809_v31, %v7548_v32  ;;  %v9838_v31 = vld [vmem:[#allocation11 + $0x76c] sm:$0xf0] }
 0x189   :  { %v7324_v39 = vld [vmem:[#allocation11 + $0x4e8] sm:$0xf0]  ;;  %v6786_v32 = vld [vmem:[#allocation11 + $0x90] sm:$0xf] }
 0x18a   :  { %2531 = vmatpush.bf16.msrb.mxu3 %v7039_v47  ;;  %2553 = vmatpush.bf16.msra.mxu1 %v7679_v48  ;;  %v9801_v44 = vld [vmem:[#allocation11 + $0x64c] sm:$0xf]  ;;  %v7327_v46 = vor.u32 %v9753_v38, %v7324_v39  ;;  %v7106_v47 = vld [vmem:[#allocation11 + $0x310] sm:$0xf] }
 0x18b   :  { %2495 = vmatmul.bf16.vlgmr.msrb.gmra.mxu0 %v10714_v17  ;;  %v7516_v45 = vld [vmem:[#allocation11 + $0x668] sm:$0xf0]  ;;  %v9702_v48 = vld [vmem:[#allocation11 + $0x32c] sm:$0xf0] }
 0x18c   :  { %2517 = vmatpush.bf16.msrb.mxu2 %v6815_v54  ;;  %2539 = vmatpush.bf16.msra.mxu0 %v7455_v55  ;;  %v9745_v50 = vld [vmem:[#allocation11 + $0x48c] sm:$0xf]  ;;  %v7519_v52 = vor.u32 %v9801_v44, %v7516_v45  ;;  %v9646_v54 = vld [vmem:[#allocation11 + $0x16c] sm:$0xf0]  ;;  %v7107_v55 = vor.u32 %v9702_v48, %v7106_v47  ;;  %v9722_v44 = vld [vmem:[#allocation11 + $0x3d4] sm:$0xf] }
 0x18d   :  { %v7292_v51 = vld [vmem:[#allocation11 + $0x4a8] sm:$0xf0]  ;;  %v6883_v0 = vor.u32 %v9646_v54, %v6882_v53  ;;  %v9670_v39 = vld [vmem:[#allocation11 + $0x22c] sm:$0xf0]  ;;  %v7204_v45 = vld [vmem:[#allocation11 + $0x3f0] sm:$0xf0] }
 0x18e   :  { %2532 = vmatpush.bf16.msrb.mxu3 %v7007_v61  ;;  %2554 = vmatpush.bf16.msra.mxu1 %v7647_v62  ;;  %v9793_v57 = vld [vmem:[#allocation11 + $0x60c] sm:$0xf]  ;;  %v7295_v60 = vor.u32 %v9745_v50, %v7292_v51  ;;  %v9694_v61 = vld [vmem:[#allocation11 + $0x2ec] sm:$0xf0] }
 0x18f   :  { %v7484_v58 = vld [vmem:[#allocation11 + $0x628] sm:$0xf0]  ;;  %v7714_v62 = vld [vmem:[#allocation11 + $0x7d0] sm:$0xf]  ;;  %v7075_v7 = vor.u32 %v9694_v61, %v7074_v59  ;;  %v7172_v59 = vld [vmem:[#allocation11 + $0x3b0] sm:$0xf0] }
 0x190   :  { %2518 = vmatpush.bf16.msrb.mxu2 %v6783_v4  ;;  %2540 = vmatpush.bf16.msra.mxu0 %v7423_v5  ;;  %v9737_v1 = vld [vmem:[#allocation11 + $0x44c] sm:$0xf]  ;;  %v7487_v4 = vor.u32 %v9793_v57, %v7484_v58  ;;  %v6850_v5 = vld [vmem:[#allocation11 + $0x110] sm:$0xf]  ;;  %v7715_v9 = vor.u32 %v9854_v63, %v7714_v62  ;;  %v9714_v58 = vld [vmem:[#allocation11 + $0x394] sm:$0xf] }
 0x191   :  { %v7260_v2 = vld [vmem:[#allocation11 + $0x468] sm:$0xf0]  ;;  %v9614_v47 = vld [vmem:[#allocation11 + $0x6c] sm:$0xf0] }
 0x192   :  { %2533 = vmatpush.bf16.msrb.mxu3 %v6975_v13  ;;  %2555 = vmatpush.bf16.msra.mxu1 %v7615_v14  ;;  %v7263_v11 = vor.u32 %v9737_v1, %v7260_v2  ;;  %v7682_v13 = vld [vmem:[#allocation11 + $0x790] sm:$0xf]  ;;  %v9729_v16 = vld [vmem:[#allocation11 + $0x40c] sm:$0xf]  ;;  %v6948_v1 = vld [vmem:[#allocation11 + $0x1f0] sm:$0xf0] }
 0x193   :  { %v9846_v14 = vld [vmem:[#allocation11 + $0x7ac] sm:$0xf0]  ;;  %v7228_v8 = vld [vmem:[#allocation11 + $0x428] sm:$0xf0] }
 0x194   :  { %2519 = vmatpush.bf16.msrb.mxu2 %v6751_v18  ;;  %2541 = vmatpush.bf16.msra.mxu0 %v7391_v19  ;;  %v6818_v18 = vld [vmem:[#allocation11 + $0xd0] sm:$0xf]  ;;  %v7683_v23 = vor.u32 %v9846_v14, %v7682_v13  ;;  %v7231_v24 = vor.u32 %v9729_v16, %v7228_v8  ;;  %v6916_v16 = vld [vmem:[#allocation11 + $0x1b0] sm:$0xf0] }
 0x195   :  { %2534 = vmatmul.bf16.vlgmr.msrb.gmra.mxu3 %v10702_v3  ;;  %v9630_v19 = vld [vmem:[#allocation11 + $0xec] sm:$0xf0] }
 0x196   :  { %2578 = vmatpush.bf16.msra.mxu3 %v7203_v15  ;;  %2556 = vmatpush.bf16.msra.mxu1 %v7583_v27  ;;  %v6851_v15 = vor.u32 %v9638_v6, %v6850_v5  ;;  %v9678_v27 = vld [vmem:[#allocation11 + $0x26c] sm:$0xf0]  ;;  %v6819_v28 = vor.u32 %v9630_v19, %v6818_v18  ;;  %v7143_v18 = vor.u32 %v9706_v10, %v7140_v12  ;;  %v7428_v10 = vld [vmem:[#allocation11 + $0x5b0] sm:$0xf0] }
 0x197   :  { %v7011_v36 = vor.u32 %v9678_v27, %v7010_v25  ;;  %v7394_v48 = vld [vmem:[#allocation11 + $0x550] sm:$0xf]  ;;  %v9666_v12 = vld [vmem:[#allocation11 + $0x214] sm:$0xf] }
 0x198   :  { %2520 = vmatpush.bf16.msrb.mxu2 %v6719_v33  ;;  %2542 = vmatpush.bf16.msra.mxu0 %v7359_v34  ;;  %v9622_v33 = vld [vmem:[#allocation11 + $0xac] sm:$0xf0] }
 0x199   :  { %v7426_v34 = vld [vmem:[#allocation11 + $0x590] sm:$0xf]  ;;  %v6787_v42 = vor.u32 %v9622_v33, %v6786_v32 }
 0x19a   :  { %2579 = vmatpush.bf16.msra.mxu3 %v7171_v30  ;;  %2557 = vmatpush.bf16.msra.mxu1 %v7551_v40  ;;  %v7650_v30 = vld [vmem:[#allocation11 + $0x750] sm:$0xf] }
 0x19b   :  { %2521 = vmatmul.bf16.vlgmr.msrb.gmra.mxu2 %v10705_v26  ;;  %v7651_v38 = vor.u32 %v9838_v31, %v7650_v30  ;;  %v7618_v40 = vld [vmem:[#allocation11 + $0x710] sm:$0xf] }
 0x19c   :  { %2565 = vmatpush.bf16.msra.mxu2 %v6947_v37  ;;  %2543 = vmatpush.bf16.msra.mxu0 %v7327_v46  ;;  %v6978_v37 = vld [vmem:[#allocation11 + $0x210] sm:$0xf]  ;;  %v7619_v51 = vor.u32 %v9830_v41, %v7618_v40 }
 0x19d   :  { %v6754_v46 = vld [vmem:[#allocation11 + $0x50] sm:$0xf]  ;;  %v6979_v50 = vor.u32 %v9670_v39, %v6978_v37  ;;  %v7716_v39 = vld [vmem:[#allocation11 + $0x7f0] sm:$0xf0] }
 0x19e   :  { %2580 = vmatpush.bf16.msra.mxu3 %v7139_v43  ;;  %2558 = vmatpush.bf16.msra.mxu1 %v7519_v52  ;;  %v7427_v43 = vor.u32 %v9782_v35, %v7426_v34  ;;  %v7207_v52 = vor.u32 %v9722_v44, %v7204_v45  ;;  %v7586_v53 = vld [vmem:[#allocation11 + $0x6d0] sm:$0xf]  ;;  %v9690_v35 = vld [vmem:[#allocation11 + $0x2d4] sm:$0xf] }
 0x19f   :  { %v9822_v54 = vld [vmem:[#allocation11 + $0x6ec] sm:$0xf0] }
 0x1a0   :  { %2566 = vmatpush.bf16.msra.mxu2 %v6915_v49  ;;  %2544 = vmatpush.bf16.msra.mxu0 %v7295_v60  ;;  %v9774_v49 = vld [vmem:[#allocation11 + $0x56c] sm:$0xf0]  ;;  %v7587_v2 = vor.u32 %v9822_v54, %v7586_v53 }
 0x1a1   :  { %v7395_v57 = vor.u32 %v9774_v49, %v7394_v48  ;;  %v6722_v60 = vld [vmem:[#allocation11 + $0x10] sm:$0xf]  ;;  %v7044_v48 = vld [vmem:[#allocation11 + $0x2b0] sm:$0xf0] }
 0x1a2   :  { %2581 = vmatpush.bf16.msra.mxu3 %v7107_v55  ;;  %2559 = vmatpush.bf16.msra.mxu1 %v7487_v4  ;;  %v6755_v55 = vor.u32 %v9614_v47, %v6754_v46  ;;  %v9606_v61 = vld [vmem:[#allocation11 + $0x2c] sm:$0xf0]  ;;  %v7175_v4 = vor.u32 %v9714_v58, %v7172_v59  ;;  %v9682_v47 = vld [vmem:[#allocation11 + $0x294] sm:$0xf] }
 0x1a3   :  { %v7362_v62 = vld [vmem:[#allocation11 + $0x510] sm:$0xf]  ;;  %v6723_v5 = vor.u32 %v9606_v61, %v6722_v60  ;;  %v9786_v58 = vld [vmem:[#allocation11 + $0x5d4] sm:$0xf]  ;;  %v7047_v60 = vor.u32 %v9682_v47, %v7044_v48  ;;  %v7146_v47 = vld [vmem:[#allocation11 + $0x358] sm:$0xf] }
 0x1a4   :  { %2567 = vmatpush.bf16.msra.mxu2 %v6883_v0  ;;  %2545 = vmatpush.bf16.msra.mxu0 %v7263_v11  ;;  %v9766_v63 = vld [vmem:[#allocation11 + $0x52c] sm:$0xf0]  ;;  %v9658_v0 = vld [vmem:[#allocation11 + $0x1d4] sm:$0xf] }
 0x1a5   :  { %2560 = vmatmul.bf16.vlgmr.msra.gmra.mxu1 %v10710_v56  ;;  %v7363_v6 = vor.u32 %v9766_v63, %v7362_v62  ;;  %v6951_v11 = vor.u32 %v9658_v0, %v6948_v1  ;;  %v7330_v13 = vld [vmem:[#allocation11 + $0x4d0] sm:$0xf]  ;;  %v7460_v59 = vld [vmem:[#allocation11 + $0x5f0] sm:$0xf0] }
 0x1a6   :  { %2582 = vmatpush.bf16.msra.mxu3 %v7075_v7  ;;  %2604 = vmatpush.bf16.msrb.mxu1 %v7715_v9  ;;  %v7554_v7 = vld [vmem:[#allocation11 + $0x690] sm:$0xf]  ;;  %v9674_v0 = vld [vmem:[#allocation11 + $0x254] sm:$0xf] }
 0x1a7   :  { %v9814_v9 = vld [vmem:[#allocation11 + $0x6ac] sm:$0xf0]  ;;  %v7012_v1 = vld [vmem:[#allocation11 + $0x270] sm:$0xf0] }
 0x1a8   :  { %2568 = vmatpush.bf16.msra.mxu2 %v6851_v15  ;;  %2546 = vmatpush.bf16.msra.mxu0 %v7231_v24  ;;  %v9758_v14 = vld [vmem:[#allocation11 + $0x4ec] sm:$0xf0]  ;;  %v9650_v15 = vld [vmem:[#allocation11 + $0x194] sm:$0xf]  ;;  %v7555_v8 = vor.u32 %v9814_v9, %v7554_v7 }
 0x1a9   :  { %v7331_v19 = vor.u32 %v9758_v14, %v7330_v13  ;;  %v7522_v20 = vld [vmem:[#allocation11 + $0x650] sm:$0xf]  ;;  %v7108_v24 = vld [vmem:[#allocation11 + $0x330] sm:$0xf0] }
 0x1aa   :  { %2583 = vmatpush.bf16.msra.mxu3 %v7043_v22  ;;  %2605 = vmatpush.bf16.msrb.mxu1 %v7683_v23  ;;  %v9806_v21 = vld [vmem:[#allocation11 + $0x66c] sm:$0xf0]  ;;  %v9698_v22 = vld [vmem:[#allocation11 + $0x314] sm:$0xf]  ;;  %v6919_v23 = vor.u32 %v9650_v15, %v6916_v16 }
 0x1ab   :  { %2547 = vmatmul.bf16.vlgmr.msra.gmra.mxu0 %v10714_v17  ;;  %v7298_v25 = vld [vmem:[#allocation11 + $0x490] sm:$0xf]  ;;  %v7523_v30 = vor.u32 %v9806_v21, %v7522_v20  ;;  %v7111_v32 = vor.u32 %v9698_v22, %v7108_v24  ;;  %v6788_v7 = vld [vmem:[#allocation11 + $0xb0] sm:$0xf0]  ;;  %v9727_v20 = vld [vmem:[#allocation11 + $0x3f4] sm:$0xf0] }
 0x1ac   :  { %2569 = vmatpush.bf16.msra.mxu2 %v6819_v28  ;;  %2591 = vmatpush.bf16.msrb.mxu0 %v7459_v29  ;;  %v9750_v27 = vld [vmem:[#allocation11 + $0x4ac] sm:$0xf0]  ;;  %v9642_v28 = vld [vmem:[#allocation11 + $0x154] sm:$0xf] }
 0x1ad   :  { %v6884_v29 = vld [vmem:[#allocation11 + $0x170] sm:$0xf0]  ;;  %v7490_v31 = vld [vmem:[#allocation11 + $0x610] sm:$0xf]  ;;  %v7299_v33 = vor.u32 %v9750_v27, %v7298_v25 }
 0x1ae   :  { %2584 = vmatpush.bf16.msra.mxu3 %v7011_v36  ;;  %2606 = vmatpush.bf16.msrb.mxu1 %v7651_v38  ;;  %v9798_v34 = vld [vmem:[#allocation11 + $0x62c] sm:$0xf0]  ;;  %v7076_v36 = vld [vmem:[#allocation11 + $0x2f0] sm:$0xf0]  ;;  %v6887_v37 = vor.u32 %v9642_v28, %v6884_v29 }
 0x1af   :  { %v9850_v38 = vld [vmem:[#allocation11 + $0x7d4] sm:$0xf]  ;;  %v7266_v40 = vld [vmem:[#allocation11 + $0x450] sm:$0xf]  ;;  %v7491_v44 = vor.u32 %v9798_v34, %v7490_v31  ;;  %v7079_v45 = vor.u32 %v9690_v35, %v7076_v36  ;;  %v9719_v34 = vld [vmem:[#allocation11 + $0x3b4] sm:$0xf0] }
 0x1b0   :  { %2570 = vmatpush.bf16.msra.mxu2 %v6787_v42  ;;  %2592 = vmatpush.bf16.msrb.mxu0 %v7427_v43  ;;  %v9742_v41 = vld [vmem:[#allocation11 + $0x46c] sm:$0xf0]  ;;  %v9634_v42 = vld [vmem:[#allocation11 + $0x114] sm:$0xf]  ;;  %v7719_v46 = vor.u32 %v9850_v38, %v7716_v39  ;;  %v6954_v39 = vld [vmem:[#allocation11 + $0x1d8] sm:$0xf] }
 0x1b1   :  { %v6852_v43 = vld [vmem:[#allocation11 + $0x130] sm:$0xf0]  ;;  %v7267_v49 = vor.u32 %v9742_v41, %v7266_v40  ;;  %v7234_v53 = vld [vmem:[#allocation11 + $0x410] sm:$0xf]  ;;  %v9663_v40 = vld [vmem:[#allocation11 + $0x1f4] sm:$0xf0] }
 0x1b2   :  { %2585 = vmatpush.bf16.msra.mxu3 %v6979_v50  ;;  %2607 = vmatpush.bf16.msrb.mxu1 %v7619_v51  ;;  %v6855_v50 = vor.u32 %v9634_v42, %v6852_v43  ;;  %v9842_v51 = vld [vmem:[#allocation11 + $0x794] sm:$0xf]  ;;  %v9734_v54 = vld [vmem:[#allocation11 + $0x42c] sm:$0xf0]  ;;  %v6955_v48 = vor.u32 %v9663_v40, %v6954_v39 }
 0x1b3   :  { %v7235_v62 = vor.u32 %v9734_v54, %v7234_v53  ;;  %v9778_v9 = vld [vmem:[#allocation11 + $0x594] sm:$0xf]  ;;  %v9655_v53 = vld [vmem:[#allocation11 + $0x1b4] sm:$0xf0] }
 0x1b4   :  { %2571 = vmatpush.bf16.msra.mxu2 %v6755_v55  ;;  %2593 = vmatpush.bf16.msrb.mxu0 %v7395_v57  ;;  %v9626_v55 = vld [vmem:[#allocation11 + $0xd4] sm:$0xf] }
 0x1b5   :  { %2586 = vmatmul.bf16.vlgmr.msra.gmra.mxu3 %v10702_v3  ;;  %v6820_v57 = vld [vmem:[#allocation11 + $0xf0] sm:$0xf0] }
 0x1b6   :  { %2630 = vmatpush.bf16.msrb.mxu3 %v7207_v52  ;;  %2608 = vmatpush.bf16.msrb.mxu1 %v7587_v2  ;;  %v7684_v52 = vld [vmem:[#allocation11 + $0x7b0] sm:$0xf0]  ;;  %v6823_v63 = vor.u32 %v9626_v55, %v6820_v57 }
 0x1b7   :  { %v7687_v61 = vor.u32 %v9842_v51, %v7684_v52  ;;  %v9834_v2 = vld [vmem:[#allocation11 + $0x754] sm:$0xf]  ;;  %v6922_v52 = vld [vmem:[#allocation11 + $0x198] sm:$0xf] }
 0x1b8   :  { %2572 = vmatpush.bf16.msra.mxu2 %v6723_v5  ;;  %2594 = vmatpush.bf16.msrb.mxu0 %v7363_v6  ;;  %v7652_v5 = vld [vmem:[#allocation11 + $0x770] sm:$0xf0] }
 0x1b9   :  { %v9618_v6 = vld [vmem:[#allocation11 + $0x94] sm:$0xf]  ;;  %v7655_v13 = vor.u32 %v9834_v2, %v7652_v5  ;;  %v9647_v2 = vld [vmem:[#allocation11 + $0x174] sm:$0xf0] }
 0x1ba   :  { %2631 = vmatpush.bf16.msrb.mxu3 %v7175_v4  ;;  %2609 = vmatpush.bf16.msrb.mxu1 %v7555_v8  ;;  %v7463_v4 = vor.u32 %v9786_v58, %v7460_v59  ;;  %v6791_v14 = vor.u32 %v9618_v6, %v6788_v7  ;;  %v6980_v15 = vld [vmem:[#allocation11 + $0x230] sm:$0xf0] }
 0x1bb   :  { %2573 = vmatmul.bf16.vlgmr.msra.gmra.mxu2 %v10705_v26  ;;  %v9826_v16 = vld [vmem:[#allocation11 + $0x714] sm:$0xf]  ;;  %v6983_v25 = vor.u32 %v9666_v12, %v6980_v15 }
 0x1bc   :  { %2617 = vmatpush.bf16.msrb.mxu2 %v6951_v11  ;;  %2595 = vmatpush.bf16.msrb.mxu0 %v7331_v19  ;;  %v7015_v11 = vor.u32 %v9674_v0, %v7012_v1  ;;  %v7620_v8 = vld [vmem:[#allocation11 + $0x730] sm:$0xf0]  ;;  %v7210_v19 = vld [vmem:[#allocation11 + $0x3d8] sm:$0xf] }
 0x1bd   :  { %v9610_v21 = vld [vmem:[#allocation11 + $0x54] sm:$0xf]  ;;  %v7623_v27 = vor.u32 %v9826_v16, %v7620_v8  ;;  %v7211_v28 = vor.u32 %v9727_v20, %v7210_v19  ;;  %v6890_v1 = vld [vmem:[#allocation11 + $0x158] sm:$0xf] }
 0x1be   :  { %2632 = vmatpush.bf16.msrb.mxu3 %v7143_v18  ;;  %2610 = vmatpush.bf16.msrb.mxu1 %v7523_v30  ;;  %v7431_v18 = vor.u32 %v9778_v9, %v7428_v10  ;;  %v6756_v22 = vld [vmem:[#allocation11 + $0x70] sm:$0xf0]  ;;  %v7082_v10 = vld [vmem:[#allocation11 + $0x2d8] sm:$0xf]  ;;  %v6891_v12 = vor.u32 %v9647_v2, %v6890_v1  ;;  %v9723_v1 = vld [vmem:[#allocation11 + $0x3dc] sm:$0xf] }
 0x1bf   :  { %v7396_v24 = vld [vmem:[#allocation11 + $0x570] sm:$0xf0]  ;;  %v6759_v31 = vor.u32 %v9610_v21, %v6756_v22  ;;  %v6858_v8 = vld [vmem:[#allocation11 + $0x118] sm:$0xf]  ;;  %v7212_v2 = vld [vmem:[#allocation11 + $0x3f8] sm:$0xf0] }
 0x1c0   :  { %2618 = vmatpush.bf16.msrb.mxu2 %v6919_v23  ;;  %2596 = vmatpush.bf16.msrb.mxu0 %v7299_v33  ;;  %v9770_v23 = vld [vmem:[#allocation11 + $0x554] sm:$0xf]  ;;  %v7178_v33 = vld [vmem:[#allocation11 + $0x398] sm:$0xf] }
 0x1c1   :  { %v9818_v29 = vld [vmem:[#allocation11 + $0x6d4] sm:$0xf]  ;;  %v7179_v42 = vor.u32 %v9719_v34, %v7178_v33  ;;  %v6826_v33 = vld [vmem:[#allocation11 + $0xd8] sm:$0xf] }
 0x1c2   :  { %2633 = vmatpush.bf16.msrb.mxu3 %v7111_v32  ;;  %2611 = vmatpush.bf16.msrb.mxu1 %v7491_v44  ;;  %v7588_v30 = vld [vmem:[#allocation11 + $0x6f0] sm:$0xf0]  ;;  %v7399_v32 = vor.u32 %v9770_v23, %v7396_v24  ;;  %v7050_v23 = vld [vmem:[#allocation11 + $0x298] sm:$0xf] }
 0x1c3   :  { %v9602_v35 = vld [vmem:[#allocation11 + $0x14] sm:$0xf]  ;;  %v7591_v41 = vor.u32 %v9818_v29, %v7588_v30  ;;  %v9687_v24 = vld [vmem:[#allocation11 + $0x2b4] sm:$0xf0] }
 0x1c4   :  { %2619 = vmatpush.bf16.msrb.mxu2 %v6887_v37  ;;  %2597 = vmatpush.bf16.msrb.mxu0 %v7267_v49  ;;  %v6724_v36 = vld [vmem:[#allocation11 + $0x30] sm:$0xf0]  ;;  %v9711_v49 = vld [vmem:[#allocation11 + $0x374] sm:$0xf0] }
 0x1c5   :  { %2612 = vmatmul.bf16.vlgmr.msrb.gmra.mxu1 %v10710_v56  ;;  %v9762_v37 = vld [vmem:[#allocation11 + $0x514] sm:$0xf]  ;;  %v6727_v43 = vor.u32 %v9602_v35, %v6724_v36  ;;  %v7147_v55 = vor.u32 %v9711_v49, %v7146_v47  ;;  %v7690_v29 = vld [vmem:[#allocation11 + $0x798] sm:$0xf] }
 0x1c6   :  { %2634 = vmatpush.bf16.msrb.mxu3 %v7079_v45  ;;  %2656 = vmatpush.bf16.msra.mxu1 %v7719_v46  ;;  %v7364_v38 = vld [vmem:[#allocation11 + $0x530] sm:$0xf0]  ;;  %v9847_v30 = vld [vmem:[#allocation11 + $0x7b4] sm:$0xf0] }
 0x1c7   :  { %v7367_v44 = vor.u32 %v9762_v37, %v7364_v38  ;;  %v9810_v45 = vld [vmem:[#allocation11 + $0x694] sm:$0xf]  ;;  %v9631_v34 = vld [vmem:[#allocation11 + $0xf4] sm:$0xf0]  ;;  %v7051_v38 = vor.u32 %v9687_v24, %v7050_v23  ;;  %v7691_v39 = vor.u32 %v9847_v30, %v7690_v29 }
 0x1c8   :  { %2620 = vmatpush.bf16.msrb.mxu2 %v6855_v50  ;;  %2598 = vmatpush.bf16.msrb.mxu0 %v7235_v62  ;;  %v7556_v46 = vld [vmem:[#allocation11 + $0x6b0] sm:$0xf0]  ;;  %v9703_v62 = vld [vmem:[#allocation11 + $0x334] sm:$0xf0] }
 0x1c9   :  { %v9754_v50 = vld [vmem:[#allocation11 + $0x4d4] sm:$0xf]  ;;  %v7559_v54 = vor.u32 %v9810_v45, %v7556_v46  ;;  %v7466_v36 = vld [vmem:[#allocation11 + $0x5d8] sm:$0xf] }
 0x1ca   :  { %2635 = vmatpush.bf16.msrb.mxu3 %v7047_v60  ;;  %2657 = vmatpush.bf16.msra.mxu1 %v7687_v61  ;;  %v7332_v51 = vld [vmem:[#allocation11 + $0x4f0] sm:$0xf0]  ;;  %v7114_v60 = vld [vmem:[#allocation11 + $0x318] sm:$0xf]  ;;  %v6923_v61 = vor.u32 %v9655_v53, %v6922_v52 }
 0x1cb   :  { %2599 = vmatmul.bf16.vlgmr.msrb.gmra.mxu0 %v10714_v17  ;;  %v7335_v57 = vor.u32 %v9754_v50, %v7332_v51  ;;  %v9802_v58 = vld [vmem:[#allocation11 + $0x654] sm:$0xf]  ;;  %v7115_v6 = vor.u32 %v9703_v62, %v7114_v60  ;;  %v9791_v37 = vld [vmem:[#allocation11 + $0x5f4] sm:$0xf0] }
 0x1cc   :  { %2621 = vmatpush.bf16.msrb.mxu2 %v6823_v63  ;;  %2643 = vmatpush.bf16.msra.mxu0 %v7463_v4  ;;  %v7524_v59 = vld [vmem:[#allocation11 + $0x670] sm:$0xf0]  ;;  %v7467_v46 = vor.u32 %v9791_v37, %v7466_v36  ;;  %v9839_v47 = vld [vmem:[#allocation11 + $0x774] sm:$0xf0]  ;;  %v9707_v37 = vld [vmem:[#allocation11 + $0x35c] sm:$0xf] }
 0x1cd   :  { %v9746_v63 = vld [vmem:[#allocation11 + $0x494] sm:$0xf]  ;;  %v7527_v4 = vor.u32 %v9802_v58, %v7524_v59  ;;  %v9623_v49 = vld [vmem:[#allocation11 + $0xb4] sm:$0xf0] }
 0x1ce   :  { %2636 = vmatpush.bf16.msrb.mxu3 %v7015_v11  ;;  %2658 = vmatpush.bf16.msra.mxu1 %v7655_v13  ;;  %v7300_v0 = vld [vmem:[#allocation11 + $0x4b0] sm:$0xf0]  ;;  %v9695_v11 = vld [vmem:[#allocation11 + $0x2f4] sm:$0xf0] }
 0x1cf   :  { %v9794_v5 = vld [vmem:[#allocation11 + $0x614] sm:$0xf]  ;;  %v7303_v7 = vor.u32 %v9746_v63, %v7300_v0  ;;  %v7722_v13 = vld [vmem:[#allocation11 + $0x7d8] sm:$0xf]  ;;  %v7083_v21 = vor.u32 %v9695_v11, %v7082_v10  ;;  %v7215_v11 = vor.u32 %v9723_v1, %v7212_v2 }
 0x1d0   :  { %2622 = vmatpush.bf16.msrb.mxu2 %v6791_v14  ;;  %2644 = vmatpush.bf16.msra.mxu0 %v7431_v18  ;;  %v7492_v9 = vld [vmem:[#allocation11 + $0x630] sm:$0xf0]  ;;  %v9855_v14 = vld [vmem:[#allocation11 + $0x7f4] sm:$0xf0] }
 0x1d1   :  { %v9738_v15 = vld [vmem:[#allocation11 + $0x454] sm:$0xf]  ;;  %v9639_v18 = vld [vmem:[#allocation11 + $0x134] sm:$0xf0]  ;;  %v7495_v19 = vor.u32 %v9794_v5, %v7492_v9  ;;  %v7723_v22 = vor.u32 %v9855_v14, %v7722_v13 }
 0x1d2   :  { %2637 = vmatpush.bf16.msrb.mxu3 %v6983_v25  ;;  %2659 = vmatpush.bf16.msra.mxu1 %v7623_v27  ;;  %v7268_v16 = vld [vmem:[#allocation11 + $0x470] sm:$0xf0]  ;;  %v10734_v25 = vld [vmem:[#allocation13] sm:$0xff]  ;;  %v7434_v51 = vld [vmem:[#allocation11 + $0x598] sm:$0xf] }
 0x1d3   :  { %v7271_v27 = vor.u32 %v9738_v15, %v7268_v16  ;;  %v1061_v35 = vperm.slane %v10734_v25, 0  ;;  %v9783_v52 = vld [vmem:[#allocation11 + $0x5b4] sm:$0xf0] }
 0x1d4   :  { %2623 = vmatpush.bf16.msrb.mxu2 %v6759_v31  ;;  %2645 = vmatpush.bf16.msra.mxu0 %v7399_v32  ;;  %v9730_v31 = vld [vmem:[#allocation11 + $0x414] sm:$0xf]  ;;  %v9671_v59 = vld [vmem:[#allocation11 + $0x234] sm:$0xf0]  ;;  %v7435_v0 = vor.u32 %v9783_v52, %v7434_v51  ;;  %v9699_v51 = vld [vmem:[#allocation11 + $0x31c] sm:$0xf] }
 0x1d5   :  { %2638 = vmatmul.bf16.vlgmr.msrb.gmra.mxu3 %v10702_v3  ;;  %v7236_v32 = vld [vmem:[#allocation11 + $0x430] sm:$0xf0]  ;;  %v7626_v60 = vld [vmem:[#allocation11 + $0x718] sm:$0xf] }
 0x1d6   :  { %2682 = vmatpush.bf16.msra.mxu3 %v7211_v28  ;;  %2660 = vmatpush.bf16.msra.mxu1 %v7591_v41  ;;  %v6859_v28 = vor.u32 %v9639_v18, %v6858_v8  ;;  %v7239_v40 = vor.u32 %v9730_v31, %v7236_v32  ;;  %v6827_v41 = vor.u32 %v9631_v34, %v6826_v33  ;;  %v9615_v5 = vld [vmem:[#allocation11 + $0x74] sm:$0xf0]  ;;  %v9715_v8 = vld [vmem:[#allocation11 + $0x39c] sm:$0xf] }
 0x1d7   :  { %v9823_v13 = vld [vmem:[#allocation11 + $0x6f4] sm:$0xf0]  ;;  %v7180_v18 = vld [vmem:[#allocation11 + $0x3b8] sm:$0xf0] }
 0x1d8   :  { %2624 = vmatpush.bf16.msrb.mxu2 %v6727_v43  ;;  %2646 = vmatpush.bf16.msra.mxu0 %v7367_v44  ;;  %v2379_v20 = vpop.f32.mrf.mxu3  ;;  %v9679_v43 = vld [vmem:[#allocation11 + $0x274] sm:$0xf0]  ;;  %v7183_v31 = vor.u32 %v9715_v8, %v7180_v18  ;;  %v9683_v18 = vld [vmem:[#allocation11 + $0x29c] sm:$0xf] }
 0x1d9   :  { %v7658_v44 = vld [vmem:[#allocation11 + $0x758] sm:$0xf] }
 0x1da   :  { %2683 = vmatpush.bf16.msra.mxu3 %v7179_v42  ;;  %2661 = vmatpush.bf16.msra.mxu1 %v7559_v54  ;;  %v7018_v42 = vld [vmem:[#allocation11 + $0x258] sm:$0xf] }
 0x1db   :  { %2625 = vmatmul.bf16.vlgmr.msrb.gmra.mxu2 %v10705_v26  ;;  %v7019_v54 = vor.u32 %v9679_v43, %v7018_v42  ;;  %v9815_v36 = vld [vmem:[#allocation11 + $0x6b4] sm:$0xf0]  ;;  %v9651_v43 = vld [vmem:[#allocation11 + $0x19c] sm:$0xf] }
 0x1dc   :  { %2669 = vmatpush.bf16.msra.mxu2 %v6955_v48  ;;  %2647 = vmatpush.bf16.msra.mxu0 %v7335_v57  ;;  %v6794_v48 = vld [vmem:[#allocation11 + $0x98] sm:$0xf]  ;;  %v7659_v57 = vor.u32 %v9839_v47, %v7658_v44  ;;  %v6924_v44 = vld [vmem:[#allocation11 + $0x1b8] sm:$0xf0] }
 0x1dd   :  { %v6795_v58 = vor.u32 %v9623_v49, %v6794_v48  ;;  %v9759_v42 = vld [vmem:[#allocation11 + $0x4f4] sm:$0xf0]  ;;  %v6927_v52 = vor.u32 %v9651_v43, %v6924_v44  ;;  %v9835_v43 = vld [vmem:[#allocation11 + $0x75c] sm:$0xf] }
 0x1de   :  { %2684 = vmatpush.bf16.msra.mxu3 %v7147_v55  ;;  %2662 = vmatpush.bf16.msra.mxu1 %v7527_v4  ;;  %v2366_v45 = vpop.f32.mrf.mxu2  ;;  %v6986_v55 = vld [vmem:[#allocation11 + $0x218] sm:$0xf] }
 0x1df   :  { %v2367_v50 = vadd.f32 %v2366_v45, %v1061_v35  ;;  %v6762_v4 = vld [vmem:[#allocation11 + $0x58] sm:$0xf]  ;;  %v6987_v9 = vor.u32 %v9671_v59, %v6986_v55  ;;  %v9643_v59 = vld [vmem:[#allocation11 + $0x15c] sm:$0xf] }
 0x1e0   :  { %2670 = vmatpush.bf16.msra.mxu2 %v6923_v61  ;;  %2648 = vmatpush.bf16.msra.mxu0 %v7303_v7  ;;  %v2381_v53 = vpop.f32.mrf.mxu3  ;;  %v9831_v61 = vld [vmem:[#allocation11 + $0x734] sm:$0xf0]  ;;  %v6763_v15 = vor.u32 %v9615_v5, %v6762_v4  ;;  %v9691_v4 = vld [vmem:[#allocation11 + $0x2dc] sm:$0xf] }
 0x1e1   :  { %v2380_v62 = vadd.f32 %v2379_v20, %v2367_v50  ;;  %v9775_v7 = vld [vmem:[#allocation11 + $0x574] sm:$0xf0]  ;;  %v7627_v10 = vor.u32 %v9831_v61, %v7626_v60  ;;  %v7116_v53 = vld [vmem:[#allocation11 + $0x338] sm:$0xf0] }
 0x1e2   :  { %2685 = vmatpush.bf16.msra.mxu3 %v7115_v6  ;;  %2663 = vmatpush.bf16.msra.mxu1 %v7495_v19  ;;  %v2405_v63 = vpop.f32.mrf.mxu1  ;;  %v7402_v6 = vld [vmem:[#allocation11 + $0x558] sm:$0xf]  ;;  %v6892_v60 = vld [vmem:[#allocation11 + $0x178] sm:$0xf0] }
 0x1e3   :  { %v7403_v16 = vor.u32 %v9775_v7, %v7402_v6  ;;  %v6730_v19 = vld [vmem:[#allocation11 + $0x18] sm:$0xf]  ;;  %v7084_v5 = vld [vmem:[#allocation11 + $0x2f8] sm:$0xf0]  ;;  %v6895_v6 = vor.u32 %v9643_v59, %v6892_v60 }
 0x1e4   :  { %2671 = vmatpush.bf16.msra.mxu2 %v6891_v12  ;;  %2649 = vmatpush.bf16.msra.mxu0 %v7271_v27  ;;  %v7594_v12 = vld [vmem:[#allocation11 + $0x6d8] sm:$0xf]  ;;  %v9659_v27 = vld [vmem:[#allocation11 + $0x1dc] sm:$0xf] }
 0x1e5   :  { %2664 = vmatmul.bf16.vlgmr.msra.gmra.mxu1 %v10710_v56  ;;  %v9607_v20 = vld [vmem:[#allocation11 + $0x34] sm:$0xf0]  ;;  %v7595_v30 = vor.u32 %v9823_v13, %v7594_v12  ;;  %v9851_v7 = vld [vmem:[#allocation11 + $0x7dc] sm:$0xf] }
 0x1e6   :  { %2686 = vmatpush.bf16.msra.mxu3 %v7083_v21  ;;  %2708 = vmatpush.bf16.msrb.mxu1 %v7723_v22  ;;  %v2368_v14 = vpop.f32.mrf.mxu2  ;;  %v7370_v21 = vld [vmem:[#allocation11 + $0x518] sm:$0xf]  ;;  %v6731_v33 = vor.u32 %v9607_v20, %v6730_v19  ;;  %v9635_v12 = vld [vmem:[#allocation11 + $0x11c] sm:$0xf] }
 0x1e7   :  { %v9767_v22 = vld [vmem:[#allocation11 + $0x534] sm:$0xf0]  ;;  %v6860_v13 = vld [vmem:[#allocation11 + $0x138] sm:$0xf0] }
 0x1e8   :  { %2672 = vmatpush.bf16.msra.mxu2 %v6859_v28  ;;  %2650 = vmatpush.bf16.msra.mxu0 %v7239_v40  ;;  %v2392_v23 = vpop.f32.mrf.mxu0  ;;  %v10739_v24 = vpop.f32.mrf.mxu3  ;;  %v6956_v28 = vld [vmem:[#allocation11 + $0x1f8] sm:$0xf0]  ;;  %v7371_v34 = vor.u32 %v9767_v22, %v7370_v21  ;;  %v7562_v35 = vld [vmem:[#allocation11 + $0x698] sm:$0xf]  ;;  %v6863_v21 = vor.u32 %v9635_v12, %v6860_v13 }
 0x1e9   :  { %v2393_v29 = vadd.f32 %v2392_v23, %v2380_v62  ;;  %v7148_v40 = vld [vmem:[#allocation11 + $0x378] sm:$0xf0]  ;;  %v7563_v45 = vor.u32 %v9815_v36, %v7562_v35  ;;  %v7530_v49 = vld [vmem:[#allocation11 + $0x658] sm:$0xf] }
 0x1ea   :  { %2687 = vmatpush.bf16.msra.mxu3 %v7051_v38  ;;  %2709 = vmatpush.bf16.msrb.mxu1 %v7691_v39  ;;  %v2407_v32 = vpop.f32.mrf.mxu1  ;;  %v6959_v39 = vor.u32 %v9659_v27, %v6956_v28  ;;  %v7151_v47 = vor.u32 %v9707_v37, %v7148_v40  ;;  %v9807_v50 = vld [vmem:[#allocation11 + $0x674] sm:$0xf0]  ;;  %v7052_v19 = vld [vmem:[#allocation11 + $0x2b8] sm:$0xf0] }
 0x1eb   :  { %2651 = vmatmul.bf16.vlgmr.msra.gmra.mxu0 %v10714_v17  ;;  %v10741_v38 = vadd.f32 %v2405_v63, %v2393_v29  ;;  %v9751_v55 = vld [vmem:[#allocation11 + $0x4b4] sm:$0xf0]  ;;  %v7531_v61 = vor.u32 %v9807_v50, %v7530_v49  ;;  %v9843_v22 = vld [vmem:[#allocation11 + $0x79c] sm:$0xf]  ;;  %v7055_v36 = vor.u32 %v9683_v18, %v7052_v19 }
 0x1ec   :  { %2673 = vmatpush.bf16.msra.mxu2 %v6827_v41  ;;  %2695 = vmatpush.bf16.msrb.mxu0 %v7467_v46  ;;  %v7338_v41 = vld [vmem:[#allocation11 + $0x4d8] sm:$0xf]  ;;  %v7692_v23 = vld [vmem:[#allocation11 + $0x7b8] sm:$0xf0] }
 0x1ed   :  { %v7339_v48 = vor.u32 %v9759_v42, %v7338_v41  ;;  %v7498_v62 = vld [vmem:[#allocation11 + $0x618] sm:$0xf]  ;;  %v6828_v32 = vld [vmem:[#allocation11 + $0xf8] sm:$0xf0]  ;;  %v7695_v37 = vor.u32 %v9843_v22, %v7692_v23  ;;  %v7926_v22 = vld [vmem:[#allocation14 + $0x188] sm:$0xf] }
 0x1ee   :  { %2688 = vmatpush.bf16.msra.mxu3 %v7019_v54  ;;  %2710 = vmatpush.bf16.msrb.mxu1 %v7659_v57  ;;  %v10744_v46 = vpop.f32.mrf.mxu2  ;;  %v7306_v54 = vld [vmem:[#allocation11 + $0x498] sm:$0xf]  ;;  %v9675_v41 = vld [vmem:[#allocation11 + $0x25c] sm:$0xf]  ;;  %v9908_v23 = vld [vmem:[#allocation14 + $0x1a0] sm:$0xf0] }
 0x1ef   :  { %v7307_v1 = vor.u32 %v9751_v55, %v7306_v54  ;;  %v9799_v2 = vld [vmem:[#allocation11 + $0x634] sm:$0xf0]  ;;  %v7020_v42 = vld [vmem:[#allocation11 + $0x278] sm:$0xf0] }
 0x1f0   :  { %2674 = vmatpush.bf16.msra.mxu2 %v6795_v58  ;;  %2696 = vmatpush.bf16.msrb.mxu0 %v7435_v0  ;;  %v2394_v57 = vpop.f32.mrf.mxu0  ;;  %v2433_v58 = vpop.f32.mrf.mxu3  ;;  %v7119_v0 = vor.u32 %v9699_v51, %v7116_v53  ;;  %v7499_v14 = vor.u32 %v9799_v2, %v7498_v62  ;;  %v7242_v27 = vld [vmem:[#allocation11 + $0x418] sm:$0xf]  ;;  %v9779_v49 = vld [vmem:[#allocation11 + $0x59c] sm:$0xf]  ;;  %v7023_v51 = vor.u32 %v9675_v41, %v7020_v42 }
 0x1f1   :  { %v7436_v50 = vld [vmem:[#allocation11 + $0x5b8] sm:$0xf0] }
 0x1f2   :  { %2689 = vmatpush.bf16.msra.mxu3 %v6987_v9  ;;  %2711 = vmatpush.bf16.msrb.mxu1 %v7627_v10  ;;  %v10747_v63 = vpop.f32.mrf.mxu1  ;;  %v7724_v9 = vld [vmem:[#allocation11 + $0x7f8] sm:$0xf0]  ;;  %v7274_v10 = vld [vmem:[#allocation11 + $0x458] sm:$0xf]  ;;  %v7439_v62 = vor.u32 %v9779_v49, %v7436_v50 }
 0x1f3   :  { %v7727_v8 = vor.u32 %v9851_v7, %v7724_v9  ;;  %v6988_v57 = vld [vmem:[#allocation11 + $0x238] sm:$0xf0] }
 0x1f4   :  { %2675 = vmatpush.bf16.msra.mxu2 %v6763_v15  ;;  %2697 = vmatpush.bf16.msrb.mxu0 %v7403_v16  ;;  %v7087_v16 = vor.u32 %v9691_v4, %v7084_v5  ;;  %v9827_v58 = vld [vmem:[#allocation11 + $0x71c] sm:$0xf] }
 0x1f5   :  { %2690 = vmatmul.bf16.vlgmr.msra.gmra.mxu3 %v10702_v3  ;;  %v7628_v59 = vld [vmem:[#allocation11 + $0x738] sm:$0xf0] }
 0x1f6   :  { %2734 = vmatpush.bf16.msrb.mxu3 %v7215_v11  ;;  %2712 = vmatpush.bf16.msrb.mxu1 %v7595_v30  ;;  %v9743_v11 = vld [vmem:[#allocation11 + $0x474] sm:$0xf0]  ;;  %v2420_v15 = vpop.f32.mrf.mxu2  ;;  %v9611_v2 = vld [vmem:[#allocation11 + $0x5c] sm:$0xf] }
 0x1f7   :  { %v7275_v20 = vor.u32 %v9743_v11, %v7274_v10  ;;  %v9735_v30 = vld [vmem:[#allocation11 + $0x434] sm:$0xf0]  ;;  %v6764_v4 = vld [vmem:[#allocation11 + $0x78] sm:$0xf0]  ;;  %v7631_v10 = vor.u32 %v9827_v58, %v7628_v59  ;;  %v7870_v58 = vld [vmem:[#allocation14 + $0x118] sm:$0xf] }
 0x1f8   :  { %2676 = vmatpush.bf16.msra.mxu2 %v6731_v33  ;;  %2698 = vmatpush.bf16.msrb.mxu0 %v7371_v34  ;;  %v10749_v28 = vpop.f32.mrf.mxu0  ;;  %v10751_v29 = vpop.f32.mrf.mxu3  ;;  %v9787_v33 = vld [vmem:[#allocation11 + $0x5dc] sm:$0xf] }
 0x1f9   :  { %v7468_v34 = vld [vmem:[#allocation11 + $0x5f8] sm:$0xf0] }
 0x1fa   :  { %2735 = vmatpush.bf16.msrb.mxu3 %v7183_v31  ;;  %2713 = vmatpush.bf16.msrb.mxu1 %v7563_v45  ;;  %v9627_v31 = vld [vmem:[#allocation11 + $0xdc] sm:$0xf]  ;;  %v2459_v35 = vpop.f32.mrf.mxu1  ;;  %v7471_v44 = vor.u32 %v9787_v33, %v7468_v34 }
 0x1fb   :  { %2677 = vmatmul.bf16.vlgmr.msra.gmra.mxu2 %v10705_v26  ;;  %v6831_v40 = vor.u32 %v9627_v31, %v6828_v32  ;;  %v7660_v45 = vld [vmem:[#allocation11 + $0x778] sm:$0xf0] }
 0x1fc   :  { %2721 = vmatpush.bf16.msrb.mxu2 %v6959_v39  ;;  %2699 = vmatpush.bf16.msrb.mxu0 %v7339_v48  ;;  %v7243_v39 = vor.u32 %v9735_v30, %v7242_v27  ;;  %v6796_v48 = vld [vmem:[#allocation11 + $0xb8] sm:$0xf0]  ;;  %v7663_v54 = vor.u32 %v9835_v43, %v7660_v45  ;;  %v9901_v45 = vld [vmem:[#allocation14 + $0x168] sm:$0xf0] }
 0x1fd   :  { %v9771_v5 = vld [vmem:[#allocation11 + $0x55c] sm:$0xf] }
 0x1fe   :  { %2736 = vmatpush.bf16.msrb.mxu3 %v7151_v47  ;;  %2714 = vmatpush.bf16.msrb.mxu1 %v7531_v61  ;;  %v9619_v47 = vld [vmem:[#allocation11 + $0x9c] sm:$0xf]  ;;  %v10754_v53 = vpop.f32.mrf.mxu2 }
 0x1ff   :  { %v6799_v55 = vor.u32 %v9619_v47, %v6796_v48  ;;  %v9819_v12 = vld [vmem:[#allocation11 + $0x6dc] sm:$0xf] }
 0x200   :  { %2722 = vmatpush.bf16.msrb.mxu2 %v6927_v52  ;;  %2700 = vmatpush.bf16.msrb.mxu0 %v7307_v1  ;;  %v9667_v52 = vld [vmem:[#allocation11 + $0x21c] sm:$0xf]  ;;  %v2446_v60 = vpop.f32.mrf.mxu0  ;;  %v2485_v61 = vpop.f32.mrf.mxu3  ;;  %v9964_v1 = vld [vmem:[#allocation14 + $0x360] sm:$0xf0] }
 0x201   :  { %v6991_v9 = vor.u32 %v9667_v52, %v6988_v57  ;;  %v7596_v13 = vld [vmem:[#allocation11 + $0x6f8] sm:$0xf0]  ;;  %v8066_v52 = vld [vmem:[#allocation14 + $0x2a0] sm:$0xf]  ;;  %v1062_v60 = vperm.slane %v10734_v25, 1 }
 0x202   :  { %2737 = vmatpush.bf16.msrb.mxu3 %v7119_v0  ;;  %2715 = vmatpush.bf16.msrb.mxu1 %v7499_v14  ;;  %v8150_v0 = vld [vmem:[#allocation14 + $0x348] sm:$0xf]  ;;  %v10757_v7 = vpop.f32.mrf.mxu1  ;;  %v6767_v14 = vor.u32 %v9611_v2, %v6764_v4  ;;  %v9603_v18 = vld [vmem:[#allocation11 + $0x1c] sm:$0xf]  ;;  %v7599_v30 = vor.u32 %v9819_v12, %v7596_v13 }
 0x203   :  { %v8151_v11 = vor.u32 %v9964_v1, %v8150_v0  ;;  %v6732_v19 = vld [vmem:[#allocation11 + $0x38] sm:$0xf0]  ;;  %v8038_v4 = vld [vmem:[#allocation14 + $0x268] sm:$0xf] }
 0x204   :  { %2723 = vmatpush.bf16.msrb.mxu2 %v6895_v6  ;;  %2701 = vmatpush.bf16.msrb.mxu0 %v7275_v20  ;;  %v7404_v6 = vld [vmem:[#allocation11 + $0x578] sm:$0xf0]  ;;  %v6735_v32 = vor.u32 %v9603_v18, %v6732_v19  ;;  %v8010_v19 = vld [vmem:[#allocation14 + $0x230] sm:$0xf] }
 0x205   :  { %2716 = vmatmul.bf16.vlgmr.msrb.gmra.mxu1 %v10710_v56  ;;  %v7407_v15 = vor.u32 %v9771_v5, %v7404_v6  ;;  %v9763_v20 = vld [vmem:[#allocation11 + $0x51c] sm:$0xf]  ;;  %v9936_v5 = vld [vmem:[#allocation14 + $0x280] sm:$0xf0] }
 0x206   :  { %2738 = vmatpush.bf16.msrb.mxu3 %v7087_v16  ;;  %2760 = vmatpush.bf16.msra.mxu1 %v7727_v8  ;;  %v8122_v16 = vld [vmem:[#allocation14 + $0x310] sm:$0xf]  ;;  %v9957_v8 = vld [vmem:[#allocation14 + $0x328] sm:$0xf0]  ;;  %v2472_v27 = vpop.f32.mrf.mxu2  ;;  %v9811_v34 = vld [vmem:[#allocation11 + $0x69c] sm:$0xf] }
 0x207   :  { %v8123_v31 = vor.u32 %v9957_v8, %v8122_v16  ;;  %v7564_v35 = vld [vmem:[#allocation11 + $0x6b8] sm:$0xf0]  ;;  %v8039_v8 = vor.u32 %v9936_v5, %v8038_v4  ;;  %v8570_v27 = vld [vmem:[#allocation14 + $0x690] sm:$0xf] }
 0x208   :  { %2724 = vmatpush.bf16.msrb.mxu2 %v6863_v21  ;;  %2702 = vmatpush.bf16.msrb.mxu0 %v7243_v39  ;;  %v7372_v21 = vld [vmem:[#allocation11 + $0x538] sm:$0xf0]  ;;  %v7927_v39 = vor.u32 %v9908_v23, %v7926_v22  ;;  %v7567_v47 = vor.u32 %v9811_v34, %v7564_v35  ;;  %v9880_v34 = vld [vmem:[#allocation14 + $0xc0] sm:$0xf0]  ;;  %v8374_v35 = vld [vmem:[#allocation14 + $0x508] sm:$0xf] }
 0x209   :  { %v7375_v33 = vor.u32 %v9763_v20, %v7372_v21  ;;  %v9755_v41 = vld [vmem:[#allocation11 + $0x4dc] sm:$0xf]  ;;  %v9929_v20 = vld [vmem:[#allocation14 + $0x248] sm:$0xf0] }
 0x20a   :  { %2739 = vmatpush.bf16.msrb.mxu3 %v7055_v36  ;;  %2761 = vmatpush.bf16.msra.mxu1 %v7695_v37  ;;  %v8094_v36 = vld [vmem:[#allocation14 + $0x2d8] sm:$0xf]  ;;  %v10760_v37 = vpop.f32.mrf.mxu0  ;;  %v7340_v42 = vld [vmem:[#allocation11 + $0x4f8] sm:$0xf0]  ;;  %v2511_v43 = vpop.f32.mrf.mxu1 }
 0x20b   :  { %2703 = vmatmul.bf16.vlgmr.msrb.gmra.mxu0 %v10714_v17  ;;  %v7343_v49 = vor.u32 %v9755_v41, %v7340_v42  ;;  %v9803_v50 = vld [vmem:[#allocation11 + $0x65c] sm:$0xf] }
 0x20c   :  { %2725 = vmatpush.bf16.msrb.mxu2 %v6831_v40  ;;  %2747 = vmatpush.bf16.msra.mxu0 %v7471_v44  ;;  %v9950_v40 = vld [vmem:[#allocation14 + $0x2f0] sm:$0xf0]  ;;  %v7898_v44 = vld [vmem:[#allocation14 + $0x150] sm:$0xf] }
 0x20d   :  { %v8095_v48 = vor.u32 %v9950_v40, %v8094_v36  ;;  %v7308_v57 = vld [vmem:[#allocation11 + $0x4b8] sm:$0xf0]  ;;  %v10020_v36 = vld [vmem:[#allocation14 + $0x520] sm:$0xf0] }
 0x20e   :  { %2740 = vmatpush.bf16.msrb.mxu3 %v7023_v51  ;;  %2762 = vmatpush.bf16.msra.mxu1 %v7663_v54  ;;  %v7532_v51 = vld [vmem:[#allocation11 + $0x678] sm:$0xf0]  ;;  %v9943_v54 = vld [vmem:[#allocation14 + $0x2b8] sm:$0xf0] }
 0x20f   :  { %v9894_v59 = vld [vmem:[#allocation14 + $0x130] sm:$0xf0]  ;;  %v7535_v61 = vor.u32 %v9803_v50, %v7532_v51  ;;  %v8067_v0 = vor.u32 %v9943_v54, %v8066_v52  ;;  %v9873_v50 = vld [vmem:[#allocation14 + $0x88] sm:$0xf0]  ;;  %v8346_v52 = vld [vmem:[#allocation14 + $0x4d0] sm:$0xf] }
 0x210   :  { %2726 = vmatpush.bf16.msrb.mxu2 %v6799_v55  ;;  %2748 = vmatpush.bf16.msra.mxu0 %v7439_v62  ;;  %v9747_v55 = vld [vmem:[#allocation11 + $0x49c] sm:$0xf] }
 0x211   :  { %v9795_v62 = vld [vmem:[#allocation11 + $0x61c] sm:$0xf]  ;;  %v7311_v1 = vor.u32 %v9747_v55, %v7308_v57 }
 0x212   :  { %2741 = vmatpush.bf16.msrb.mxu3 %v6991_v9  ;;  %2763 = vmatpush.bf16.msra.mxu1 %v7631_v10  ;;  %v7500_v2 = vld [vmem:[#allocation11 + $0x638] sm:$0xf0]  ;;  %v2498_v6 = vpop.f32.mrf.mxu0  ;;  %v7871_v9 = vor.u32 %v9894_v59, %v7870_v58  ;;  %v8598_v10 = vld [vmem:[#allocation14 + $0x6c8] sm:$0xf] }
 0x213   :  { %v9739_v12 = vld [vmem:[#allocation11 + $0x45c] sm:$0xf]  ;;  %v7503_v16 = vor.u32 %v9795_v62, %v7500_v2  ;;  %v8318_v2 = vld [vmem:[#allocation14 + $0x498] sm:$0xf]  ;;  %v9046_v6 = vld [vmem:[#allocation14 + $0xa48] sm:$0xf] }
 0x214   :  { %2727 = vmatpush.bf16.msrb.mxu2 %v6767_v14  ;;  %2749 = vmatpush.bf16.msra.mxu0 %v7407_v15  ;;  %v7276_v13 = vld [vmem:[#allocation11 + $0x478] sm:$0xf0]  ;;  %v7842_v14 = vld [vmem:[#allocation14 + $0xe0] sm:$0xf]  ;;  %v9887_v15 = vld [vmem:[#allocation14 + $0xf8] sm:$0xf0] }
 0x215   :  { %2742 = vmatmul.bf16.vlgmr.msrb.gmra.mxu3 %v10702_v3  ;;  %v7899_v3 = vor.u32 %v9901_v45, %v7898_v44  ;;  %v7279_v22 = vor.u32 %v9739_v12, %v7276_v13  ;;  %v7843_v23 = vor.u32 %v9887_v15, %v7842_v14  ;;  %v7982_v44 = vld [vmem:[#allocation14 + $0x1f8] sm:$0xf]  ;;  %v9922_v45 = vld [vmem:[#allocation14 + $0x210] sm:$0xf0]  ;;  %v1063_v12 = vperm.slane %v10734_v25, 2 }
 0x216   :  { %5634 = vmatpush.bf16.msra.mxu3 %v8151_v11  ;;  %2764 = vmatpush.bf16.msra.mxu1 %v7599_v30  ;;  %v10076_v11 = vld [vmem:[#allocation14 + $0x6e0] sm:$0xf0]  ;;  %v10069_v30 = vld [vmem:[#allocation14 + $0x6a8] sm:$0xf0]  ;;  %v7983_v54 = vor.u32 %v9922_v45, %v7982_v44  ;;  %v10006_v5 = vld [vmem:[#allocation14 + $0x4b0] sm:$0xf0] }
 0x217   :  { %v8599_v18 = vor.u32 %v10076_v11, %v8598_v10  ;;  %v8571_v40 = vor.u32 %v10069_v30, %v8570_v27  ;;  %v8486_v15 = vld [vmem:[#allocation14 + $0x5e8] sm:$0xf]  ;;  %v10132_v27 = vld [vmem:[#allocation14 + $0x8a0] sm:$0xf0]  ;;  %v2471_v44 = vadd.f32 %v10754_v53, %v1063_v12  ;;  %v9978_v12 = vld [vmem:[#allocation14 + $0x3d0] sm:$0xf0] }
 0x218   :  { %2728 = vmatpush.bf16.msrb.mxu2 %v6735_v32  ;;  %2750 = vmatpush.bf16.msra.mxu0 %v7375_v33  ;;  %v10765_v21 = vpop.f32.mrf.mxu3  ;;  %v7244_v32 = vld [vmem:[#allocation11 + $0x438] sm:$0xf0]  ;;  %v7814_v33 = vld [vmem:[#allocation14 + $0xa8] sm:$0xf] }
 0x219   :  { %v7815_v43 = vor.u32 %v9880_v34, %v7814_v33  ;;  %v2773_v33 = vmax.f32 %v10741_v38, 0.0  ;;  %v9992_v38 = vld [vmem:[#allocation14 + $0x440] sm:$0xf0] }
 0x21a   :  { %5635 = vmatpush.bf16.msra.mxu3 %v8123_v31  ;;  %2765 = vmatpush.bf16.msra.mxu1 %v7567_v47  ;;  %v9731_v31 = vld [vmem:[#allocation11 + $0x41c] sm:$0xf]  ;;  %v8542_v47 = vld [vmem:[#allocation14 + $0x658] sm:$0xf] }
 0x21b   :  { %2729 = vmatmul.bf16.vlgmr.msrb.gmra.mxu2 %v10705_v26  ;;  %v2419_v26 = vadd.f32 %v10744_v46, %v1062_v60  ;;  %v7247_v42 = vor.u32 %v9731_v31, %v7244_v32  ;;  %v9915_v60 = vld [vmem:[#allocation14 + $0x1d8] sm:$0xf0]  ;;  %v9018_v31 = vld [vmem:[#allocation14 + $0xa10] sm:$0xf]  ;;  %v10181_v32 = vld [vmem:[#allocation14 + $0xa28] sm:$0xf0] }
 0x21c   :  { %5621 = vmatpush.bf16.msra.mxu2 %v7927_v39  ;;  %2751 = vmatpush.bf16.msra.mxu0 %v7343_v49  ;;  %v8011_v39 = vor.u32 %v9929_v20, %v8010_v19  ;;  %v7786_v49 = vld [vmem:[#allocation14 + $0x70] sm:$0xf]  ;;  %v8290_v19 = vld [vmem:[#allocation14 + $0x460] sm:$0xf] }
 0x21d   :  { %v2432_v46 = vadd.f32 %v10739_v24, %v2419_v26  ;;  %v10062_v24 = vld [vmem:[#allocation14 + $0x670] sm:$0xf0]  ;;  %v7787_v59 = vor.u32 %v9873_v50, %v7786_v49  ;;  %v10048_v26 = vld [vmem:[#allocation14 + $0x600] sm:$0xf0]  ;;  %v8990_v50 = vld [vmem:[#allocation14 + $0x9d8] sm:$0xf] }
 0x21e   :  { %5636 = vmatpush.bf16.msra.mxu3 %v8095_v48  ;;  %2766 = vmatpush.bf16.msra.mxu1 %v7535_v61  ;;  %v8375_v48 = vor.u32 %v10020_v36, %v8374_v35  ;;  %v2522_v51 = vpop.f32.mrf.mxu2  ;;  %v8543_v57 = vor.u32 %v10062_v24, %v8542_v47  ;;  %v10055_v61 = vld [vmem:[#allocation14 + $0x638] sm:$0xf0]  ;;  %v8794_v47 = vld [vmem:[#allocation14 + $0x850] sm:$0xf]  ;;  %v9019_v24 = vor.u32 %v10181_v32, %v9018_v31  ;;  %v10153_v32 = vld [vmem:[#allocation14 + $0x948] sm:$0xf0] }
 0x21f   :  { %v2445_v41 = vadd.f32 %v10749_v28, %v2432_v46  ;;  %v7954_v28 = vld [vmem:[#allocation14 + $0x1c0] sm:$0xf]  ;;  %v8487_v46 = vor.u32 %v10048_v26, %v8486_v15  ;;  %v8934_v26 = vld [vmem:[#allocation14 + $0x968] sm:$0xf]  ;;  %v8906_v31 = vld [vmem:[#allocation14 + $0x930] sm:$0xf] }
 0x220   :  { %5622 = vmatpush.bf16.msra.mxu2 %v7899_v3  ;;  %2752 = vmatpush.bf16.msra.mxu0 %v7311_v1  ;;  %v10013_v3 = vld [vmem:[#allocation14 + $0x4e8] sm:$0xf0]  ;;  %v2537_v58 = vpop.f32.mrf.mxu3  ;;  %v9866_v1 = vld [vmem:[#allocation14 + $0x50] sm:$0xf0]  ;;  %v7955_v10 = vor.u32 %v9915_v60, %v7954_v28 }
 0x221   :  { %v2458_v55 = vadd.f32 %v10747_v63, %v2445_v41  ;;  %v8347_v62 = vor.u32 %v10013_v3, %v8346_v52  ;;  %v1064_v63 = vperm.slane %v10734_v25, 3  ;;  %v8458_v41 = vld [vmem:[#allocation14 + $0x5b0] sm:$0xf]  ;;  %v10782_v52 = vpack.c.bf16 %v2773_v33, %v2773_v33  ;;  %v9985_v60 = vld [vmem:[#allocation14 + $0x408] sm:$0xf0] }
 0x222   :  { %5637 = vmatpush.bf16.msra.mxu3 %v8067_v0  ;;  %2767 = vmatpush.bf16.msra.mxu1 %v7503_v16  ;;  %v7758_v0 = vld [vmem:[#allocation14 + $0x38] sm:$0xf]  ;;  %v10771_v4 = vpop.f32.mrf.mxu1  ;;  %v8319_v16 = vor.u32 %v10006_v5, %v8318_v2  ;;  %v8234_v58 = vld [vmem:[#allocation14 + $0x3f0] sm:$0xf]  ;;  %v9270_v33 = vld [vmem:[#allocation14 + $0xc08] sm:$0xf] }
 0x223   :  { %v2774_v11 = vmax.f32 %v2458_v55, 0.0  ;;  %v7759_v14 = vor.u32 %v9866_v1, %v7758_v0  ;;  %v2523_v30 = vadd.f32 %v2522_v51, %v1064_v63  ;;  %v10174_v51 = vld [vmem:[#allocation14 + $0x9f0] sm:$0xf0]  ;;  %v8430_v55 = vld [vmem:[#allocation14 + $0x578] sm:$0xf] }
 0x224   :  { %5623 = vmatpush.bf16.msra.mxu2 %v7871_v9  ;;  %2753 = vmatpush.bf16.msra.mxu0 %v7279_v22  ;;  %v10188_v9 = vld [vmem:[#allocation14 + $0xa60] sm:$0xf0]  ;;  %v10167_v0 = vld [vmem:[#allocation14 + $0x9b8] sm:$0xf0]  ;;  %v8402_v63 = vld [vmem:[#allocation14 + $0x540] sm:$0xf] }
 0x225   :  { %2768 = vmatmul.bf16.vlgmr.msra.gmra.mxu1 %v10710_v56  ;;  %v8514_v56 = vld [vmem:[#allocation14 + $0x620] sm:$0xf]  ;;  %v9047_v20 = vor.u32 %v10188_v9, %v9046_v6  ;;  %v10777_v34 = vpack.c.bf16 %v2774_v11, %v2774_v11  ;;  %v2536_v49 = vadd.f32 %v10765_v21, %v2523_v30  ;;  %v10118_v21 = vld [vmem:[#allocation14 + $0x830] sm:$0xf0]  ;;  %v8235_v9 = vor.u32 %v9985_v60, %v8234_v58  ;;  %v8206_v11 = vld [vmem:[#allocation14 + $0x3b8] sm:$0xf] }
 0x226   :  { %5638 = vmatpush.bf16.msra.mxu3 %v8039_v8  ;;  %5660 = vmatpush.bf16.msrb.mxu1 %v8599_v18  ;;  %v8515_v13 = vor.u32 %v10055_v61, %v8514_v56  ;;  %v7730_v8 = vld [vmem:[#allocation14] sm:$0xf]  ;;  %v9859_v18 = vld [vmem:[#allocation14 + $0x18] sm:$0xf0]  ;;  %v2524_v22 = vpop.f32.mrf.mxu2  ;;  %v8766_v56 = vld [vmem:[#allocation14 + $0x818] sm:$0xf]  ;;  %v8991_v61 = vor.u32 %v10174_v51, %v8990_v50 }
 0x227   :  { %v7731_v36 = vor.u32 %v9859_v18, %v7730_v8  ;;  %v8178_v22 = vld [vmem:[#allocation14 + $0x380] sm:$0xf]  ;;  %v9214_v58 = vld [vmem:[#allocation14 + $0xb98] sm:$0xf] }
 0x228   :  { %5624 = vmatpush.bf16.msra.mxu2 %v7843_v23  ;;  %2754 = vmatpush.bf16.msra.mxu0 %v7247_v42  ;;  %v9999_v23 = vld [vmem:[#allocation14 + $0x478] sm:$0xf0]  ;;  %v2548_v35 = vpop.f32.mrf.mxu0  ;;  %v10041_v42 = vld [vmem:[#allocation14 + $0x5c8] sm:$0xf0] }
 0x229   :  { %v8459_v3 = vor.u32 %v10041_v42, %v8458_v41  ;;  %v10097_v41 = vld [vmem:[#allocation14 + $0x788] sm:$0xf0]  ;;  %v8907_v42 = vor.u32 %v10153_v32, %v8906_v31  ;;  %v9891_v31 = vld [vmem:[#allocation14 + $0x11c] sm:$0xf]  ;;  %v7872_v32 = vld [vmem:[#allocation14 + $0x134] sm:$0xf0] }
 0x22a   :  { %5639 = vmatpush.bf16.msra.mxu3 %v8011_v39  ;;  %5661 = vmatpush.bf16.msrb.mxu1 %v8571_v40  ;;  %v8291_v39 = vor.u32 %v9999_v23, %v8290_v19  ;;  %v2563_v45 = vpop.f32.mrf.mxu1  ;;  %v8207_v19 = vor.u32 %v9978_v12, %v8206_v11  ;;  %v9971_v23 = vld [vmem:[#allocation14 + $0x398] sm:$0xf0]  ;;  %v9954_v11 = vld [vmem:[#allocation14 + $0x314] sm:$0xf]  ;;  %v8124_v12 = vld [vmem:[#allocation14 + $0x32c] sm:$0xf0] }
 0x22b   :  { %2755 = vmatmul.bf16.vlgmr.msra.gmra.mxu0 %v10714_v17  ;;  %v8822_v17 = vld [vmem:[#allocation14 + $0x888] sm:$0xf] }
 0x22c   :  { %5625 = vmatpush.bf16.msra.mxu2 %v7815_v43  ;;  %5647 = vmatpush.bf16.msrb.mxu0 %v8375_v48  ;;  %v8823_v40 = vor.u32 %v10132_v27, %v8822_v17  ;;  %v8262_v43 = vld [vmem:[#allocation14 + $0x428] sm:$0xf]  ;;  %v10125_v48 = vld [vmem:[#allocation14 + $0x868] sm:$0xf0]  ;;  %v10104_v27 = vld [vmem:[#allocation14 + $0x7c0] sm:$0xf0] }
 0x22d   :  { %v8263_v53 = vor.u32 %v9992_v38, %v8262_v43  ;;  %v8795_v28 = vor.u32 %v10125_v48, %v8794_v47  ;;  %v8710_v17 = vld [vmem:[#allocation14 + $0x7a8] sm:$0xf]  ;;  %v8878_v43 = vld [vmem:[#allocation14 + $0x8f8] sm:$0xf]  ;;  %v10146_v38 = vld [vmem:[#allocation14 + $0x910] sm:$0xf0] }
 0x22e   :  { %5640 = vmatpush.bf16.msra.mxu3 %v7983_v54  ;;  %5662 = vmatpush.bf16.msrb.mxu1 %v8543_v57  ;;  %v2549_v54 = vadd.f32 %v2548_v35, %v2536_v49  ;;  %v10034_v57 = vld [vmem:[#allocation14 + $0x590] sm:$0xf0]  ;;  %v9242_v47 = vld [vmem:[#allocation14 + $0xbd0] sm:$0xf]  ;;  %v10237_v48 = vld [vmem:[#allocation14 + $0xbe8] sm:$0xf0] }
 0x22f   :  { %v8431_v2 = vor.u32 %v10034_v57, %v8430_v55  ;;  %v9243_v55 = vor.u32 %v10237_v48, %v9242_v47  ;;  %v10139_v57 = vld [vmem:[#allocation14 + $0x8d8] sm:$0xf0]  ;;  %v9884_v47 = vld [vmem:[#allocation14 + $0xe4] sm:$0xf] }
 0x230   :  { %5626 = vmatpush.bf16.msra.mxu2 %v7787_v59  ;;  %5648 = vmatpush.bf16.msrb.mxu0 %v8347_v62  ;;  %v2484_v59 = vadd.f32 %v10751_v29, %v2471_v44  ;;  %v8962_v62 = vld [vmem:[#allocation14 + $0x9a0] sm:$0xf]  ;;  %v2550_v5 = vpop.f32.mrf.mxu0  ;;  %v2562_v6 = vadd.f32 %v10771_v4, %v2549_v54  ;;  %v8767_v29 = vor.u32 %v10118_v21, %v8766_v56  ;;  %v10090_v54 = vld [vmem:[#allocation14 + $0x750] sm:$0xf0]  ;;  %v9961_v56 = vld [vmem:[#allocation14 + $0x34c] sm:$0xf] }
 0x231   :  { %v8963_v15 = vor.u32 %v10167_v0, %v8962_v62  ;;  %v8152_v21 = vld [vmem:[#allocation14 + $0x364] sm:$0xf0]  ;;  %v8626_v62 = vld [vmem:[#allocation14 + $0x700] sm:$0xf]  ;;  %v10083_v0 = vld [vmem:[#allocation14 + $0x718] sm:$0xf0] }
 0x232   :  { %5641 = vmatpush.bf16.msra.mxu3 %v7955_v10  ;;  %5663 = vmatpush.bf16.msrb.mxu1 %v8515_v13  ;;  %v2497_v1 = vadd.f32 %v10760_v37, %v2484_v59  ;;  %v10027_v10 = vld [vmem:[#allocation14 + $0x558] sm:$0xf0]  ;;  %v8738_v13 = vld [vmem:[#allocation14 + $0x7e0] sm:$0xf]  ;;  %v2776_v18 = vmax.f32 %v2562_v6, 0.0 }
 0x233   :  { %v8403_v37 = vor.u32 %v10027_v10, %v8402_v63  ;;  %v10230_v59 = vld [vmem:[#allocation14 + $0xbb0] sm:$0xf0]  ;;  %v9186_v63 = vld [vmem:[#allocation14 + $0xb60] sm:$0xf]  ;;  %v10223_v10 = vld [vmem:[#allocation14 + $0xb78] sm:$0xf0] }
 0x234   :  { %5627 = vmatpush.bf16.msra.mxu2 %v7759_v14  ;;  %5649 = vmatpush.bf16.msrb.mxu0 %v8319_v16  ;;  %v10111_v14 = vld [vmem:[#allocation14 + $0x7f8] sm:$0xf0]  ;;  %v10160_v16 = vld [vmem:[#allocation14 + $0x980] sm:$0xf0]  ;;  %v2510_v8 = vadd.f32 %v10757_v7, %v2497_v1  ;;  %v10791_v7 = vpack.c.bf16 %v2776_v18, %v2776_v18  ;;  %v9905_v1 = vld [vmem:[#allocation14 + $0x18c] sm:$0xf]  ;;  %v9215_v5 = vor.u32 %v10230_v59, %v9214_v58 }
 0x235   :  { %5642 = vmatmul.bf16.vlgmr.msra.gmra.mxu3 %v10777_v34  ;;  %v8935_v30 = vor.u32 %v10160_v16, %v8934_v26  ;;  %v9898_v16 = vld [vmem:[#allocation14 + $0x154] sm:$0xf]  ;;  %v7900_v18 = vld [vmem:[#allocation14 + $0x16c] sm:$0xf0]  ;;  %v10293_v58 = vld [vmem:[#allocation14 + $0xda8] sm:$0xf0] }
 0x236   :  { %5686 = vmatpush.bf16.msrb.mxu3 %v9047_v20  ;;  %5664 = vmatpush.bf16.msrb.mxu1 %v8487_v46  ;;  %v8739_v20 = vor.u32 %v10111_v14, %v8738_v13  ;;  %v10244_v46 = vld [vmem:[#allocation14 + $0xc20] sm:$0xf0]  ;;  %v2775_v35 = vmax.f32 %v2510_v8, 0.0  ;;  %v8627_v14 = vor.u32 %v10083_v0, %v8626_v62 }
 0x237   :  { %v9271_v44 = vor.u32 %v10244_v46, %v9270_v33 }
 0x238   :  { %5628 = vmatpush.bf16.msra.mxu2 %v7731_v36  ;;  %5650 = vmatpush.bf16.msrb.mxu0 %v8291_v39  ;;  %v10789_v4 = vpop.f32.mrf.mxu3  ;;  %v8179_v36 = vor.u32 %v9971_v23, %v8178_v22  ;;  %v8711_v39 = vor.u32 %v10104_v27, %v8710_v17  ;;  %v10795_v51 = vpack.c.bf16 %v2775_v35, %v2775_v35  ;;  %v10216_v22 = vld [vmem:[#allocation14 + $0xb40] sm:$0xf0]  ;;  %v9947_v17 = vld [vmem:[#allocation14 + $0x2dc] sm:$0xf]  ;;  %v8096_v27 = vld [vmem:[#allocation14 + $0x2f4] sm:$0xf0] }
 0x239   :  { %v8099_v35 = vor.u32 %v9947_v17, %v8096_v27  ;;  %v9863_v27 = vld [vmem:[#allocation14 + $0x3c] sm:$0xf] }
 0x23a   :  { %5687 = vmatpush.bf16.msrb.mxu3 %v9019_v24  ;;  %5665 = vmatpush.bf16.msrb.mxu1 %v8459_v3  ;;  %v1065_v24 = vperm.slane %v10734_v25, 4  ;;  %v8654_v3 = vld [vmem:[#allocation14 + $0x738] sm:$0xf] }
 0x23b   :  { %5629 = vmatmul.bf16.vlgmr.msra.gmra.mxu2 %v10782_v52 }
 0x23c   :  { %5673 = vmatpush.bf16.msrb.mxu2 %v8823_v40  ;;  %5651 = vmatpush.bf16.msrb.mxu0 %v8263_v53  ;;  %v8682_v40 = vld [vmem:[#allocation14 + $0x770] sm:$0xf]  ;;  %v8879_v53 = vor.u32 %v10146_v38, %v8878_v43  ;;  %v9494_v43 = vld [vmem:[#allocation14 + $0xdc8] sm:$0xf]  ;;  %v7875_v38 = vor.u32 %v9891_v31, %v7872_v32 }
 0x23d   :  { %v8683_v50 = vor.u32 %v10097_v41, %v8682_v40  ;;  %v9940_v40 = vld [vmem:[#allocation14 + $0x2a4] sm:$0xf]  ;;  %v8068_v41 = vld [vmem:[#allocation14 + $0x2bc] sm:$0xf0] }
 0x23e   :  { %5688 = vmatpush.bf16.msrb.mxu3 %v8991_v61  ;;  %5666 = vmatpush.bf16.msrb.mxu1 %v8431_v2  ;;  %v2574_v45 = vpop.f32.mrf.mxu2  ;;  %v8655_v61 = vor.u32 %v10090_v54, %v8654_v3  ;;  %v9102_v3 = vld [vmem:[#allocation14 + $0xab8] sm:$0xf]  ;;  %v10202_v54 = vld [vmem:[#allocation14 + $0xad0] sm:$0xf0] }
 0x23f   :  { %v2575_v25 = vadd.f32 %v2574_v45, %v1065_v24 }
 0x240   :  { %5674 = vmatpush.bf16.msrb.mxu2 %v8795_v28  ;;  %5652 = vmatpush.bf16.msrb.mxu0 %v8235_v9  ;;  %v2589_v49 = vpop.f32.mrf.mxu3  ;;  %v8850_v28 = vld [vmem:[#allocation14 + $0x8c0] sm:$0xf]  ;;  %v7928_v9 = vld [vmem:[#allocation14 + $0x1a4] sm:$0xf0] }
 0x241   :  { %v8851_v2 = vor.u32 %v10139_v57, %v8850_v28  ;;  %v2588_v13 = vadd.f32 %v10789_v4, %v2575_v25  ;;  %v7931_v26 = vor.u32 %v9905_v1, %v7928_v9  ;;  %v7903_v4 = vor.u32 %v9898_v16, %v7900_v18  ;;  %v7844_v49 = vld [vmem:[#allocation14 + $0xfc] sm:$0xf0]  ;;  %v8040_v28 = vld [vmem:[#allocation14 + $0x284] sm:$0xf0]  ;;  %v9466_v57 = vld [vmem:[#allocation14 + $0xd90] sm:$0xf] }
 0x242   :  { %5689 = vmatpush.bf16.msrb.mxu3 %v8963_v15  ;;  %5667 = vmatpush.bf16.msrb.mxu1 %v8403_v37  ;;  %v2613_v60 = vpop.f32.mrf.mxu1  ;;  %v9187_v37 = vor.u32 %v10223_v10, %v9186_v63  ;;  %v7847_v59 = vor.u32 %v9884_v47, %v7844_v49  ;;  %v9103_v25 = vor.u32 %v10202_v54, %v9102_v3  ;;  %v9074_v1 = vld [vmem:[#allocation14 + $0xa80] sm:$0xf]  ;;  %v8376_v9 = vld [vmem:[#allocation14 + $0x524] sm:$0xf0]  ;;  %v7984_v16 = vld [vmem:[#allocation14 + $0x214] sm:$0xf0] }
 0x243   :  { %v9856_v47 = vld [vmem:[#allocation14 + $0x4] sm:$0xf]  ;;  %v8824_v3 = vld [vmem:[#allocation14 + $0x8a4] sm:$0xf0] }
 0x244   :  { %5675 = vmatpush.bf16.msrb.mxu2 %v8767_v29  ;;  %5653 = vmatpush.bf16.msrb.mxu0 %v8207_v19  ;;  %v8155_v29 = vor.u32 %v9961_v56, %v8152_v21  ;;  %v8127_v19 = vor.u32 %v9954_v11, %v8124_v12  ;;  %v9926_v56 = vld [vmem:[#allocation14 + $0x234] sm:$0xf]  ;;  %v8012_v21 = vld [vmem:[#allocation14 + $0x24c] sm:$0xf0]  ;;  %v9996_v54 = vld [vmem:[#allocation14 + $0x464] sm:$0xf] }
 0x245   :  { %5668 = vmatmul.bf16.vlgmr.msrb.gmra.mxu1 %v10791_v7  ;;  %v9870_v12 = vld [vmem:[#allocation14 + $0x74] sm:$0xf] }
 0x246   :  { %5690 = vmatpush.bf16.msrb.mxu3 %v8935_v30  ;;  %v2576_v6 = vpop.f32.mrf.mxu2 }
 0x247   :  { %v10017_v6 = vld [vmem:[#allocation14 + $0x50c] sm:$0xf] }
 0x248   :  { %5676 = vmatpush.bf16.msrb.mxu2 %v8739_v20  ;;  %5654 = vmatpush.bf16.msrb.mxu0 %v8179_v36  ;;  %v2600_v15 = vpop.f32.mrf.mxu0  ;;  %v9158_v20 = vld [vmem:[#allocation14 + $0xb28] sm:$0xf]  ;;  %v9130_v36 = vld [vmem:[#allocation14 + $0xaf0] sm:$0xf] }
 0x249   :  { %v2601_v8 = vadd.f32 %v2600_v15, %v2588_v13  ;;  %v9159_v33 = vor.u32 %v10216_v22, %v9158_v20  ;;  %v7788_v13 = vld [vmem:[#allocation14 + $0x8c] sm:$0xf0]  ;;  %v9919_v15 = vld [vmem:[#allocation14 + $0x1fc] sm:$0xf] }
 0x24a   :  { %5691 = vmatpush.bf16.msrb.mxu3 %v8907_v42  ;;  %v2615_v23 = vpop.f32.mrf.mxu1  ;;  %v10279_v20 = vld [vmem:[#allocation14 + $0xd38] sm:$0xf0]  ;;  %v7791_v17 = vor.u32 %v9870_v12, %v7788_v13  ;;  %v7987_v32 = vor.u32 %v9919_v15, %v7984_v16  ;;  %v9048_v12 = vld [vmem:[#allocation14 + $0xa64] sm:$0xf0]  ;;  %v8768_v15 = vld [vmem:[#allocation14 + $0x834] sm:$0xf0] }
 0x24b   :  { %5655 = vmatmul.bf16.vlgmr.msrb.gmra.mxu0 %v10795_v51  ;;  %v2614_v30 = vadd.f32 %v2613_v60, %v2601_v8  ;;  %v7816_v60 = vld [vmem:[#allocation14 + $0xc4] sm:$0xf0]  ;;  %v8348_v8 = vld [vmem:[#allocation14 + $0x4ec] sm:$0xf0]  ;;  %v10804_v22 = vld [vmem:[#allocation13] sm:$0xff] }
 0x24c   :  { %5677 = vmatpush.bf16.msrb.mxu2 %v8711_v39  ;;  %5699 = vmatpush.bf16.msra.mxu0 %v9271_v44  ;;  %v10209_v39 = vld [vmem:[#allocation14 + $0xb08] sm:$0xf0]  ;;  %v10300_v44 = vld [vmem:[#allocation14 + $0xde0] sm:$0xf0]  ;;  %v1066_v23 = vperm.slane %v10804_v22, 5 }
 0x24d   :  { %v2777_v46 = vmax.f32 %v2614_v30, 0.0  ;;  %v9131_v48 = vor.u32 %v10209_v39, %v9130_v36  ;;  %v9495_v24 = vor.u32 %v10300_v44, %v9494_v43  ;;  %v7760_v30 = vld [vmem:[#allocation14 + $0x54] sm:$0xf0]  ;;  %v10003_v36 = vld [vmem:[#allocation14 + $0x49c] sm:$0xf] }
 0x24e   :  { %5692 = vmatpush.bf16.msrb.mxu3 %v8879_v53  ;;  %v9933_v53 = vld [vmem:[#allocation14 + $0x26c] sm:$0xf]  ;;  %v8320_v39 = vld [vmem:[#allocation14 + $0x4b4] sm:$0xf0]  ;;  %v10115_v13 = vld [vmem:[#allocation14 + $0x81c] sm:$0xf] }
 0x24f   :  { %v10799_v42 = vpack.c.bf16 %v2777_v46, %v2777_v46  ;;  %5712 = vmatpush.bf16.msra.mxu1 %v9495_v24  ;;  %v8043_v0 = vor.u32 %v9933_v53, %v8040_v28  ;;  %v7956_v46 = vld [vmem:[#allocation14 + $0x1dc] sm:$0xf0]  ;;  %v10129_v24 = vld [vmem:[#allocation14 + $0x88c] sm:$0xf]  ;;  %v8236_v16 = vld [vmem:[#allocation14 + $0x40c] sm:$0xf0] }
 0x250   :  { %5678 = vmatpush.bf16.msrb.mxu2 %v8683_v50  ;;  %5700 = vmatpush.bf16.msra.mxu0 %v9243_v55  ;;  %v2602_v45 = vpop.f32.mrf.mxu0  ;;  %v8071_v50 = vor.u32 %v9940_v40, %v8068_v41  ;;  %v9877_v55 = vld [vmem:[#allocation14 + $0xac] sm:$0xf]  ;;  %v9382_v40 = vld [vmem:[#allocation14 + $0xce8] sm:$0xf]  ;;  %v10272_v41 = vld [vmem:[#allocation14 + $0xd00] sm:$0xf0] }
 0x251   :  { %v7819_v10 = vor.u32 %v9877_v55, %v7816_v60  ;;  %v9383_v43 = vor.u32 %v10272_v41, %v9382_v40  ;;  %v7763_v45 = vor.u32 %v9863_v27, %v7760_v30  ;;  %v8292_v53 = vld [vmem:[#allocation14 + $0x47c] sm:$0xf0]  ;;  %v9354_v55 = vld [vmem:[#allocation14 + $0xcb0] sm:$0xf]  ;;  %v8771_v30 = vor.u32 %v10115_v13, %v8768_v15  ;;  %v8488_v15 = vld [vmem:[#allocation14 + $0x604] sm:$0xf0] }
 0x252   :  { %5693 = vmatpush.bf16.msrb.mxu3 %v8851_v2  ;;  %v10195_v2 = vld [vmem:[#allocation14 + $0xa98] sm:$0xf0] }
 0x253   :  { %v9075_v11 = vor.u32 %v10195_v2, %v9074_v1  ;;  %v9989_v1 = vld [vmem:[#allocation14 + $0x42c] sm:$0xf]  ;;  %v8264_v2 = vld [vmem:[#allocation14 + $0x444] sm:$0xf0] }
 0x254   :  { %5679 = vmatpush.bf16.msrb.mxu2 %v8655_v61  ;;  %5701 = vmatpush.bf16.msra.mxu0 %v9215_v5  ;;  %v9467_v61 = vor.u32 %v10293_v58, %v9466_v57  ;;  %v9438_v5 = vld [vmem:[#allocation14 + $0xd58] sm:$0xf]  ;;  %v10265_v57 = vld [vmem:[#allocation14 + $0xcc8] sm:$0xf0] }
 0x256   :  { %5738 = vmatpush.bf16.msra.mxu3 %v8155_v29  ;;  %5713 = vmatpush.bf16.msra.mxu1 %v9467_v61  ;;  %v10286_v29 = vld [vmem:[#allocation14 + $0xd70] sm:$0xf0] }
 0x257   :  { %v9439_v63 = vor.u32 %v10286_v29, %v9438_v5 }
 0x258   :  { %5680 = vmatpush.bf16.msrb.mxu2 %v8627_v14  ;;  %5702 = vmatpush.bf16.msra.mxu0 %v9187_v37  ;;  %v10802_v62 = vpop.f32.mrf.mxu3  ;;  %v8015_v14 = vor.u32 %v9926_v56, %v8012_v21  ;;  %v10010_v37 = vld [vmem:[#allocation14 + $0x4d4] sm:$0xf]  ;;  %v8827_v56 = vor.u32 %v10129_v24, %v8824_v3  ;;  %v8712_v24 = vld [vmem:[#allocation14 + $0x7c4] sm:$0xf0]  ;;  %v9968_v3 = vld [vmem:[#allocation14 + $0x384] sm:$0xf] }
 0x259   :  { %v10122_v21 = vld [vmem:[#allocation14 + $0x854] sm:$0xf] }
 0x25a   :  { %5739 = vmatpush.bf16.msra.mxu3 %v8127_v19  ;;  %5714 = vmatpush.bf16.msra.mxu1 %v9439_v63  ;;  %v9410_v19 = vld [vmem:[#allocation14 + $0xd20] sm:$0xf] }
 0x25b   :  { %5681 = vmatmul.bf16.vlgmr.msrb.gmra.mxu2 %v10799_v42 }
 0x25c   :  { %5725 = vmatpush.bf16.msra.mxu2 %v7931_v26  ;;  %5703 = vmatpush.bf16.msra.mxu0 %v9159_v33  ;;  %v8379_v26 = vor.u32 %v10017_v6, %v8376_v9  ;;  %v9912_v33 = vld [vmem:[#allocation14 + $0x1c4] sm:$0xf]  ;;  %v9326_v6 = vld [vmem:[#allocation14 + $0xc78] sm:$0xf]  ;;  %v10258_v9 = vld [vmem:[#allocation14 + $0xc90] sm:$0xf0] }
 0x25d   :  { %v7959_v49 = vor.u32 %v9912_v33, %v7956_v46  ;;  %v9327_v63 = vor.u32 %v10258_v9, %v9326_v6  ;;  %v8600_v33 = vld [vmem:[#allocation14 + $0x6e4] sm:$0xf0]  ;;  %v10157_v9 = vld [vmem:[#allocation14 + $0x96c] sm:$0xf] }
 0x25e   :  { %5740 = vmatpush.bf16.msra.mxu3 %v8099_v35  ;;  %v2626_v18 = vpop.f32.mrf.mxu2  ;;  %v8351_v35 = vor.u32 %v10010_v37, %v8348_v8  ;;  %v9298_v8 = vld [vmem:[#allocation14 + $0xc40] sm:$0xf] }
 0x260   :  { %5726 = vmatpush.bf16.msra.mxu2 %v7903_v4  ;;  %5704 = vmatpush.bf16.msra.mxu0 %v9131_v48  ;;  %v9411_v4 = vor.u32 %v10279_v20, %v9410_v19  ;;  %v2641_v31 = vpop.f32.mrf.mxu3  ;;  %v7732_v48 = vld [vmem:[#allocation14 + $0x1c] sm:$0xf0]  ;;  %v10178_v20 = vld [vmem:[#allocation14 + $0xa14] sm:$0xf] }
 0x261   :  { %v7735_v58 = vor.u32 %v9856_v47, %v7732_v48  ;;  %v8992_v47 = vld [vmem:[#allocation14 + $0x9f4] sm:$0xf0]  ;;  %v10101_v48 = vld [vmem:[#allocation14 + $0x7ac] sm:$0xf] }
 0x262   :  { %5741 = vmatpush.bf16.msra.mxu3 %v8071_v50  ;;  %5715 = vmatpush.bf16.msra.mxu1 %v9411_v4  ;;  %v2665_v44 = vpop.f32.mrf.mxu1  ;;  %v8323_v50 = vor.u32 %v10003_v36, %v8320_v39  ;;  %v10108_v4 = vld [vmem:[#allocation14 + $0x7e4] sm:$0xf]  ;;  %v9975_v36 = vld [vmem:[#allocation14 + $0x3bc] sm:$0xf]  ;;  %v8208_v39 = vld [vmem:[#allocation14 + $0x3d4] sm:$0xf0] }
 0x264   :  { %5727 = vmatpush.bf16.msra.mxu2 %v7875_v38  ;;  %5705 = vmatpush.bf16.msra.mxu0 %v9103_v25  ;;  %v2627_v38 = vadd.f32 %v2626_v18, %v1066_v23  ;;  %v8295_v25 = vor.u32 %v9996_v54, %v8292_v53  ;;  %v10251_v18 = vld [vmem:[#allocation14 + $0xc58] sm:$0xf0]  ;;  %v9020_v23 = vld [vmem:[#allocation14 + $0xa2c] sm:$0xf0]  ;;  %v8180_v54 = vld [vmem:[#allocation14 + $0x39c] sm:$0xf0] }
 0x265   :  { %v9023_v41 = vor.u32 %v10178_v20, %v9020_v23  ;;  %v10059_v53 = vld [vmem:[#allocation14 + $0x65c] sm:$0xf]  ;;  %v8628_v20 = vld [vmem:[#allocation14 + $0x71c] sm:$0xf0] }
 0x266   :  { %5742 = vmatpush.bf16.msra.mxu3 %v8043_v0  ;;  %5716 = vmatpush.bf16.msra.mxu1 %v9383_v43  ;;  %v2628_v28 = vpop.f32.mrf.mxu2  ;;  %v2640_v60 = vadd.f32 %v10802_v62, %v2627_v38  ;;  %v8796_v0 = vld [vmem:[#allocation14 + $0x86c] sm:$0xf0]  ;;  %v10185_v62 = vld [vmem:[#allocation14 + $0xa4c] sm:$0xf]  ;;  %v10171_v43 = vld [vmem:[#allocation14 + $0x9dc] sm:$0xf] }
 0x267   :  { %v9051_v19 = vor.u32 %v10185_v62, %v9048_v12  ;;  %v1067_v62 = vperm.slane %v10804_v22, 6 }
 0x268   :  { %5728 = vmatpush.bf16.msra.mxu2 %v7847_v59  ;;  %5706 = vmatpush.bf16.msra.mxu0 %v9075_v11  ;;  %v9355_v59 = vor.u32 %v10265_v57, %v9354_v55  ;;  %v2652_v61 = vpop.f32.mrf.mxu0  ;;  %v8799_v11 = vor.u32 %v10122_v21, %v8796_v0  ;;  %v8544_v55 = vld [vmem:[#allocation14 + $0x674] sm:$0xf0]  ;;  %v8995_v57 = vor.u32 %v10171_v43, %v8992_v47  ;;  %v10031_v47 = vld [vmem:[#allocation14 + $0x57c] sm:$0xf] }
 0x269   :  { %v2653_v5 = vadd.f32 %v2652_v61, %v2640_v60  ;;  %v10164_v60 = vld [vmem:[#allocation14 + $0x9a4] sm:$0xf]  ;;  %v8183_v21 = vor.u32 %v9968_v3, %v8180_v54  ;;  %v8684_v61 = vld [vmem:[#allocation14 + $0x78c] sm:$0xf0]  ;;  %v7906_v43 = vld [vmem:[#allocation14 + $0x158] sm:$0xf] }
 0x26a   :  { %5743 = vmatpush.bf16.msra.mxu3 %v8015_v14  ;;  %5717 = vmatpush.bf16.msra.mxu1 %v9355_v59  ;;  %v2667_v29 = vpop.f32.mrf.mxu1  ;;  %v8267_v14 = vor.u32 %v9989_v1, %v8264_v2  ;;  %v8715_v59 = vor.u32 %v10101_v48, %v8712_v24  ;;  %v10052_v1 = vld [vmem:[#allocation14 + $0x624] sm:$0xf]  ;;  %v8516_v2 = vld [vmem:[#allocation14 + $0x63c] sm:$0xf0]  ;;  %v8432_v48 = vld [vmem:[#allocation14 + $0x594] sm:$0xf0] }
 0x26b   :  { %v8936_v29 = vld [vmem:[#allocation14 + $0x984] sm:$0xf0]  ;;  %v8435_v3 = vor.u32 %v10031_v47, %v8432_v48  ;;  %v7766_v48 = vld [vmem:[#allocation14 + $0x40] sm:$0xf] }
 0x26c   :  { %5729 = vmatpush.bf16.msra.mxu2 %v7819_v10  ;;  %5751 = vmatpush.bf16.msrb.mxu0 %v8379_v26  ;;  %v2666_v10 = vadd.f32 %v2665_v44, %v2653_v5  ;;  %v9982_v26 = vld [vmem:[#allocation14 + $0x3f4] sm:$0xf]  ;;  %v8939_v13 = vor.u32 %v10157_v9, %v8936_v29  ;;  %v8130_v9 = vld [vmem:[#allocation14 + $0x318] sm:$0xf]  ;;  %v9160_v47 = vld [vmem:[#allocation14 + $0xb44] sm:$0xf0] }
 0x26d   :  { %v8239_v31 = vor.u32 %v9982_v26, %v8236_v16  ;;  %v10066_v44 = vld [vmem:[#allocation14 + $0x694] sm:$0xf] }
 0x26e   :  { %5744 = vmatpush.bf16.msra.mxu3 %v7987_v32  ;;  %5718 = vmatpush.bf16.msra.mxu1 %v9327_v63  ;;  %v2778_v37 = vmax.f32 %v2666_v10, 0.0  ;;  %v10073_v32 = vld [vmem:[#allocation14 + $0x6cc] sm:$0xf]  ;;  %v8519_v63 = vor.u32 %v10052_v1, %v8516_v2  ;;  %v10087_v10 = vld [vmem:[#allocation14 + $0x73c] sm:$0xf] }
 0x26f   :  { %v8603_v40 = vor.u32 %v10073_v32, %v8600_v33  ;;  %v10150_v16 = vld [vmem:[#allocation14 + $0x934] sm:$0xf]  ;;  %v8460_v32 = vld [vmem:[#allocation14 + $0x5cc] sm:$0xf0] }
 0x270   :  { %5730 = vmatpush.bf16.msra.mxu2 %v7791_v17  ;;  %5752 = vmatpush.bf16.msrb.mxu0 %v8351_v35  ;;  %v9299_v17 = vor.u32 %v10251_v18, %v9298_v8  ;;  %v10809_v27 = vpack.c.bf16 %v2778_v37, %v2778_v37  ;;  %v2654_v46 = vpop.f32.mrf.mxu0  ;;  %v8740_v35 = vld [vmem:[#allocation14 + $0x7fc] sm:$0xf0]  ;;  %v8908_v37 = vld [vmem:[#allocation14 + $0x94c] sm:$0xf0]  ;;  %v9958_v29 = vld [vmem:[#allocation14 + $0x330] sm:$0xf0] }
 0x271   :  { %v8743_v38 = vor.u32 %v10108_v4, %v8740_v35  ;;  %v8911_v4 = vor.u32 %v10150_v16, %v8908_v37  ;;  %v10143_v35 = vld [vmem:[#allocation14 + $0x8fc] sm:$0xf]  ;;  %v8102_v37 = vld [vmem:[#allocation14 + $0x2e0] sm:$0xf] }
 0x272   :  { %5745 = vmatpush.bf16.msra.mxu3 %v7959_v49  ;;  %5719 = vmatpush.bf16.msra.mxu1 %v9299_v17  ;;  %v8211_v49 = vor.u32 %v9975_v36, %v8208_v39  ;;  %v7934_v17 = vld [vmem:[#allocation14 + $0x190] sm:$0xf]  ;;  %v8880_v36 = vld [vmem:[#allocation14 + $0x914] sm:$0xf0]  ;;  %v10227_v16 = vld [vmem:[#allocation14 + $0xb9c] sm:$0xf] }
 0x273   :  { %5694 = vmatmul.bf16.vlgmr.msrb.gmra.mxu3 %v10809_v27 }
 0x274   :  { %5731 = vmatpush.bf16.msra.mxu2 %v7763_v45  ;;  %5753 = vmatpush.bf16.msrb.mxu0 %v8323_v50  ;;  %v8572_v45 = vld [vmem:[#allocation14 + $0x6ac] sm:$0xf0] }
 0x275   :  { %v8575_v50 = vor.u32 %v10066_v44, %v8572_v45  ;;  %v9902_v44 = vld [vmem:[#allocation14 + $0x170] sm:$0xf0] }
 0x276   :  { %5790 = vmatpush.bf16.msrb.mxu3 %v9051_v19  ;;  %5764 = vmatpush.bf16.msrb.mxu1 %v8603_v40  ;;  %v10080_v19 = vld [vmem:[#allocation14 + $0x704] sm:$0xf] }
 0x277   :  { %v8631_v46 = vor.u32 %v10080_v19, %v8628_v20  ;;  %v7822_v19 = vld [vmem:[#allocation14 + $0xb0] sm:$0xf]  ;;  %v9881_v20 = vld [vmem:[#allocation14 + $0xc8] sm:$0xf0] }
 0x278   :  { %5732 = vmatpush.bf16.msra.mxu2 %v7735_v58  ;;  %5754 = vmatpush.bf16.msrb.mxu0 %v8295_v25  ;;  %v2691_v28 = vpop.f32.mrf.mxu3  ;;  %v8547_v58 = vor.u32 %v10059_v53, %v8544_v55  ;;  %v10094_v25 = vld [vmem:[#allocation14 + $0x774] sm:$0xf]  ;;  %v7907_v53 = vor.u32 %v9902_v44, %v7906_v43  ;;  %v10241_v55 = vld [vmem:[#allocation14 + $0xc0c] sm:$0xf]  ;;  %v8046_v44 = vld [vmem:[#allocation14 + $0x270] sm:$0xf] }
 0x279   :  { %v8687_v6 = vor.u32 %v10094_v25, %v8684_v61  ;;  %v10024_v25 = vld [vmem:[#allocation14 + $0x544] sm:$0xf]  ;;  %v8404_v61 = vld [vmem:[#allocation14 + $0x55c] sm:$0xf0]  ;;  %v10213_v43 = vld [vmem:[#allocation14 + $0xb2c] sm:$0xf] }
 0x27a   :  { %5791 = vmatpush.bf16.msrb.mxu3 %v9023_v41  ;;  %5765 = vmatpush.bf16.msrb.mxu1 %v8575_v50  ;;  %v8852_v50 = vld [vmem:[#allocation14 + $0x8dc] sm:$0xf0] }
 0x27b   :  { %5733 = vmatmul.bf16.vlgmr.msra.gmra.mxu2 %v10782_v52 }
 0x27c   :  { %5777 = vmatpush.bf16.msrb.mxu2 %v8827_v56  ;;  %5755 = vmatpush.bf16.msrb.mxu0 %v8267_v14  ;;  %v8964_v56 = vld [vmem:[#allocation14 + $0x9bc] sm:$0xf0]  ;;  %v10045_v14 = vld [vmem:[#allocation14 + $0x5ec] sm:$0xf] }
 0x27d   :  { %v8967_v0 = vor.u32 %v10164_v60, %v8964_v56  ;;  %v8491_v8 = vor.u32 %v10045_v14, %v8488_v15  ;;  %v7878_v60 = vld [vmem:[#allocation14 + $0x120] sm:$0xf]  ;;  %v9895_v56 = vld [vmem:[#allocation14 + $0x138] sm:$0xf0]  ;;  %v8131_v14 = vor.u32 %v9958_v29, %v8130_v9 }
 0x27e   :  { %5792 = vmatpush.bf16.msrb.mxu3 %v8995_v57  ;;  %5766 = vmatpush.bf16.msrb.mxu1 %v8547_v58  ;;  %v2678_v5 = vpop.f32.mrf.mxu2  ;;  %v8158_v57 = vld [vmem:[#allocation14 + $0x350] sm:$0xf]  ;;  %v9965_v58 = vld [vmem:[#allocation14 + $0x368] sm:$0xf0]  ;;  %v10199_v29 = vld [vmem:[#allocation14 + $0xabc] sm:$0xf] }
 0x27f   :  { %v2679_v23 = vadd.f32 %v2678_v5, %v1067_v62  ;;  %v8159_v1 = vor.u32 %v9965_v58, %v8158_v57  ;;  %v7879_v5 = vor.u32 %v9895_v56, %v7878_v60  ;;  %v9888_v62 = vld [vmem:[#allocation14 + $0x100] sm:$0xf0]  ;;  %v8018_v57 = vld [vmem:[#allocation14 + $0x238] sm:$0xf]  ;;  %v9930_v58 = vld [vmem:[#allocation14 + $0x250] sm:$0xf0] }
 0x280   :  { %5778 = vmatpush.bf16.msrb.mxu2 %v8799_v11  ;;  %5756 = vmatpush.bf16.msrb.mxu0 %v8239_v31  ;;  %v8656_v11 = vld [vmem:[#allocation14 + $0x754] sm:$0xf0]  ;;  %v2693_v12 = vpop.f32.mrf.mxu3  ;;  %v10038_v31 = vld [vmem:[#allocation14 + $0x5b4] sm:$0xf]  ;;  %v9860_v60 = vld [vmem:[#allocation14 + $0x20] sm:$0xf0] }
 0x281   :  { %v8659_v26 = vor.u32 %v10087_v10, %v8656_v11  ;;  %v8463_v39 = vor.u32 %v10038_v31, %v8460_v32  ;;  %v2692_v41 = vadd.f32 %v2691_v28, %v2679_v23  ;;  %v9244_v10 = vld [vmem:[#allocation14 + $0xbec] sm:$0xf0]  ;;  %v7850_v11 = vld [vmem:[#allocation14 + $0xe8] sm:$0xf]  ;;  %v8407_v12 = vor.u32 %v10024_v25, %v8404_v61  ;;  %v10220_v31 = vld [vmem:[#allocation14 + $0xb64] sm:$0xf] }
 0x282   :  { %5793 = vmatpush.bf16.msrb.mxu3 %v8967_v0  ;;  %5767 = vmatpush.bf16.msrb.mxu1 %v8519_v63  ;;  %v2717_v18 = vpop.f32.mrf.mxu1  ;;  %v8074_v32 = vld [vmem:[#allocation14 + $0x2a8] sm:$0xf]  ;;  %v10133_v25 = vld [vmem:[#allocation14 + $0x8a8] sm:$0xf0] }
 0x283   :  { %5746 = vmatmul.bf16.vlgmr.msra.gmra.mxu3 %v10777_v34 }
 0x284   :  { %5779 = vmatpush.bf16.msrb.mxu2 %v8771_v30  ;;  %5757 = vmatpush.bf16.msrb.mxu0 %v8211_v49  ;;  %v9909_v30 = vld [vmem:[#allocation14 + $0x1a8] sm:$0xf0]  ;;  %v10136_v49 = vld [vmem:[#allocation14 + $0x8c4] sm:$0xf] }
 0x285   :  { %v7935_v40 = vor.u32 %v9909_v30, %v7934_v17 }
 0x286   :  { %5794 = vmatpush.bf16.msrb.mxu3 %v8939_v13  ;;  %5768 = vmatpush.bf16.msrb.mxu1 %v8491_v8  ;;  %v2680_v33 = vpop.f32.mrf.mxu2  ;;  %v9951_v8 = vld [vmem:[#allocation14 + $0x2f8] sm:$0xf0] }
 0x287   :  { %v8103_v17 = vor.u32 %v9951_v8, %v8102_v37  ;;  %v9944_v33 = vld [vmem:[#allocation14 + $0x2c0] sm:$0xf0] }
 0x288   :  { %5780 = vmatpush.bf16.msrb.mxu2 %v8743_v38  ;;  %5758 = vmatpush.bf16.msrb.mxu0 %v8183_v21  ;;  %v2704_v45 = vpop.f32.mrf.mxu0  ;;  %v8883_v38 = vor.u32 %v10143_v35, %v8880_v36  ;;  %v8855_v21 = vor.u32 %v10136_v49, %v8852_v50  ;;  %v7794_v35 = vld [vmem:[#allocation14 + $0x78] sm:$0xf]  ;;  %v9874_v36 = vld [vmem:[#allocation14 + $0x90] sm:$0xf0]  ;;  %v1068_v49 = vperm.slane %v10804_v22, 7  ;;  %v8019_v22 = vor.u32 %v9930_v58, %v8018_v57 }
 0x289   :  { %v2705_v24 = vadd.f32 %v2704_v45, %v2692_v41  ;;  %v7795_v41 = vor.u32 %v9874_v36, %v7794_v35  ;;  %v9937_v45 = vld [vmem:[#allocation14 + $0x288] sm:$0xf0]  ;;  %v9916_v37 = vld [vmem:[#allocation14 + $0x1e0] sm:$0xf0]  ;;  %v8774_v35 = vld [vmem:[#allocation14 + $0x820] sm:$0xf] }
 0x28a   :  { %5795 = vmatpush.bf16.msrb.mxu3 %v8911_v4  ;;  %5769 = vmatpush.bf16.msrb.mxu1 %v8463_v39  ;;  %v2719_v54 = vpop.f32.mrf.mxu1  ;;  %v7823_v4 = vor.u32 %v9881_v20, %v7822_v19  ;;  %v8075_v39 = vor.u32 %v9944_v33, %v8074_v32  ;;  %v9076_v19 = vld [vmem:[#allocation14 + $0xa9c] sm:$0xf0]  ;;  %v9054_v20 = vld [vmem:[#allocation14 + $0xa50] sm:$0xf]  ;;  %v10021_v32 = vld [vmem:[#allocation14 + $0x528] sm:$0xf0] }
 0x28b   :  { %v2718_v28 = vadd.f32 %v2717_v18, %v2705_v24  ;;  %v9216_v18 = vld [vmem:[#allocation14 + $0xbb4] sm:$0xf0]  ;;  %v9867_v24 = vld [vmem:[#allocation14 + $0x58] sm:$0xf0]  ;;  %v9163_v54 = vor.u32 %v10213_v43, %v9160_v47 }
 0x28c   :  { %5781 = vmatpush.bf16.msrb.mxu2 %v8715_v59  ;;  %v9272_v59 = vld [vmem:[#allocation14 + $0xc24] sm:$0xf0]  ;;  %v9219_v30 = vor.u32 %v10227_v16, %v9216_v18  ;;  %v10119_v36 = vld [vmem:[#allocation14 + $0x838] sm:$0xf0] }
 0x28d   :  { %v2779_v0 = vmax.f32 %v2718_v28, 0.0  ;;  %v9275_v2 = vor.u32 %v10241_v55, %v9272_v59  ;;  %v10206_v55 = vld [vmem:[#allocation14 + $0xaf4] sm:$0xf]  ;;  %v9132_v28 = vld [vmem:[#allocation14 + $0xb0c] sm:$0xf0]  ;;  %v8775_v47 = vor.u32 %v10119_v36, %v8774_v35 }
 0x28e   :  { %5796 = vmatpush.bf16.msrb.mxu3 %v8883_v38  ;;  %5770 = vmatpush.bf16.msrb.mxu1 %v8435_v3  ;;  %v8047_v3 = vor.u32 %v9937_v45, %v8046_v44  ;;  %v7738_v59 = vld [vmem:[#allocation14 + $0x8] sm:$0xf]  ;;  %v9026_v44 = vld [vmem:[#allocation14 + $0xa18] sm:$0xf]  ;;  %v10182_v45 = vld [vmem:[#allocation14 + $0xa30] sm:$0xf0] }
 0x28f   :  { %v10815_v63 = vpack.c.bf16 %v2779_v0, %v2779_v0  ;;  %v9135_v0 = vor.u32 %v10206_v55, %v9132_v28  ;;  %v7962_v16 = vld [vmem:[#allocation14 + $0x1c8] sm:$0xf]  ;;  %v9027_v57 = vor.u32 %v10182_v45, %v9026_v44  ;;  %v10283_v28 = vld [vmem:[#allocation14 + $0xd5c] sm:$0xf]  ;;  %v8662_v35 = vld [vmem:[#allocation14 + $0x740] sm:$0xf] }
 0x290   :  { %5782 = vmatpush.bf16.msrb.mxu2 %v8687_v6  ;;  %v10234_v6 = vld [vmem:[#allocation14 + $0xbd4] sm:$0xf]  ;;  %v2706_v13 = vpop.f32.mrf.mxu0  ;;  %v7963_v33 = vor.u32 %v9916_v37, %v7962_v16  ;;  %v8690_v16 = vld [vmem:[#allocation14 + $0x778] sm:$0xf]  ;;  %v10091_v36 = vld [vmem:[#allocation14 + $0x758] sm:$0xf0] }
 0x291   :  { %5707 = vmatmul.bf16.vlgmr.msra.gmra.mxu0 %v10815_v63  ;;  %v9247_v15 = vor.u32 %v10234_v6, %v9244_v10  ;;  %v9104_v10 = vld [vmem:[#allocation14 + $0xad4] sm:$0xf0]  ;;  %v10098_v37 = vld [vmem:[#allocation14 + $0x790] sm:$0xf0] }
 0x292   :  { %5797 = vmatpush.bf16.msrb.mxu3 %v8855_v21  ;;  %5803 = vmatpush.bf16.msra.mxu0 %v9275_v2  ;;  %v8830_v21 = vld [vmem:[#allocation14 + $0x890] sm:$0xf]  ;;  %v7990_v2 = vld [vmem:[#allocation14 + $0x200] sm:$0xf]  ;;  %v8914_v44 = vld [vmem:[#allocation14 + $0x938] sm:$0xf] }
 0x293   :  { %5771 = vmatpush.bf16.msrb.mxu1 %v8407_v12  ;;  %v8831_v9 = vor.u32 %v10133_v25, %v8830_v21  ;;  %v8326_v25 = vld [vmem:[#allocation14 + $0x4a0] sm:$0xf]  ;;  %v10154_v45 = vld [vmem:[#allocation14 + $0x950] sm:$0xf0] }
 0x294   :  { %5783 = vmatpush.bf16.msrb.mxu2 %v8659_v26  ;;  %v7851_v26 = vor.u32 %v9888_v62, %v7850_v11  ;;  %v8802_v11 = vld [vmem:[#allocation14 + $0x858] sm:$0xf]  ;;  %v10126_v62 = vld [vmem:[#allocation14 + $0x870] sm:$0xf0] }
 0x295   :  { %5798 = vmatmul.bf16.vlgmr.msrb.gmra.mxu3 %v10809_v27  ;;  %v8803_v18 = vor.u32 %v10126_v62, %v8802_v11  ;;  %v10168_v11 = vld [vmem:[#allocation14 + $0x9c0] sm:$0xf0] }
 0x296   :  { %5842 = vmatpush.bf16.msra.mxu3 %v8159_v1  ;;  %5804 = vmatpush.bf16.msra.mxu0 %v9247_v15  ;;  %v7739_v1 = vor.u32 %v9860_v60, %v7738_v59  ;;  %v9107_v15 = vor.u32 %v10199_v29, %v9104_v10  ;;  %v8998_v59 = vld [vmem:[#allocation14 + $0x9e0] sm:$0xf]  ;;  %v10175_v60 = vld [vmem:[#allocation14 + $0x9f8] sm:$0xf0]  ;;  %v8970_v10 = vld [vmem:[#allocation14 + $0x9a8] sm:$0xf] }
 0x298   :  { %5784 = vmatpush.bf16.msrb.mxu2 %v8631_v46  ;;  %v2743_v23 = vpop.f32.mrf.mxu3  ;;  %v9188_v46 = vld [vmem:[#allocation14 + $0xb7c] sm:$0xf0] }
 0x29a   :  { %5843 = vmatpush.bf16.msra.mxu3 %v8131_v14  ;;  %5805 = vmatpush.bf16.msra.mxu0 %v9219_v30 }
 0x29b   :  { %5785 = vmatmul.bf16.vlgmr.msrb.gmra.mxu2 %v10799_v42 }
 0x29c   :  { %5829 = vmatpush.bf16.msra.mxu2 %v7935_v40  ;;  %v9191_v40 = vor.u32 %v10220_v31, %v9188_v46  ;;  %v8382_v31 = vld [vmem:[#allocation14 + $0x510] sm:$0xf]  ;;  %v9496_v46 = vld [vmem:[#allocation14 + $0xde4] sm:$0xf0] }
 0x29d   :  { %v8383_v43 = vor.u32 %v10021_v32, %v8382_v31  ;;  %v10269_v31 = vld [vmem:[#allocation14 + $0xcec] sm:$0xf]  ;;  %v8270_v32 = vld [vmem:[#allocation14 + $0x430] sm:$0xf] }
 0x29e   :  { %5844 = vmatpush.bf16.msra.mxu3 %v8103_v17  ;;  %v2730_v38 = vpop.f32.mrf.mxu2  ;;  %5806 = vmatpush.bf16.msra.mxu0 %v9191_v40  ;;  %v10189_v17 = vld [vmem:[#allocation14 + $0xa68] sm:$0xf0] }
 0x29f   :  { %v2731_v61 = vadd.f32 %v2730_v38, %v1068_v49  ;;  %v9055_v40 = vor.u32 %v10189_v17, %v9054_v20  ;;  %v10014_v49 = vld [vmem:[#allocation14 + $0x4f0] sm:$0xf0]  ;;  %v10161_v20 = vld [vmem:[#allocation14 + $0x988] sm:$0xf0] }
 0x2a0   :  { %5830 = vmatpush.bf16.msra.mxu2 %v7907_v53  ;;  %v2745_v50 = vpop.f32.mrf.mxu3  ;;  %v7767_v53 = vor.u32 %v9867_v24, %v7766_v48  ;;  %v10290_v48 = vld [vmem:[#allocation14 + $0xd94] sm:$0xf]  ;;  %v8354_v24 = vld [vmem:[#allocation14 + $0x4d8] sm:$0xf] }
 0x2a1   :  { %5759 = vmatmul.bf16.vlgmr.msrb.gmra.mxu0 %v10795_v51  ;;  %v2744_v12 = vadd.f32 %v2743_v23, %v2731_v61  ;;  %v8355_v58 = vor.u32 %v10014_v49, %v8354_v24  ;;  %v10007_v61 = vld [vmem:[#allocation14 + $0x4b8] sm:$0xf0]  ;;  %v8242_v24 = vld [vmem:[#allocation14 + $0x3f8] sm:$0xf]  ;;  %v9986_v49 = vld [vmem:[#allocation14 + $0x410] sm:$0xf0] }
 0x2a2   :  { %5845 = vmatpush.bf16.msra.mxu3 %v8075_v39  ;;  %v2769_v56 = vpop.f32.mrf.mxu1  ;;  %5807 = vmatpush.bf16.msra.mxu0 %v9163_v54  ;;  %v8746_v54 = vld [vmem:[#allocation14 + $0x7e8] sm:$0xf] }
 0x2a4   :  { %5831 = vmatpush.bf16.msra.mxu2 %v7879_v5  ;;  %v9923_v5 = vld [vmem:[#allocation14 + $0x218] sm:$0xf0] }
 0x2a5   :  { %v7991_v13 = vor.u32 %v9923_v5, %v7990_v2  ;;  %v10105_v2 = vld [vmem:[#allocation14 + $0x7c8] sm:$0xf0]  ;;  %v8999_v5 = vor.u32 %v10175_v60, %v8998_v59  ;;  %v8243_v59 = vor.u32 %v9986_v49, %v8242_v24  ;;  %v8886_v60 = vld [vmem:[#allocation14 + $0x900] sm:$0xf]  ;;  %v10070_v24 = vld [vmem:[#allocation14 + $0x6b0] sm:$0xf0] }
 0x2a6   :  { %5846 = vmatpush.bf16.msra.mxu3 %v8047_v3  ;;  %v2732_v6 = vpop.f32.mrf.mxu2  ;;  %5808 = vmatpush.bf16.msra.mxu0 %v9135_v0  ;;  %v9468_v3 = vld [vmem:[#allocation14 + $0xdac] sm:$0xf0]  ;;  %v9440_v0 = vld [vmem:[#allocation14 + $0xd74] sm:$0xf0]  ;;  %v9885_v49 = vld [vmem:[#allocation14 + $0xec] sm:$0xf] }
 0x2a7   :  { %v9443_v62 = vor.u32 %v10283_v28, %v9440_v0  ;;  %v7936_v28 = vld [vmem:[#allocation14 + $0x1ac] sm:$0xf0]  ;;  %v9979_v0 = vld [vmem:[#allocation14 + $0x3d8] sm:$0xf0] }
 0x2a8   :  { %5832 = vmatpush.bf16.msra.mxu2 %v7851_v26  ;;  %v2756_v14 = vpop.f32.mrf.mxu0  ;;  %v10192_v26 = vld [vmem:[#allocation14 + $0xa84] sm:$0xf] }
 0x2a9   :  { %v2757_v8 = vadd.f32 %v2756_v14, %v2744_v12  ;;  %v9079_v39 = vor.u32 %v10192_v26, %v9076_v19  ;;  %v8298_v14 = vld [vmem:[#allocation14 + $0x468] sm:$0xf]  ;;  %v9412_v26 = vld [vmem:[#allocation14 + $0xd3c] sm:$0xf0]  ;;  %v8942_v19 = vld [vmem:[#allocation14 + $0x970] sm:$0xf] }
 0x2aa   :  { %5847 = vmatpush.bf16.msra.mxu3 %v8019_v22  ;;  %v2771_v30 = vpop.f32.mrf.mxu1  ;;  %5809 = vmatpush.bf16.msra.mxu0 %v9107_v15  ;;  %v3301_v22 = vld [vmem:[#allocation16] sm:$0xff] }
 0x2ab   :  { %v2770_v23 = vadd.f32 %v2769_v56, %v2757_v8  ;;  %v9471_v56 = vor.u32 %v10290_v48, %v9468_v3  ;;  %v3303_v29 = vperm.slane %v3301_v22, 0  ;;  %v10000_v15 = vld [vmem:[#allocation14 + $0x480] sm:$0xf0]  ;;  %v8971_v8 = vor.u32 %v10168_v11, %v8970_v10  ;;  %v10262_v48 = vld [vmem:[#allocation14 + $0xcb4] sm:$0xf] }
 0x2ac   :  { %5833 = vmatpush.bf16.msra.mxu2 %v7823_v4  ;;  %v10297_v4 = vld [vmem:[#allocation14 + $0xdcc] sm:$0xf]  ;;  %v9356_v3 = vld [vmem:[#allocation14 + $0xccc] sm:$0xf0]  ;;  %v8214_v22 = vld [vmem:[#allocation14 + $0x3c0] sm:$0xf] }
 0x2ad   :  { %v9499_v38 = vor.u32 %v10297_v4, %v9496_v46  ;;  %v8691_v4 = vor.u32 %v10098_v37, %v8690_v16  ;;  %v9384_v46 = vld [vmem:[#allocation14 + $0xd04] sm:$0xf0]  ;;  %v8215_v11 = vor.u32 %v9979_v0, %v8214_v22  ;;  %v9972_v37 = vld [vmem:[#allocation14 + $0x3a0] sm:$0xf0]  ;;  %v7824_v22 = vld [vmem:[#allocation14 + $0xcc] sm:$0xf0] }
 0x2ae   :  { %5848 = vmatpush.bf16.msra.mxu3 %v7991_v13  ;;  %5810 = vmatpush.bf16.msra.mxu0 %v9079_v39  ;;  %v10276_v13 = vld [vmem:[#allocation14 + $0xd24] sm:$0xf]  ;;  %v8943_v39 = vor.u32 %v10161_v20, %v8942_v19  ;;  %v8606_v20 = vld [vmem:[#allocation14 + $0x6d0] sm:$0xf] }
 0x2af   :  { %v9415_v30 = vor.u32 %v10276_v13, %v9412_v26  ;;  %v8186_v13 = vld [vmem:[#allocation14 + $0x388] sm:$0xf] }
 0x2b0   :  { %5834 = vmatpush.bf16.msra.mxu2 %v7795_v41  ;;  %v2780_v41 = vmax.f32 %v2770_v23, 0.0  ;;  %v2758_v55 = vpop.f32.mrf.mxu0  ;;  %v9993_v23 = vld [vmem:[#allocation14 + $0x448] sm:$0xf0] }
 0x2b1   :  { %5811 = vmatmul.bf16.vlgmr.msra.gmra.mxu0 %v10815_v63 }
 0x2b2   :  { %v10822_v50 = vpack.c.bf16 %v2780_v41, %v2780_v41  ;;  %5849 = vmatpush.bf16.msra.mxu3 %v7963_v33  ;;  %5855 = vmatpush.bf16.msrb.mxu0 %v8383_v43  ;;  %v8271_v41 = vor.u32 %v9993_v23, %v8270_v32  ;;  %v10077_v32 = vld [vmem:[#allocation14 + $0x6e8] sm:$0xf0]  ;;  %v9892_v23 = vld [vmem:[#allocation14 + $0x124] sm:$0xf] }
 0x2b4   :  { %5835 = vmatpush.bf16.msra.mxu2 %v7767_v53  ;;  %v10112_v53 = vld [vmem:[#allocation14 + $0x800] sm:$0xf0]  ;;  %5720 = vmatmul.bf16.vlgmr.msra.gmra.mxu1 %v10822_v50 }
 0x2b5   :  { %5816 = vmatpush.bf16.msra.mxu1 %v9499_v38  ;;  %v8747_v21 = vor.u32 %v10112_v53, %v8746_v54  ;;  %5850 = vmatmul.bf16.vlgmr.msra.gmra.mxu3 %v10777_v34  ;;  %v9387_v38 = vor.u32 %v10269_v31, %v9384_v46  ;;  %v8634_v54 = vld [vmem:[#allocation14 + $0x708] sm:$0xf]  ;;  %v10084_v53 = vld [vmem:[#allocation14 + $0x720] sm:$0xf0] }
 0x2b6   :  { %5894 = vmatpush.bf16.msrb.mxu3 %v9055_v40  ;;  %5856 = vmatpush.bf16.msrb.mxu0 %v8355_v58  ;;  %v9906_v58 = vld [vmem:[#allocation14 + $0x194] sm:$0xf] }
 0x2b8   :  { %5836 = vmatpush.bf16.msra.mxu2 %v7739_v1  ;;  %v8718_v1 = vld [vmem:[#allocation14 + $0x7b0] sm:$0xf]  ;;  %v5643_v6 = vpop.f32.mrf.mxu3 }
 0x2b9   :  { %5817 = vmatpush.bf16.msra.mxu1 %v9471_v56  ;;  %v8719_v12 = vor.u32 %v10105_v2, %v8718_v1  ;;  %v10147_v56 = vld [vmem:[#allocation14 + $0x918] sm:$0xf0]  ;;  %v7939_v1 = vor.u32 %v9906_v58, %v7936_v28  ;;  %v8104_v58 = vld [vmem:[#allocation14 + $0x2fc] sm:$0xf0] }
 0x2ba   :  { %5895 = vmatpush.bf16.msrb.mxu3 %v9027_v57  ;;  %v8915_v57 = vor.u32 %v10154_v45, %v8914_v44  ;;  %v10255_v2 = vld [vmem:[#allocation14 + $0xc7c] sm:$0xf]  ;;  %v8607_v44 = vor.u32 %v10077_v32, %v8606_v20  ;;  %v10217_v20 = vld [vmem:[#allocation14 + $0xb48] sm:$0xf0] }
 0x2bb   :  { %5837 = vmatmul.bf16.vlgmr.msra.gmra.mxu2 %v10782_v52 }
 0x2bc   :  { %5881 = vmatpush.bf16.msrb.mxu2 %v8831_v9  ;;  %v8327_v9 = vor.u32 %v10007_v61, %v8326_v25  ;;  %v9359_v25 = vor.u32 %v10262_v48, %v9356_v3  ;;  %v8635_v61 = vor.u32 %v10084_v53, %v8634_v54  ;;  %v10238_v48 = vld [vmem:[#allocation14 + $0xbf0] sm:$0xf0]  ;;  %v7852_v3 = vld [vmem:[#allocation14 + $0x104] sm:$0xf0] }
 0x2bd   :  { %5818 = vmatpush.bf16.msra.mxu1 %v9443_v62  ;;  %v10248_v62 = vld [vmem:[#allocation14 + $0xc44] sm:$0xf] }
 0x2be   :  { %5896 = vmatpush.bf16.msrb.mxu3 %v8999_v5  ;;  %5857 = vmatpush.bf16.msrb.mxu0 %v8327_v9  ;;  %v5630_v17 = vpop.f32.mrf.mxu2  ;;  %v9328_v5 = vld [vmem:[#allocation14 + $0xc94] sm:$0xf0]  ;;  %v9899_v9 = vld [vmem:[#allocation14 + $0x15c] sm:$0xf] }
 0x2bf   :  { %v5631_v33 = vadd.f32 %v5630_v17, %v3303_v29  ;;  %v7908_v29 = vld [vmem:[#allocation14 + $0x174] sm:$0xf0]  ;;  %v9331_v16 = vor.u32 %v10255_v2, %v9328_v5  ;;  %v9278_v17 = vld [vmem:[#allocation14 + $0xc10] sm:$0xf]  ;;  %v9941_v2 = vld [vmem:[#allocation14 + $0x2ac] sm:$0xf] }
 0x2c0   :  { %5882 = vmatpush.bf16.msrb.mxu2 %v8803_v18  ;;  %v8299_v18 = vor.u32 %v10000_v15, %v8298_v14  ;;  %v5645_v40 = vpop.f32.mrf.mxu3  ;;  %v8858_v14 = vld [vmem:[#allocation14 + $0x8c8] sm:$0xf]  ;;  %v10140_v15 = vld [vmem:[#allocation14 + $0x8e0] sm:$0xf0]  ;;  %v7911_v19 = vor.u32 %v9899_v9, %v7908_v29 }
 0x2c1   :  { %v5644_v43 = vadd.f32 %v5643_v6, %v5631_v33  ;;  %5819 = vmatpush.bf16.msra.mxu1 %v9415_v30  ;;  %v8887_v6 = vor.u32 %v10147_v56, %v8886_v60  ;;  %v10245_v30 = vld [vmem:[#allocation14 + $0xc28] sm:$0xf0]  ;;  %v8859_v31 = vor.u32 %v10140_v15, %v8858_v14  ;;  %v7880_v33 = vld [vmem:[#allocation14 + $0x13c] sm:$0xf0]  ;;  %v8076_v5 = vld [vmem:[#allocation14 + $0x2c4] sm:$0xf0] }
 0x2c2   :  { %5897 = vmatpush.bf16.msrb.mxu3 %v8971_v8  ;;  %5858 = vmatpush.bf16.msrb.mxu0 %v8299_v18  ;;  %v5669_v55 = vpop.f32.mrf.mxu1  ;;  %v9962_v8 = vld [vmem:[#allocation14 + $0x354] sm:$0xf]  ;;  %v8160_v18 = vld [vmem:[#allocation14 + $0x36c] sm:$0xf0]  ;;  %v9279_v40 = vor.u32 %v10245_v30, %v9278_v17  ;;  %v7883_v45 = vor.u32 %v9892_v23, %v7880_v33  ;;  %v8550_v60 = vld [vmem:[#allocation14 + $0x660] sm:$0xf]  ;;  %v8079_v14 = vor.u32 %v9941_v2, %v8076_v5 }
 0x2c3   :  { %v9222_v56 = vld [vmem:[#allocation14 + $0xba0] sm:$0xf]  ;;  %v8522_v29 = vld [vmem:[#allocation14 + $0x628] sm:$0xf]  ;;  %v10049_v17 = vld [vmem:[#allocation14 + $0x608] sm:$0xf0] }
 0x2c4   :  { %5883 = vmatpush.bf16.msrb.mxu2 %v8775_v47  ;;  %v8663_v47 = vor.u32 %v10091_v36, %v8662_v35  ;;  %5772 = vmatmul.bf16.vlgmr.msrb.gmra.mxu1 %v10791_v7  ;;  %v8187_v35 = vor.u32 %v9972_v37, %v8186_v13  ;;  %v8163_v36 = vor.u32 %v9962_v8, %v8160_v18  ;;  %v7796_v13 = vld [vmem:[#allocation14 + $0x94] sm:$0xf0]  ;;  %v8494_v18 = vld [vmem:[#allocation14 + $0x5f0] sm:$0xf]  ;;  %v9864_v30 = vld [vmem:[#allocation14 + $0x44] sm:$0xf] }
 0x2c5   :  { %5820 = vmatpush.bf16.msra.mxu1 %v9387_v38  ;;  %v8578_v38 = vld [vmem:[#allocation14 + $0x698] sm:$0xf]  ;;  %v9927_v33 = vld [vmem:[#allocation14 + $0x23c] sm:$0xf]  ;;  %v9082_v2 = vld [vmem:[#allocation14 + $0xa88] sm:$0xf] }
 0x2c6   :  { %5898 = vmatpush.bf16.msrb.mxu3 %v8943_v39  ;;  %5859 = vmatpush.bf16.msrb.mxu0 %v8271_v41  ;;  %v9955_v41 = vld [vmem:[#allocation14 + $0x31c] sm:$0xf]  ;;  %v8579_v28 = vor.u32 %v10070_v24, %v8578_v38  ;;  %v9857_v38 = vld [vmem:[#allocation14 + $0xc] sm:$0xf]  ;;  %v10130_v24 = vld [vmem:[#allocation14 + $0x894] sm:$0xf] }
 0x2c7   :  { %v9913_v5 = vld [vmem:[#allocation14 + $0x1cc] sm:$0xf] }
 0x2c8   :  { %5884 = vmatpush.bf16.msrb.mxu2 %v8747_v21  ;;  %v5632_v21 = vpop.f32.mrf.mxu2  ;;  %v5656_v10 = vpop.f32.mrf.mxu0 }
 0x2c9   :  { %v5657_v26 = vadd.f32 %v5656_v10, %v5644_v43  ;;  %5821 = vmatpush.bf16.msra.mxu1 %v9359_v25  ;;  %v8132_v43 = vld [vmem:[#allocation14 + $0x334] sm:$0xf0]  ;;  %v10231_v21 = vld [vmem:[#allocation14 + $0xbb8] sm:$0xf0]  ;;  %v9194_v10 = vld [vmem:[#allocation14 + $0xb68] sm:$0xf] }
 0x2ca   :  { %5899 = vmatpush.bf16.msrb.mxu3 %v8915_v57  ;;  %5860 = vmatpush.bf16.msrb.mxu0 %v8243_v59  ;;  %v8135_v53 = vor.u32 %v9955_v41, %v8132_v43  ;;  %v9948_v57 = vld [vmem:[#allocation14 + $0x2e4] sm:$0xf]  ;;  %v7855_v59 = vor.u32 %v9885_v49, %v7852_v3  ;;  %v10063_v25 = vld [vmem:[#allocation14 + $0x678] sm:$0xf0]  ;;  %v8466_v41 = vld [vmem:[#allocation14 + $0x5b8] sm:$0xf] }
 0x2cb   :  { %v10828_v46 = vadd.f32 %v5669_v55, %v5657_v26  ;;  %v8107_v0 = vor.u32 %v9948_v57, %v8104_v58  ;;  %v9934_v26 = vld [vmem:[#allocation14 + $0x274] sm:$0xf]  ;;  %v9138_v43 = vld [vmem:[#allocation14 + $0xaf8] sm:$0xf]  ;;  %v8832_v49 = vld [vmem:[#allocation14 + $0x8ac] sm:$0xf0] }
 0x2cc   :  { %5885 = vmatpush.bf16.msrb.mxu2 %v8719_v12  ;;  %v9300_v12 = vld [vmem:[#allocation14 + $0xc5c] sm:$0xf0]  ;;  %v10203_v58 = vld [vmem:[#allocation14 + $0xad8] sm:$0xf0] }
 0x2cd   :  { %5822 = vmatpush.bf16.msra.mxu1 %v9331_v16  ;;  %v9303_v39 = vor.u32 %v10248_v62, %v9300_v12  ;;  %v10056_v62 = vld [vmem:[#allocation14 + $0x640] sm:$0xf0]  ;;  %v9871_v12 = vld [vmem:[#allocation14 + $0x7c] sm:$0xf]  ;;  %v8048_v16 = vld [vmem:[#allocation14 + $0x28c] sm:$0xf0] }
 0x2ce   :  { %5900 = vmatpush.bf16.msrb.mxu3 %v8887_v6  ;;  %5861 = vmatpush.bf16.msrb.mxu0 %v8215_v11  ;;  %v8551_v6 = vor.u32 %v10063_v25, %v8550_v60  ;;  %v10224_v11 = vld [vmem:[#allocation14 + $0xb80] sm:$0xf0]  ;;  %v8523_v37 = vor.u32 %v10056_v62, %v8522_v29  ;;  %v7799_v8 = vor.u32 %v9871_v12, %v7796_v13  ;;  %v9110_v57 = vld [vmem:[#allocation14 + $0xac0] sm:$0xf]  ;;  %v10035_v60 = vld [vmem:[#allocation14 + $0x598] sm:$0xf0] }
 0x2cf   :  { %v9195_v15 = vor.u32 %v10224_v11, %v9194_v10  ;;  %v8804_v25 = vld [vmem:[#allocation14 + $0x874] sm:$0xf0]  ;;  %v10196_v29 = vld [vmem:[#allocation14 + $0xaa0] sm:$0xf0]  ;;  %v10186_v10 = vld [vmem:[#allocation14 + $0xa54] sm:$0xf] }
 0x2d0   :  { %5886 = vmatpush.bf16.msrb.mxu2 %v8691_v4  ;;  %v5671_v4 = vpop.f32.mrf.mxu1  ;;  %v5658_v54 = vpop.f32.mrf.mxu0  ;;  %v9056_v11 = vld [vmem:[#allocation14 + $0xa6c] sm:$0xf0]  ;;  %v10018_v13 = vld [vmem:[#allocation14 + $0x514] sm:$0xf] }
 0x2d1   :  { %5823 = vmatpush.bf16.msra.mxu1 %v9303_v39  ;;  %v7768_v4 = vld [vmem:[#allocation14 + $0x5c] sm:$0xf0]  ;;  %v8495_v39 = vor.u32 %v10049_v17, %v8494_v18  ;;  %v9920_v54 = vld [vmem:[#allocation14 + $0x204] sm:$0xf]  ;;  %v9502_v12 = vld [vmem:[#allocation14 + $0xdd0] sm:$0xf]  ;;  %v9059_v18 = vor.u32 %v10186_v10, %v9056_v11 }
 0x2d2   :  { %5901 = vmatpush.bf16.msrb.mxu3 %v8859_v31  ;;  %5862 = vmatpush.bf16.msrb.mxu0 %v8187_v35  ;;  %v8051_v31 = vor.u32 %v9934_v26, %v8048_v16  ;;  %v8020_v35 = vld [vmem:[#allocation14 + $0x254] sm:$0xf0]  ;;  %v10301_v26 = vld [vmem:[#allocation14 + $0xde8] sm:$0xf0]  ;;  %v10116_v16 = vld [vmem:[#allocation14 + $0x824] sm:$0xf] }
 0x2d3   :  { %v10179_v17 = vld [vmem:[#allocation14 + $0xa1c] sm:$0xf]  ;;  %v9390_v10 = vld [vmem:[#allocation14 + $0xcf0] sm:$0xf]  ;;  %v9990_v11 = vld [vmem:[#allocation14 + $0x434] sm:$0xf] }
 0x2d4   :  { %5887 = vmatpush.bf16.msrb.mxu2 %v8663_v47  ;;  %v9250_v47 = vld [vmem:[#allocation14 + $0xbd8] sm:$0xf]  ;;  %5824 = vmatmul.bf16.vlgmr.msra.gmra.mxu1 %v10822_v50 }
 0x2d5   :  { %v9251_v55 = vor.u32 %v10238_v48, %v9250_v47  ;;  %5868 = vmatpush.bf16.msrb.mxu1 %v8607_v44  ;;  %5863 = vmatmul.bf16.vlgmr.msrb.gmra.mxu0 %v10795_v51  ;;  %v10210_v44 = vld [vmem:[#allocation14 + $0xb10] sm:$0xf0]  ;;  %v7740_v47 = vld [vmem:[#allocation14 + $0x24] sm:$0xf0]  ;;  %v8023_v48 = vor.u32 %v9927_v33, %v8020_v35  ;;  %v8356_v33 = vld [vmem:[#allocation14 + $0x4f4] sm:$0xf0] }
 0x2d6   :  { %5946 = vmatpush.bf16.msra.mxu3 %v8163_v36  ;;  %5907 = vmatpush.bf16.msra.mxu0 %v9279_v40  ;;  %v7771_v40 = vor.u32 %v9864_v30, %v7768_v4  ;;  %v9139_v3 = vor.u32 %v10210_v44, %v9138_v43  ;;  %v9028_v30 = vld [vmem:[#allocation14 + $0xa34] sm:$0xf0]  ;;  %v9503_v4 = vor.u32 %v10301_v26, %v9502_v12  ;;  %v10294_v35 = vld [vmem:[#allocation14 + $0xdb0] sm:$0xf0]  ;;  %v10172_v44 = vld [vmem:[#allocation14 + $0x9e4] sm:$0xf] }
 0x2d7   :  { %5902 = vmatmul.bf16.vlgmr.msrb.gmra.mxu3 %v10809_v27  ;;  %v10273_v12 = vld [vmem:[#allocation14 + $0xd08] sm:$0xf0] }
 0x2d8   :  { %5888 = vmatpush.bf16.msrb.mxu2 %v8635_v61  ;;  %v9878_v61 = vld [vmem:[#allocation14 + $0xb4] sm:$0xf] }
 0x2d9   :  { %5869 = vmatpush.bf16.msrb.mxu1 %v8579_v28  ;;  %v7827_v9 = vor.u32 %v9878_v61, %v7824_v22  ;;  %v8835_v28 = vor.u32 %v10130_v24, %v8832_v49  ;;  %v9111_v22 = vor.u32 %v10203_v58, %v9110_v57  ;;  %v10004_v24 = vld [vmem:[#allocation14 + $0x4a4] sm:$0xf]  ;;  %v8328_v49 = vld [vmem:[#allocation14 + $0x4bc] sm:$0xf0]  ;;  %v10165_v57 = vld [vmem:[#allocation14 + $0x9ac] sm:$0xf] }
 0x2da   :  { %5947 = vmatpush.bf16.msra.mxu3 %v8135_v53  ;;  %5908 = vmatpush.bf16.msra.mxu0 %v9251_v55  ;;  %v7992_v53 = vld [vmem:[#allocation14 + $0x21c] sm:$0xf0]  ;;  %v7743_v55 = vor.u32 %v9857_v38, %v7740_v47  ;;  %v8972_v58 = vld [vmem:[#allocation14 + $0x9c4] sm:$0xf0] }
 0x2db   :  { %5889 = vmatmul.bf16.vlgmr.msrb.gmra.mxu2 %v10799_v42 }
 0x2dc   :  { %5933 = vmatpush.bf16.msra.mxu2 %v7939_v1  ;;  %v9223_v1 = vor.u32 %v10231_v21, %v9222_v56  ;;  %v7995_v56 = vor.u32 %v9920_v54, %v7992_v53  ;;  %v10123_v21 = vld [vmem:[#allocation14 + $0x85c] sm:$0xf]  ;;  %v10102_v54 = vld [vmem:[#allocation14 + $0x7b4] sm:$0xf]  ;;  %v8720_v53 = vld [vmem:[#allocation14 + $0x7cc] sm:$0xf0] }
 0x2dd   :  { %5870 = vmatpush.bf16.msrb.mxu1 %v8551_v6  ;;  %v7964_v6 = vld [vmem:[#allocation14 + $0x1e4] sm:$0xf0]  ;;  %v8807_v62 = vor.u32 %v10123_v21, %v8804_v25  ;;  %v10280_v25 = vld [vmem:[#allocation14 + $0xd40] sm:$0xf0] }
 0x2de   :  { %5948 = vmatpush.bf16.msra.mxu3 %v8107_v0  ;;  %5909 = vmatpush.bf16.msra.mxu0 %v9223_v1  ;;  %v5682_v32 = vpop.f32.mrf.mxu2  ;;  %v8410_v0 = vld [vmem:[#allocation14 + $0x548] sm:$0xf]  ;;  %v10028_v1 = vld [vmem:[#allocation14 + $0x560] sm:$0xf0] }
 0x2df   :  { %v10835_v36 = vadd.f32 %v5682_v32, %v10828_v46  ;;  %v9474_v32 = vld [vmem:[#allocation14 + $0xd98] sm:$0xf]  ;;  %v8300_v21 = vld [vmem:[#allocation14 + $0x484] sm:$0xf0] }
 0x2e0   :  { %5934 = vmatpush.bf16.msra.mxu2 %v7911_v19  ;;  %v9166_v19 = vld [vmem:[#allocation14 + $0xb30] sm:$0xf]  ;;  %v9475_v38 = vor.u32 %v10294_v35, %v9474_v32  ;;  %v8636_v32 = vld [vmem:[#allocation14 + $0x724] sm:$0xf0]  ;;  %v9910_v35 = vld [vmem:[#allocation14 + $0x1b0] sm:$0xf0] }
 0x2e1   :  { %v9167_v23 = vor.u32 %v10217_v20, %v9166_v19  ;;  %5871 = vmatpush.bf16.msrb.mxu1 %v8523_v37  ;;  %v8776_v37 = vld [vmem:[#allocation14 + $0x83c] sm:$0xf0]  ;;  %v8411_v19 = vor.u32 %v10028_v1, %v8410_v0  ;;  %v8975_v0 = vor.u32 %v10165_v57, %v8972_v58  ;;  %v10252_v57 = vld [vmem:[#allocation14 + $0xc60] sm:$0xf0]  ;;  %v9969_v58 = vld [vmem:[#allocation14 + $0x38c] sm:$0xf] }
 0x2e2   :  { %5949 = vmatpush.bf16.msra.mxu3 %v8079_v14  ;;  %5910 = vmatpush.bf16.msra.mxu0 %v9195_v15  ;;  %v8384_v14 = vld [vmem:[#allocation14 + $0x52c] sm:$0xf0]  ;;  %v7967_v15 = vor.u32 %v9913_v5, %v7964_v6 }
 0x2e3   :  { %v8387_v20 = vor.u32 %v10018_v13, %v8384_v14  ;;  %v8944_v5 = vld [vmem:[#allocation14 + $0x98c] sm:$0xf0]  ;;  %v10088_v13 = vld [vmem:[#allocation14 + $0x744] sm:$0xf]  ;;  %v8664_v14 = vld [vmem:[#allocation14 + $0x75c] sm:$0xf0] }
 0x2e4   :  { %5935 = vmatpush.bf16.msra.mxu2 %v7883_v45  ;;  %v10042_v45 = vld [vmem:[#allocation14 + $0x5d0] sm:$0xf0] }
 0x2e5   :  { %5872 = vmatpush.bf16.msrb.mxu1 %v8495_v39  ;;  %v8467_v46 = vor.u32 %v10042_v45, %v8466_v41  ;;  %v10109_v39 = vld [vmem:[#allocation14 + $0x7ec] sm:$0xf]  ;;  %v9031_v41 = vor.u32 %v10179_v17, %v9028_v30  ;;  %v9000_v45 = vld [vmem:[#allocation14 + $0x9fc] sm:$0xf0]  ;;  %v9983_v17 = vld [vmem:[#allocation14 + $0x3fc] sm:$0xf] }
 0x2e6   :  { %5950 = vmatpush.bf16.msra.mxu3 %v8051_v31  ;;  %5911 = vmatpush.bf16.msra.mxu0 %v9167_v23  ;;  %v5684_v61 = vpop.f32.mrf.mxu2  ;;  %v8779_v31 = vor.u32 %v10116_v16, %v8776_v37  ;;  %v10011_v23 = vld [vmem:[#allocation14 + $0x4dc] sm:$0xf]  ;;  %v8916_v37 = vld [vmem:[#allocation14 + $0x954] sm:$0xf0] }
 0x2e7   :  { %v8359_v43 = vor.u32 %v10011_v23, %v8356_v33  ;;  %v10095_v61 = vld [vmem:[#allocation14 + $0x77c] sm:$0xf]  ;;  %v8244_v30 = vld [vmem:[#allocation14 + $0x414] sm:$0xf0] }
 0x2e8   :  { %5936 = vmatpush.bf16.msra.mxu2 %v7855_v59  ;;  %v8438_v59 = vld [vmem:[#allocation14 + $0x580] sm:$0xf]  ;;  %v10151_v16 = vld [vmem:[#allocation14 + $0x93c] sm:$0xf]  ;;  %v7942_v33 = vld [vmem:[#allocation14 + $0x198] sm:$0xf] }
 0x2e9   :  { %5873 = vmatpush.bf16.msrb.mxu1 %v8467_v46  ;;  %v9003_v46 = vor.u32 %v10172_v44, %v9000_v45  ;;  %v8919_v23 = vor.u32 %v10151_v16, %v8916_v37  ;;  %v10067_v37 = vld [vmem:[#allocation14 + $0x69c] sm:$0xf] }
 0x2ea   :  { %5951 = vmatpush.bf16.msra.mxu3 %v8023_v48  ;;  %5912 = vmatpush.bf16.msra.mxu0 %v9139_v3  ;;  %v9446_v48 = vld [vmem:[#allocation14 + $0xd60] sm:$0xf]  ;;  %v10287_v3 = vld [vmem:[#allocation14 + $0xd78] sm:$0xf0] }
 0x2ec   :  { %5937 = vmatpush.bf16.msra.mxu2 %v7827_v9  ;;  %v8439_v9 = vor.u32 %v10035_v60, %v8438_v59  ;;  %v8723_v59 = vor.u32 %v10102_v54, %v8720_v53  ;;  %v9418_v60 = vld [vmem:[#allocation14 + $0xd28] sm:$0xf]  ;;  %v7914_v54 = vld [vmem:[#allocation14 + $0x160] sm:$0xf]  ;;  %v9903_v53 = vld [vmem:[#allocation14 + $0x178] sm:$0xf0] }
 0x2ee   :  { %5952 = vmatpush.bf16.msra.mxu3 %v7995_v56  ;;  %5913 = vmatpush.bf16.msra.mxu0 %v9111_v22  ;;  %v9997_v56 = vld [vmem:[#allocation14 + $0x46c] sm:$0xf]  ;;  %v8692_v22 = vld [vmem:[#allocation14 + $0x794] sm:$0xf0] }
 0x2ef   :  { %5874 = vmatpush.bf16.msrb.mxu1 %v8439_v9  ;;  %v8303_v1 = vor.u32 %v9997_v56, %v8300_v21  ;;  %v9419_v9 = vor.u32 %v10280_v25, %v9418_v60  ;;  %v8188_v21 = vld [vmem:[#allocation14 + $0x3a4] sm:$0xf0]  ;;  %v8166_v25 = vld [vmem:[#allocation14 + $0x358] sm:$0xf] }
 0x2f0   :  { %5938 = vmatpush.bf16.msra.mxu2 %v7799_v8  ;;  %v9083_v8 = vor.u32 %v10196_v29, %v9082_v2  ;;  %v10158_v2 = vld [vmem:[#allocation14 + $0x974] sm:$0xf]  ;;  %v8695_v29 = vor.u32 %v10095_v61, %v8692_v22  ;;  %v7915_v22 = vor.u32 %v9903_v53, %v7914_v54  ;;  %v10053_v53 = vld [vmem:[#allocation14 + $0x62c] sm:$0xf] }
 0x2f1   :  { %v9966_v61 = vld [vmem:[#allocation14 + $0x370] sm:$0xf0] }
 0x2f2   :  { %5953 = vmatpush.bf16.msra.mxu3 %v7967_v15  ;;  %5914 = vmatpush.bf16.msra.mxu0 %v9083_v8  ;;  %v8947_v15 = vor.u32 %v10158_v2, %v8944_v5  ;;  %v9280_v2 = vld [vmem:[#allocation14 + $0xc2c] sm:$0xf0] }
 0x2f3   :  { %5875 = vmatpush.bf16.msrb.mxu1 %v8411_v19  ;;  %v8667_v19 = vor.u32 %v10088_v13, %v8664_v14  ;;  %v8138_v14 = vld [vmem:[#allocation14 + $0x320] sm:$0xf] }
 0x2f4   :  { %5939 = vmatpush.bf16.msra.mxu2 %v7771_v40  ;;  %v8748_v40 = vld [vmem:[#allocation14 + $0x804] sm:$0xf0] }
 0x2f5   :  { %v8751_v47 = vor.u32 %v10109_v39, %v8748_v40  ;;  %5915 = vmatmul.bf16.vlgmr.msra.gmra.mxu0 %v10815_v63  ;;  %5954 = vmatmul.bf16.vlgmr.msra.gmra.mxu3 %v10777_v34  ;;  %v8247_v39 = vor.u32 %v9983_v17, %v8244_v30  ;;  %v10144_v40 = vld [vmem:[#allocation14 + $0x904] sm:$0xf]  ;;  %v7858_v17 = vld [vmem:[#allocation14 + $0xf0] sm:$0xf]  ;;  %v9889_v30 = vld [vmem:[#allocation14 + $0x108] sm:$0xf0] }
 0x2f6   :  { %5998 = vmatpush.bf16.msrb.mxu3 %v9059_v18  ;;  %5959 = vmatpush.bf16.msrb.mxu0 %v8387_v20  ;;  %v10843_v8 = vpop.f32.mrf.mxu3  ;;  %v9391_v18 = vor.u32 %v10273_v12, %v9390_v10  ;;  %v9362_v20 = vld [vmem:[#allocation14 + $0xcb8] sm:$0xf]  ;;  %v9896_v10 = vld [vmem:[#allocation14 + $0x140] sm:$0xf0] }
 0x2f7   :  { %5920 = vmatpush.bf16.msra.mxu1 %v9503_v4  ;;  %v10266_v4 = vld [vmem:[#allocation14 + $0xcd0] sm:$0xf0] }
 0x2f8   :  { %5940 = vmatpush.bf16.msra.mxu2 %v7743_v55  ;;  %5876 = vmatmul.bf16.vlgmr.msrb.gmra.mxu1 %v10791_v7  ;;  %v8331_v55 = vor.u32 %v10004_v24, %v8328_v49  ;;  %v9363_v44 = vor.u32 %v10266_v4, %v9362_v20  ;;  %v9334_v24 = vld [vmem:[#allocation14 + $0xc80] sm:$0xf]  ;;  %v10259_v49 = vld [vmem:[#allocation14 + $0xc98] sm:$0xf0]  ;;  %v8580_v20 = vld [vmem:[#allocation14 + $0x6b4] sm:$0xf0] }
 0x2f9   :  { %v9335_v56 = vor.u32 %v10259_v49, %v9334_v24  ;;  %v8082_v24 = vld [vmem:[#allocation14 + $0x2b0] sm:$0xf]  ;;  %v9945_v49 = vld [vmem:[#allocation14 + $0x2c8] sm:$0xf0] }
 0x2fa   :  { %5999 = vmatpush.bf16.msrb.mxu3 %v9031_v41  ;;  %5960 = vmatpush.bf16.msrb.mxu0 %v8359_v43  ;;  %v8888_v41 = vld [vmem:[#allocation14 + $0x91c] sm:$0xf0] }
 0x2fb   :  { %5941 = vmatmul.bf16.vlgmr.msra.gmra.mxu2 %v10782_v52  ;;  %5921 = vmatpush.bf16.msra.mxu1 %v9475_v38  ;;  %v9976_v38 = vld [vmem:[#allocation14 + $0x3c4] sm:$0xf] }
 0x2fc   :  { %5985 = vmatpush.bf16.msrb.mxu2 %v8835_v28  ;;  %v9447_v28 = vor.u32 %v10287_v3, %v9446_v48  ;;  %v7943_v48 = vor.u32 %v9910_v35, %v7942_v33  ;;  %v8891_v3 = vor.u32 %v10144_v40, %v8888_v41  ;;  %v9952_v33 = vld [vmem:[#allocation14 + $0x300] sm:$0xf0]  ;;  %v8583_v35 = vor.u32 %v10067_v37, %v8580_v20  ;;  %v10207_v37 = vld [vmem:[#allocation14 + $0xafc] sm:$0xf]  ;;  %v7746_v20 = vld [vmem:[#allocation14 + $0x10] sm:$0xf] }
 0x2fd   :  { %v10060_v40 = vld [vmem:[#allocation14 + $0x664] sm:$0xf] }
 0x2fe   :  { %6000 = vmatpush.bf16.msrb.mxu3 %v9003_v46  ;;  %5961 = vmatpush.bf16.msrb.mxu0 %v8331_v55  ;;  %v10841_v6 = vpop.f32.mrf.mxu2  ;;  %v9306_v55 = vld [vmem:[#allocation14 + $0xc48] sm:$0xf]  ;;  %v5697_v60 = vpop.f32.mrf.mxu3  ;;  %v10228_v41 = vld [vmem:[#allocation14 + $0xba4] sm:$0xf] }
 0x2ff   :  { %5922 = vmatpush.bf16.msra.mxu1 %v9447_v28  ;;  %v10137_v28 = vld [vmem:[#allocation14 + $0x8cc] sm:$0xf]  ;;  %v9307_v12 = vor.u32 %v10252_v57, %v9306_v55  ;;  %v9196_v55 = vld [vmem:[#allocation14 + $0xb84] sm:$0xf0] }
 0x300   :  { %5986 = vmatpush.bf16.msrb.mxu2 %v8807_v62  ;;  %v8272_v62 = vld [vmem:[#allocation14 + $0x44c] sm:$0xf0]  ;;  %v8524_v57 = vld [vmem:[#allocation14 + $0x644] sm:$0xf0] }
 0x301   :  { %v8275_v26 = vor.u32 %v9990_v11, %v8272_v62  ;;  %v8191_v11 = vor.u32 %v9969_v58, %v8188_v21  ;;  %v8167_v62 = vor.u32 %v9966_v61, %v8166_v25  ;;  %v7802_v58 = vld [vmem:[#allocation14 + $0x80] sm:$0xf]  ;;  %v8054_v25 = vld [vmem:[#allocation14 + $0x278] sm:$0xf]  ;;  %v9938_v61 = vld [vmem:[#allocation14 + $0x290] sm:$0xf0] }
 0x302   :  { %6001 = vmatpush.bf16.msrb.mxu3 %v8975_v0  ;;  %5962 = vmatpush.bf16.msrb.mxu0 %v8303_v1  ;;  %v10074_v0 = vld [vmem:[#allocation14 + $0x6d4] sm:$0xf] }
 0x303   :  { %5923 = vmatpush.bf16.msra.mxu1 %v9419_v9  ;;  %v10242_v1 = vld [vmem:[#allocation14 + $0xc14] sm:$0xf]  ;;  %v8608_v9 = vld [vmem:[#allocation14 + $0x6ec] sm:$0xf0] }
 0x304   :  { %5987 = vmatpush.bf16.msrb.mxu2 %v8779_v31  ;;  %v10081_v31 = vld [vmem:[#allocation14 + $0x70c] sm:$0xf]  ;;  %v9283_v13 = vor.u32 %v10242_v1, %v9280_v2  ;;  %v10046_v2 = vld [vmem:[#allocation14 + $0x5f4] sm:$0xf] }
 0x305   :  { %v8639_v45 = vor.u32 %v10081_v31, %v8636_v32 }
 0x306   :  { %6002 = vmatpush.bf16.msrb.mxu3 %v8947_v15  ;;  %5963 = vmatpush.bf16.msrb.mxu0 %v8275_v26  ;;  %v5736_v43 = vpop.f32.mrf.mxu2  ;;  %v9959_v15 = vld [vmem:[#allocation14 + $0x338] sm:$0xf0]  ;;  %v8611_v26 = vor.u32 %v10074_v0, %v8608_v9  ;;  %v10846_v31 = vpop.f32.mrf.mxu3  ;;  %v8527_v0 = vor.u32 %v10053_v53, %v8524_v57  ;;  %v9168_v9 = vld [vmem:[#allocation14 + $0xb4c] sm:$0xf0]  ;;  %v10193_v57 = vld [vmem:[#allocation14 + $0xa8c] sm:$0xf] }
 0x307   :  { %5924 = vmatpush.bf16.msra.mxu1 %v9391_v18  ;;  %v10235_v18 = vld [vmem:[#allocation14 + $0xbdc] sm:$0xf]  ;;  %v8139_v4 = vor.u32 %v9959_v15, %v8138_v14  ;;  %v9224_v43 = vld [vmem:[#allocation14 + $0xbbc] sm:$0xf0] }
 0x308   :  { %5988 = vmatpush.bf16.msrb.mxu2 %v8751_v47  ;;  %v8216_v47 = vld [vmem:[#allocation14 + $0x3dc] sm:$0xf0]  ;;  %v9931_v14 = vld [vmem:[#allocation14 + $0x258] sm:$0xf0] }
 0x309   :  { %v8219_v46 = vor.u32 %v9976_v38, %v8216_v47  ;;  %v9882_v38 = vld [vmem:[#allocation14 + $0xd0] sm:$0xf0] }
 0x30a   :  { %6003 = vmatpush.bf16.msrb.mxu3 %v8919_v23  ;;  %5964 = vmatpush.bf16.msrb.mxu0 %v8247_v39  ;;  %v8110_v23 = vld [vmem:[#allocation14 + $0x2e8] sm:$0xf]  ;;  %v7859_v39 = vor.u32 %v9889_v30, %v7858_v17  ;;  %v9861_v17 = vld [vmem:[#allocation14 + $0x28] sm:$0xf0] }
 0x30b   :  { %5925 = vmatpush.bf16.msra.mxu1 %v9363_v44  ;;  %v8552_v44 = vld [vmem:[#allocation14 + $0x67c] sm:$0xf0]  ;;  %v8111_v47 = vor.u32 %v9952_v33, %v8110_v23 }
 0x30c   :  { %5989 = vmatpush.bf16.msrb.mxu2 %v8723_v59  ;;  %v8860_v59 = vld [vmem:[#allocation14 + $0x8e4] sm:$0xf0] }
 0x30d   :  { %v8863_v5 = vor.u32 %v10137_v28, %v8860_v59  ;;  %v9875_v28 = vld [vmem:[#allocation14 + $0x98] sm:$0xf0]  ;;  %v8083_v59 = vor.u32 %v9945_v49, %v8082_v24  ;;  %v8440_v24 = vld [vmem:[#allocation14 + $0x59c] sm:$0xf0] }
 0x30e   :  { %6004 = vmatpush.bf16.msrb.mxu3 %v8891_v3  ;;  %5965 = vmatpush.bf16.msrb.mxu0 %v8219_v46  ;;  %v8555_v3 = vor.u32 %v10060_v40, %v8552_v44  ;;  %v10221_v46 = vld [vmem:[#allocation14 + $0xb6c] sm:$0xf]  ;;  %v10851_v60 = vpop.f32.mrf.mxu0  ;;  %v7803_v1 = vor.u32 %v9875_v28, %v7802_v58  ;;  %v9924_v40 = vld [vmem:[#allocation14 + $0x220] sm:$0xf0]  ;;  %v7747_v44 = vor.u32 %v9861_v17, %v7746_v20  ;;  %v7970_v58 = vld [vmem:[#allocation14 + $0x1d0] sm:$0xf] }
 0x30f   :  { %5926 = vmatpush.bf16.msra.mxu1 %v9335_v56  ;;  %v5749_v56 = vpop.f32.mrf.mxu3  ;;  %v9199_v21 = vor.u32 %v10221_v46, %v9196_v55  ;;  %v10025_v46 = vld [vmem:[#allocation14 + $0x54c] sm:$0xf]  ;;  %v8412_v55 = vld [vmem:[#allocation14 + $0x564] sm:$0xf0]  ;;  %v8362_v20 = vld [vmem:[#allocation14 + $0x4e0] sm:$0xf] }
 0x310   :  { %5990 = vmatpush.bf16.msrb.mxu2 %v8695_v29  ;;  %v7886_v29 = vld [vmem:[#allocation14 + $0x128] sm:$0xf]  ;;  %v9917_v28 = vld [vmem:[#allocation14 + $0x1e8] sm:$0xf0]  ;;  %v10015_v17 = vld [vmem:[#allocation14 + $0x4f8] sm:$0xf0] }
 0x311   :  { %v7887_v16 = vor.u32 %v9896_v10, %v7886_v29  ;;  %v8496_v29 = vld [vmem:[#allocation14 + $0x60c] sm:$0xf0]  ;;  %v7774_v10 = vld [vmem:[#allocation14 + $0x48] sm:$0xf] }
 0x312   :  { %6005 = vmatpush.bf16.msrb.mxu3 %v8863_v5  ;;  %5966 = vmatpush.bf16.msrb.mxu0 %v8191_v11  ;;  %v10214_v5 = vld [vmem:[#allocation14 + $0xb34] sm:$0xf]  ;;  %v9868_v11 = vld [vmem:[#allocation14 + $0x60] sm:$0xf0]  ;;  %v8499_v15 = vor.u32 %v10046_v2, %v8496_v29  ;;  %v9084_v56 = vld [vmem:[#allocation14 + $0xaa4] sm:$0xf0] }
 0x313   :  { %5927 = vmatpush.bf16.msra.mxu1 %v9307_v12  ;;  %v9171_v12 = vor.u32 %v10214_v5, %v9168_v9  ;;  %v10022_v2 = vld [vmem:[#allocation14 + $0x530] sm:$0xf0]  ;;  %v7971_v5 = vor.u32 %v9917_v28, %v7970_v58  ;;  %v9504_v9 = vld [vmem:[#allocation14 + $0xdec] sm:$0xf0]  ;;  %v8782_v29 = vld [vmem:[#allocation14 + $0x828] sm:$0xf] }
 0x314   :  { %5991 = vmatpush.bf16.msrb.mxu2 %v8667_v19  ;;  %v9252_v19 = vld [vmem:[#allocation14 + $0xbf4] sm:$0xf0]  ;;  %v10277_v58 = vld [vmem:[#allocation14 + $0xd2c] sm:$0xf]  ;;  %v8306_v28 = vld [vmem:[#allocation14 + $0x470] sm:$0xf] }
 0x315   :  { %v9255_v32 = vor.u32 %v10235_v18, %v9252_v19  ;;  %5967 = vmatmul.bf16.vlgmr.msrb.gmra.mxu0 %v10795_v51  ;;  %6006 = vmatmul.bf16.vlgmr.msrb.gmra.mxu3 %v10809_v27  ;;  %v9140_v18 = vld [vmem:[#allocation14 + $0xb14] sm:$0xf0] }
 0x316   :  { %6050 = vmatpush.bf16.msra.mxu3 %v8167_v62  ;;  %6011 = vmatpush.bf16.msra.mxu0 %v9283_v13  ;;  %v8055_v62 = vor.u32 %v9938_v61, %v8054_v25  ;;  %v8026_v13 = vld [vmem:[#allocation14 + $0x240] sm:$0xf]  ;;  %v8468_v19 = vld [vmem:[#allocation14 + $0x5d4] sm:$0xf0]  ;;  %v5710_v23 = vpop.f32.mrf.mxu0  ;;  %v10190_v25 = vld [vmem:[#allocation14 + $0xa70] sm:$0xf0] }
 0x317   :  { %5972 = vmatpush.bf16.msrb.mxu1 %v8611_v26  ;;  %v7775_v26 = vor.u32 %v9868_v11, %v7774_v10  ;;  %v8027_v30 = vor.u32 %v9931_v14, %v8026_v13  ;;  %v10120_v10 = vld [vmem:[#allocation14 + $0x840] sm:$0xf0]  ;;  %v8415_v14 = vor.u32 %v10025_v46, %v8412_v55  ;;  %v10169_v46 = vld [vmem:[#allocation14 + $0x9c8] sm:$0xf0] }
 0x318   :  { %5992 = vmatpush.bf16.msrb.mxu2 %v8639_v45  ;;  %v7830_v45 = vld [vmem:[#allocation14 + $0xb8] sm:$0xf]  ;;  %5928 = vmatmul.bf16.vlgmr.msra.gmra.mxu1 %v10822_v50  ;;  %v10855_v33 = vpop.f32.mrf.mxu3 }
 0x319   :  { %v7831_v54 = vor.u32 %v9882_v38, %v7830_v45  ;;  %v10200_v45 = vld [vmem:[#allocation14 + $0xac4] sm:$0xf]  ;;  %v9112_v38 = vld [vmem:[#allocation14 + $0xadc] sm:$0xf0] }
 0x31a   :  { %6051 = vmatpush.bf16.msra.mxu3 %v8139_v4  ;;  %6012 = vmatpush.bf16.msra.mxu0 %v9255_v32  ;;  %v8838_v4 = vld [vmem:[#allocation14 + $0x898] sm:$0xf]  ;;  %v10134_v32 = vld [vmem:[#allocation14 + $0x8b0] sm:$0xf0]  ;;  %v9115_v53 = vor.u32 %v10200_v45, %v9112_v38  ;;  %v8334_v45 = vld [vmem:[#allocation14 + $0x4a8] sm:$0xf] }
 0x31b   :  { %5993 = vmatmul.bf16.vlgmr.msrb.gmra.mxu2 %v10799_v42  ;;  %5973 = vmatpush.bf16.msrb.mxu1 %v8583_v35  ;;  %v9143_v35 = vor.u32 %v10207_v37, %v9140_v18  ;;  %v8783_v18 = vor.u32 %v10120_v10, %v8782_v29  ;;  %v10008_v38 = vld [vmem:[#allocation14 + $0x4c0] sm:$0xf0] }
 0x31c   :  { %6037 = vmatpush.bf16.msra.mxu2 %v7943_v48  ;;  %v9227_v48 = vor.u32 %v10228_v41, %v9224_v43 }
 0x31e   :  { %6052 = vmatpush.bf16.msra.mxu3 %v8111_v47  ;;  %6013 = vmatpush.bf16.msra.mxu0 %v9227_v48  ;;  %v8839_v47 = vor.u32 %v10134_v32, %v8838_v4  ;;  %v10032_v48 = vld [vmem:[#allocation14 + $0x584] sm:$0xf]  ;;  %v10858_v11 = vpop.f32.mrf.mxu0  ;;  %v8754_v4 = vld [vmem:[#allocation14 + $0x7f0] sm:$0xf]  ;;  %v10113_v32 = vld [vmem:[#allocation14 + $0x808] sm:$0xf0] }
 0x31f   :  { %5974 = vmatpush.bf16.msrb.mxu1 %v8555_v3  ;;  %v8810_v3 = vld [vmem:[#allocation14 + $0x860] sm:$0xf] }
 0x320   :  { %6038 = vmatpush.bf16.msra.mxu2 %v7915_v22  ;;  %v10853_v22 = vpop.f32.mrf.mxu2 }
 0x322   :  { %6053 = vmatpush.bf16.msra.mxu3 %v8083_v59  ;;  %6014 = vmatpush.bf16.msra.mxu0 %v9199_v21  ;;  %v8443_v59 = vor.u32 %v10032_v48, %v8440_v24  ;;  %v9062_v21 = vld [vmem:[#allocation14 + $0xa58] sm:$0xf]  ;;  %v10106_v24 = vld [vmem:[#allocation14 + $0x7d0] sm:$0xf0] }
 0x323   :  { %5975 = vmatpush.bf16.msrb.mxu1 %v8527_v0  ;;  %v10298_v0 = vld [vmem:[#allocation14 + $0xdd4] sm:$0xf]  ;;  %v9063_v13 = vor.u32 %v10190_v25, %v9062_v21  ;;  %v8726_v48 = vld [vmem:[#allocation14 + $0x7b8] sm:$0xf]  ;;  %v9420_v21 = vld [vmem:[#allocation14 + $0xd44] sm:$0xf0] }
 0x324   :  { %6039 = vmatpush.bf16.msra.mxu2 %v7887_v16  ;;  %v10039_v16 = vld [vmem:[#allocation14 + $0x5bc] sm:$0xf]  ;;  %v9507_v37 = vor.u32 %v10298_v0, %v9504_v9  ;;  %v8698_v25 = vld [vmem:[#allocation14 + $0x780] sm:$0xf]  ;;  %v10162_v9 = vld [vmem:[#allocation14 + $0x990] sm:$0xf0] }
 0x325   :  { %v8471_v43 = vor.u32 %v10039_v16, %v8468_v19  ;;  %v10183_v16 = vld [vmem:[#allocation14 + $0xa38] sm:$0xf0] }
 0x326   :  { %6054 = vmatpush.bf16.msra.mxu3 %v8055_v62  ;;  %6015 = vmatpush.bf16.msra.mxu0 %v9171_v12  ;;  %v5801_v62 = vpop.f32.mrf.mxu3  ;;  %v9087_v12 = vor.u32 %v10193_v57, %v9084_v56  ;;  %v10291_v19 = vld [vmem:[#allocation14 + $0xd9c] sm:$0xf]  ;;  %v8727_v57 = vor.u32 %v10106_v24, %v8726_v48  ;;  %v5696_v56 = vadd.f32 %v10843_v8, %v10835_v36  ;;  %v9994_v36 = vld [vmem:[#allocation14 + $0x450] sm:$0xf0]  ;;  %v8894_v24 = vld [vmem:[#allocation14 + $0x908] sm:$0xf] }
 0x327   :  { %5976 = vmatpush.bf16.msrb.mxu1 %v8499_v15  ;;  %v9423_v62 = vor.u32 %v10277_v58, %v9420_v21 }
 0x328   :  { %6040 = vmatpush.bf16.msra.mxu2 %v7859_v39  ;;  %v7998_v39 = vld [vmem:[#allocation14 + $0x208] sm:$0xf]  ;;  %v5788_v41 = vpop.f32.mrf.mxu2 }
 0x329   :  { %v7999_v49 = vor.u32 %v9924_v40, %v7998_v39  ;;  %v9006_v39 = vld [vmem:[#allocation14 + $0x9e8] sm:$0xf]  ;;  %v10176_v40 = vld [vmem:[#allocation14 + $0xa00] sm:$0xf0] }
 0x32a   :  { %6055 = vmatpush.bf16.msra.mxu3 %v8027_v30  ;;  %6016 = vmatpush.bf16.msra.mxu0 %v9143_v35  ;;  %v9476_v30 = vld [vmem:[#allocation14 + $0xdb4] sm:$0xf0]  ;;  %v8363_v35 = vor.u32 %v10015_v17, %v8362_v20  ;;  %v8922_v17 = vld [vmem:[#allocation14 + $0x940] sm:$0xf] }
 0x32b   :  { %5977 = vmatpush.bf16.msrb.mxu1 %v8471_v43  ;;  %v9479_v41 = vor.u32 %v10291_v19, %v9476_v30  ;;  %v8755_v43 = vor.u32 %v10113_v32, %v8754_v4  ;;  %v10155_v30 = vld [vmem:[#allocation14 + $0x958] sm:$0xf0] }
 0x32c   :  { %6041 = vmatpush.bf16.msra.mxu2 %v7831_v54  ;;  %v10127_v54 = vld [vmem:[#allocation14 + $0x878] sm:$0xf0] }
 0x32d   :  { %v8811_v61 = vor.u32 %v10127_v54, %v8810_v3  ;;  %v9007_v3 = vor.u32 %v10176_v40, %v9006_v39  ;;  %v8335_v54 = vor.u32 %v10008_v38, %v8334_v45  ;;  %v9987_v39 = vld [vmem:[#allocation14 + $0x418] sm:$0xf0]  ;;  %v9364_v40 = vld [vmem:[#allocation14 + $0xcd4] sm:$0xf0] }
 0x32e   :  { %6056 = vmatpush.bf16.msra.mxu3 %v7999_v49  ;;  %6017 = vmatpush.bf16.msra.mxu0 %v9115_v53  ;;  %v5762_v49 = vpop.f32.mrf.mxu0  ;;  %v8978_v53 = vld [vmem:[#allocation14 + $0x9b0] sm:$0xf]  ;;  %v9907_v45 = vld [vmem:[#allocation14 + $0x19c] sm:$0xf]  ;;  %v7944_v38 = vld [vmem:[#allocation14 + $0x1b4] sm:$0xf0] }
 0x32f   :  { %5978 = vmatpush.bf16.msrb.mxu1 %v8443_v59  ;;  %v10001_v59 = vld [vmem:[#allocation14 + $0x488] sm:$0xf0]  ;;  %v8979_v0 = vor.u32 %v10169_v46, %v8978_v53  ;;  %v10148_v49 = vld [vmem:[#allocation14 + $0x920] sm:$0xf0]  ;;  %v7947_v21 = vor.u32 %v9907_v45, %v7944_v38  ;;  %v8140_v45 = vld [vmem:[#allocation14 + $0x33c] sm:$0xf0] }
 0x330   :  { %6042 = vmatpush.bf16.msra.mxu2 %v7803_v1  ;;  %v8390_v1 = vld [vmem:[#allocation14 + $0x518] sm:$0xf] }
 0x331   :  { %v8391_v15 = vor.u32 %v10022_v2, %v8390_v1  ;;  %v5709_v1 = vadd.f32 %v10851_v60, %v5696_v56  ;;  %v8307_v2 = vor.u32 %v10001_v59, %v8306_v28  ;;  %v5721_v29 = vpop.f32.mrf.mxu1 }
 0x332   :  { %6057 = vmatpush.bf16.msra.mxu3 %v7971_v5  ;;  %6018 = vmatpush.bf16.msra.mxu0 %v9087_v12  ;;  %v8950_v5 = vld [vmem:[#allocation14 + $0x978] sm:$0xf] }
 0x333   :  { %5979 = vmatpush.bf16.msrb.mxu1 %v8415_v14  ;;  %v8278_v14 = vld [vmem:[#allocation14 + $0x438] sm:$0xf]  ;;  %v5722_v8 = vadd.f32 %v5721_v29, %v5709_v1  ;;  %v8951_v60 = vor.u32 %v10162_v9, %v8950_v5  ;;  %v8895_v1 = vor.u32 %v10148_v49, %v8894_v24  ;;  %v7916_v5 = vld [vmem:[#allocation14 + $0x17c] sm:$0xf0]  ;;  %v10249_v29 = vld [vmem:[#allocation14 + $0xc4c] sm:$0xf] }
 0x334   :  { %6043 = vmatpush.bf16.msra.mxu2 %v7775_v26  ;;  %v9034_v26 = vld [vmem:[#allocation14 + $0xa20] sm:$0xf]  ;;  %v8279_v20 = vor.u32 %v9994_v36, %v8278_v14  ;;  %v9973_v36 = vld [vmem:[#allocation14 + $0x3a8] sm:$0xf0] }
 0x335   :  { %v9035_v23 = vor.u32 %v10183_v16, %v9034_v26  ;;  %6019 = vmatmul.bf16.vlgmr.msra.gmra.mxu0 %v10815_v63  ;;  %6058 = vmatmul.bf16.vlgmr.msra.gmra.mxu3 %v10777_v34  ;;  %v8670_v26 = vld [vmem:[#allocation14 + $0x748] sm:$0xf]  ;;  %v10092_v16 = vld [vmem:[#allocation14 + $0x760] sm:$0xf0]  ;;  %10322 = vtanh.f32 %v5722_v8  ;;  %v9963_v8 = vld [vmem:[#allocation14 + $0x35c] sm:$0xf] }
 0x336   :  { %6102 = vmatpush.bf16.msrb.mxu3 %v9063_v13  ;;  %6063 = vmatpush.bf16.msrb.mxu0 %v8391_v15  ;;  %v10270_v13 = vld [vmem:[#allocation14 + $0xcf4] sm:$0xf]  ;;  %v9392_v15 = vld [vmem:[#allocation14 + $0xd0c] sm:$0xf0]  ;;  %v8671_v32 = vor.u32 %v10092_v16, %v8670_v26  ;;  %v8586_v24 = vld [vmem:[#allocation14 + $0x6a0] sm:$0xf] }
 0x337   :  { %6024 = vmatpush.bf16.msra.mxu1 %v9507_v37  ;;  %v10866_v37 = vpop.f32.mrf.mxu0  ;;  %v9395_v4 = vor.u32 %v10270_v13, %v9392_v15  ;;  %v10141_v13 = vld [vmem:[#allocation14 + $0x8e8] sm:$0xf0]  ;;  %v8168_v15 = vld [vmem:[#allocation14 + $0x374] sm:$0xf0]  ;;  %v9258_v49 = vld [vmem:[#allocation14 + $0xbe0] sm:$0xf] }
 0x338   :  { %6044 = vmatpush.bf16.msra.mxu2 %v7747_v44  ;;  %v10284_v44 = vld [vmem:[#allocation14 + $0xd64] sm:$0xf]  ;;  %5980 = vmatmul.bf16.vlgmr.msrb.gmra.mxu1 %v10791_v7 }
 0x33a   :  { %6103 = vmatpush.bf16.msrb.mxu3 %v9035_v23  ;;  %6064 = vmatpush.bf16.msrb.mxu0 %v8363_v35  ;;  %v10263_v23 = vld [vmem:[#allocation14 + $0xcbc] sm:$0xf]  ;;  %v8250_v35 = vld [vmem:[#allocation14 + $0x400] sm:$0xf] }
 0x33b   :  { %6045 = vmatmul.bf16.vlgmr.msra.gmra.mxu2 %v10782_v52  ;;  %6025 = vmatpush.bf16.msra.mxu1 %v9479_v41  ;;  %v8642_v41 = vld [vmem:[#allocation14 + $0x710] sm:$0xf]  ;;  %v8251_v48 = vor.u32 %v9987_v39, %v8250_v35  ;;  %v9367_v53 = vor.u32 %v10263_v23, %v9364_v40  ;;  %v10323_v58 = vpop.eup %10322  ;;  %v8171_v39 = vor.u32 %v9963_v8, %v8168_v15  ;;  %v10225_v15 = vld [vmem:[#allocation14 + $0xb88] sm:$0xf0] }
 0x33c   :  { %6089 = vmatpush.bf16.msrb.mxu2 %v8839_v47  ;;  %v9448_v47 = vld [vmem:[#allocation14 + $0xd7c] sm:$0xf0]  ;;  %6356 = vst [vmem:[#allocation17] sm:$0xff] %v10323_v58  ;;  %v9949_v58 = vld [vmem:[#allocation14 + $0x2ec] sm:$0xf] }
 0x33d   :  { %v9451_v55 = vor.u32 %v10284_v44, %v9448_v47  ;;  %v8923_v44 = vor.u32 %v10155_v30, %v8922_v17  ;;  %v10078_v30 = vld [vmem:[#allocation14 + $0x6f0] sm:$0xf0]  ;;  %v9202_v8 = vld [vmem:[#allocation14 + $0xb70] sm:$0xf] }
 0x33e   :  { %6104 = vmatpush.bf16.msrb.mxu3 %v9007_v3  ;;  %6065 = vmatpush.bf16.msrb.mxu0 %v8335_v54  ;;  %v5838_v10 = vpop.f32.mrf.mxu2  ;;  %v5723_v3 = vpop.f32.mrf.mxu1 }
 0x33f   :  { %6026 = vmatpush.bf16.msra.mxu1 %v9451_v55  ;;  %v5851_v54 = vpop.f32.mrf.mxu3  ;;  %v8222_v55 = vld [vmem:[#allocation14 + $0x3c8] sm:$0xf]  ;;  %v10071_v3 = vld [vmem:[#allocation14 + $0x6b8] sm:$0xf0] }
 0x340   :  { %6090 = vmatpush.bf16.msrb.mxu2 %v8811_v61  ;;  %v10099_v61 = vld [vmem:[#allocation14 + $0x798] sm:$0xf0] }
 0x341   :  { %v8699_v12 = vor.u32 %v10099_v61, %v8698_v25  ;;  %v10256_v25 = vld [vmem:[#allocation14 + $0xc84] sm:$0xf]  ;;  %v9336_v61 = vld [vmem:[#allocation14 + $0xc9c] sm:$0xf0] }
 0x342   :  { %6105 = vmatpush.bf16.msrb.mxu3 %v8979_v0  ;;  %6066 = vmatpush.bf16.msrb.mxu0 %v8307_v2  ;;  %v5814_v0 = vpop.f32.mrf.mxu0  ;;  %v9900_v2 = vld [vmem:[#allocation14 + $0x164] sm:$0xf]  ;;  %v9339_v14 = vor.u32 %v10256_v25, %v9336_v61  ;;  %v9230_v25 = vld [vmem:[#allocation14 + $0xba8] sm:$0xf] }
 0x343   :  { %6027 = vmatpush.bf16.msra.mxu1 %v9423_v62  ;;  %v8194_v62 = vld [vmem:[#allocation14 + $0x390] sm:$0xf]  ;;  %v7919_v16 = vor.u32 %v9900_v2, %v7916_v5  ;;  %v10232_v61 = vld [vmem:[#allocation14 + $0xbc0] sm:$0xf0]  ;;  %v7832_v2 = vld [vmem:[#allocation14 + $0xd4] sm:$0xf0] }
 0x344   :  { %6091 = vmatpush.bf16.msrb.mxu2 %v8783_v18  ;;  %v10868_v18 = vld [vmem:[#allocation16] sm:$0xff]  ;;  %v8195_v35 = vor.u32 %v9973_v36, %v8194_v62  ;;  %v9942_v62 = vld [vmem:[#allocation14 + $0x2b4] sm:$0xf]  ;;  %v8530_v36 = vld [vmem:[#allocation14 + $0x630] sm:$0xf] }
 0x345   :  { %v3305_v19 = vperm.slane %v10868_v18, 2  ;;  %v3304_v28 = vperm.slane %v10868_v18, 1  ;;  %v10064_v0 = vld [vmem:[#allocation14 + $0x680] sm:$0xf0] }
 0x346   :  { %6106 = vmatpush.bf16.msrb.mxu3 %v8951_v60  ;;  %6067 = vmatpush.bf16.msrb.mxu0 %v8279_v20  ;;  %v5840_v56 = vpop.f32.mrf.mxu2  ;;  %v8614_v60 = vld [vmem:[#allocation14 + $0x6d8] sm:$0xf]  ;;  %v10246_v20 = vld [vmem:[#allocation14 + $0xc30] sm:$0xf0]  ;;  %v5773_v40 = vpop.f32.mrf.mxu1 }
 0x347   :  { %v5839_v47 = vadd.f32 %v5838_v10, %v3305_v19  ;;  %6028 = vmatpush.bf16.msra.mxu1 %v9395_v4  ;;  %v9308_v10 = vld [vmem:[#allocation14 + $0xc64] sm:$0xf0]  ;;  %v5735_v26 = vadd.f32 %v10841_v6, %v3304_v28  ;;  %v9286_v19 = vld [vmem:[#allocation14 + $0xc18] sm:$0xf]  ;;  %v9893_v4 = vld [vmem:[#allocation14 + $0x12c] sm:$0xf]  ;;  %v5853_v6 = vpop.f32.mrf.mxu3 }
 0x348   :  { %6092 = vmatpush.bf16.msrb.mxu2 %v8755_v43  ;;  %v10085_v43 = vld [vmem:[#allocation14 + $0x728] sm:$0xf0]  ;;  %v8112_v28 = vld [vmem:[#allocation14 + $0x304] sm:$0xf0]  ;;  %v10050_v6 = vld [vmem:[#allocation14 + $0x610] sm:$0xf0] }
 0x349   :  { %v8643_v46 = vor.u32 %v10085_v43, %v8642_v41  ;;  %v10872_v59 = vadd.f32 %v5851_v54, %v5839_v47  ;;  %v5748_v23 = vadd.f32 %v10846_v31, %v5735_v26  ;;  %v9311_v41 = vor.u32 %v10249_v29, %v9308_v10  ;;  %v10239_v31 = vld [vmem:[#allocation14 + $0xbf8] sm:$0xf0]  ;;  %v9886_v54 = vld [vmem:[#allocation14 + $0xf4] sm:$0xf]  ;;  %v10057_v26 = vld [vmem:[#allocation14 + $0x648] sm:$0xf0] }
 0x34a   :  { %6107 = vmatpush.bf16.msrb.mxu3 %v8923_v44  ;;  %6068 = vmatpush.bf16.msrb.mxu0 %v8251_v48  ;;  %v9287_v43 = vor.u32 %v10246_v20, %v9286_v19  ;;  %v9956_v44 = vld [vmem:[#allocation14 + $0x324] sm:$0xf]  ;;  %v8615_v47 = vor.u32 %v10078_v30, %v8614_v60  ;;  %v9231_v10 = vor.u32 %v10232_v61, %v9230_v25  ;;  %v7804_v60 = vld [vmem:[#allocation14 + $0x9c] sm:$0xf0]  ;;  %v8056_v30 = vld [vmem:[#allocation14 + $0x294] sm:$0xf0] }
 0x34b   :  { %6029 = vmatpush.bf16.msra.mxu1 %v9367_v53  ;;  %v5761_v38 = vadd.f32 %v10858_v11, %v5748_v23  ;;  %v7860_v53 = vld [vmem:[#allocation14 + $0x10c] sm:$0xf0]  ;;  %v8587_v11 = vor.u32 %v10071_v3, %v8586_v24  ;;  %v9203_v20 = vor.u32 %v10225_v15, %v9202_v8  ;;  %v8502_v23 = vld [vmem:[#allocation14 + $0x5f8] sm:$0xf]  ;;  %v8028_v24 = vld [vmem:[#allocation14 + $0x25c] sm:$0xf0] }
 0x34c   :  { %6093 = vmatpush.bf16.msrb.mxu2 %v8727_v57  ;;  %v9980_v57 = vld [vmem:[#allocation14 + $0x3e0] sm:$0xf0]  ;;  %v7863_v56 = vor.u32 %v9886_v54, %v7860_v53  ;;  %v8474_v54 = vld [vmem:[#allocation14 + $0x5c0] sm:$0xf]  ;;  %v8000_v25 = vld [vmem:[#allocation14 + $0x224] sm:$0xf0] }
 0x34d   :  { %v8223_v9 = vor.u32 %v9980_v57, %v8222_v55  ;;  %v8143_v55 = vor.u32 %v9956_v44, %v8140_v45  ;;  %v9259_v57 = vor.u32 %v10239_v31, %v9258_v49  ;;  %v8503_v31 = vor.u32 %v10050_v6, %v8502_v23  ;;  %v9146_v53 = vld [vmem:[#allocation14 + $0xb00] sm:$0xf]  ;;  %v9090_v8 = vld [vmem:[#allocation14 + $0xa90] sm:$0xf]  ;;  %v9064_v23 = vld [vmem:[#allocation14 + $0xa74] sm:$0xf0] }
 0x34e   :  { %6108 = vmatpush.bf16.msrb.mxu3 %v8895_v1  ;;  %v9879_v1 = vld [vmem:[#allocation14 + $0xbc] sm:$0xf]  ;;  %v5775_v29 = vpop.f32.mrf.mxu1  ;;  %v8392_v6 = vld [vmem:[#allocation14 + $0x534] sm:$0xf0] }
 0x34f   :  { %6069 = vmatpush.bf16.msrb.mxu0 %v8223_v9  ;;  %6030 = vmatpush.bf16.msra.mxu1 %v9339_v14  ;;  %v8115_v9 = vor.u32 %v9949_v58, %v8112_v28  ;;  %v7835_v14 = vor.u32 %v9879_v1, %v7832_v2  ;;  %v7748_v58 = vld [vmem:[#allocation14 + $0x2c] sm:$0xf0]  ;;  %v10131_v28 = vld [vmem:[#allocation14 + $0x89c] sm:$0xf]  ;;  %v9118_v2 = vld [vmem:[#allocation14 + $0xac8] sm:$0xf] }
 0x350   :  { %6094 = vmatpush.bf16.msrb.mxu2 %v8699_v12  ;;  %v8866_v12 = vld [vmem:[#allocation14 + $0x8d0] sm:$0xf] }
 0x351   :  { %v8867_v17 = vor.u32 %v10141_v13, %v8866_v12  ;;  %v8084_v12 = vld [vmem:[#allocation14 + $0x2cc] sm:$0xf0] }
 0x352   :  { %v8087_v19 = vor.u32 %v9942_v62, %v8084_v12  ;;  %v10885_v44 = vpop.f32.mrf.mxu0  ;;  %v10036_v62 = vld [vmem:[#allocation14 + $0x5a0] sm:$0xf0] }
 0x353   :  { %6109 = vmatpush.bf16.msrb.mxu3 %v8867_v17  ;;  %6070 = vmatpush.bf16.msrb.mxu0 %v8195_v35  ;;  %v9935_v17 = vld [vmem:[#allocation14 + $0x27c] sm:$0xf]  ;;  %v9174_v35 = vld [vmem:[#allocation14 + $0xb38] sm:$0xf] }
 0x354   :  { %6095 = vmatpush.bf16.msrb.mxu2 %v8671_v32  ;;  %v7888_v32 = vld [vmem:[#allocation14 + $0x144] sm:$0xf0]  ;;  %6031 = vmatpush.bf16.msra.mxu1 %v9311_v41  ;;  %v9865_v41 = vld [vmem:[#allocation14 + $0x4c] sm:$0xf]  ;;  %v8059_v45 = vor.u32 %v9935_v17, %v8056_v30 }
 0x355   :  { %v7891_v48 = vor.u32 %v9893_v4, %v7888_v32  ;;  %v8531_v4 = vor.u32 %v10057_v26, %v8530_v36  ;;  %v8812_v36 = vld [vmem:[#allocation14 + $0x87c] sm:$0xf0] }
 0x356   :  { %6071 = vmatmul.bf16.vlgmr.msrb.gmra.mxu0 %v10795_v51  ;;  %6110 = vmatmul.bf16.vlgmr.msrb.gmra.mxu3 %v10809_v27 }
 0x357   :  { %6154 = vmatpush.bf16.msra.mxu3 %v8171_v39  ;;  %6115 = vmatpush.bf16.msra.mxu0 %v9287_v43  ;;  %v10218_v39 = vld [vmem:[#allocation14 + $0xb50] sm:$0xf0]  ;;  %v7776_v43 = vld [vmem:[#allocation14 + $0x64] sm:$0xf0] }
 0x358   :  { %6096 = vmatpush.bf16.msrb.mxu2 %v8643_v46  ;;  %v5774_v46 = vadd.f32 %v5773_v40, %v5761_v38  ;;  %6076 = vmatpush.bf16.msrb.mxu1 %v8615_v47  ;;  %v5825_v38 = vpop.f32.mrf.mxu1  ;;  %v9175_v47 = vor.u32 %v10218_v39, %v9174_v35  ;;  %v7779_v3 = vor.u32 %v9865_v41, %v7776_v43  ;;  %v10019_v39 = vld [vmem:[#allocation14 + $0x51c] sm:$0xf]  ;;  %v10302_v43 = vld [vmem:[#allocation14 + $0xdf0] sm:$0xf0] }
 0x359   :  { %6032 = vmatmul.bf16.vlgmr.msra.gmra.mxu1 %v10822_v50 }
 0x35a   :  { %v5787_v5 = vadd.f32 %v10853_v22, %v5774_v46  ;;  %v10211_v46 = vld [vmem:[#allocation14 + $0xb18] sm:$0xf0]  ;;  %v10888_v61 = vpop.f32.mrf.mxu3  ;;  %v5866_v12 = vpop.f32.mrf.mxu0 }
 0x35b   :  { %6097 = vmatmul.bf16.vlgmr.msrb.gmra.mxu2 %v10799_v42  ;;  %6155 = vmatpush.bf16.msra.mxu3 %v8143_v55  ;;  %v10043_v55 = vld [vmem:[#allocation14 + $0x5d8] sm:$0xf0] }
 0x35c   :  { %6141 = vmatpush.bf16.msra.mxu2 %v7947_v21  ;;  %v8558_v21 = vld [vmem:[#allocation14 + $0x668] sm:$0xf]  ;;  %6116 = vmatpush.bf16.msra.mxu0 %v9259_v57  ;;  %v5800_v22 = vadd.f32 %v10855_v33, %v5787_v5  ;;  %v9858_v57 = vld [vmem:[#allocation14 + $0x14] sm:$0xf]  ;;  %v10204_v5 = vld [vmem:[#allocation14 + $0xae0] sm:$0xf0] }
 0x35d   :  { %6077 = vmatpush.bf16.msrb.mxu1 %v8587_v11  ;;  %v8559_v13 = vor.u32 %v10064_v0, %v8558_v21  ;;  %v8840_v11 = vld [vmem:[#allocation14 + $0x8b4] sm:$0xf0]  ;;  %v9921_v21 = vld [vmem:[#allocation14 + $0x20c] sm:$0xf]  ;;  %v8475_v0 = vor.u32 %v10043_v55, %v8474_v54  ;;  %v7751_v1 = vor.u32 %v9858_v57, %v7748_v58  ;;  %v9119_v26 = vor.u32 %v10204_v5, %v9118_v2  ;;  %v10012_v55 = vld [vmem:[#allocation14 + $0x4e4] sm:$0xf] }
 0x35e   :  { %v10883_v40 = vpop.f32.mrf.mxu2  ;;  %v5813_v33 = vadd.f32 %v10866_v37, %v5800_v22  ;;  %v8843_v29 = vor.u32 %v10131_v28, %v8840_v11  ;;  %v10197_v22 = vld [vmem:[#allocation14 + $0xaa8] sm:$0xf0]  ;;  %v8364_v57 = vld [vmem:[#allocation14 + $0x4fc] sm:$0xf0]  ;;  %v10295_v58 = vld [vmem:[#allocation14 + $0xdb8] sm:$0xf0] }
 0x35f   :  { %6156 = vmatpush.bf16.msra.mxu3 %v8115_v9  ;;  %v8756_v28 = vld [vmem:[#allocation14 + $0x80c] sm:$0xf0]  ;;  %v9454_v2 = vld [vmem:[#allocation14 + $0xd68] sm:$0xf]  ;;  %v10005_v5 = vld [vmem:[#allocation14 + $0x4ac] sm:$0xf] }
 0x360   :  { %6142 = vmatpush.bf16.msra.mxu2 %v7919_v16  ;;  %v9872_v16 = vld [vmem:[#allocation14 + $0x84] sm:$0xf]  ;;  %6117 = vmatpush.bf16.msra.mxu0 %v9231_v10  ;;  %v5826_v49 = vadd.f32 %v5825_v38, %v5813_v33  ;;  %v8446_v10 = vld [vmem:[#allocation14 + $0x588] sm:$0xf]  ;;  %v5827_v15 = vpop.f32.mrf.mxu1  ;;  %v10117_v33 = vld [vmem:[#allocation14 + $0x82c] sm:$0xf]  ;;  %v9091_v38 = vor.u32 %v10197_v22, %v9090_v8 }
 0x361   :  { %6078 = vmatpush.bf16.msrb.mxu1 %v8559_v13  ;;  %v7807_v32 = vor.u32 %v9872_v16, %v7804_v60  ;;  %v8003_v13 = vor.u32 %v9921_v21, %v8000_v25  ;;  %v8418_v16 = vld [vmem:[#allocation14 + $0x550] sm:$0xf]  ;;  %v10029_v60 = vld [vmem:[#allocation14 + $0x568] sm:$0xf0]  ;;  %v8447_v30 = vor.u32 %v10036_v62, %v8446_v10  ;;  %v9008_v25 = vld [vmem:[#allocation14 + $0xa04] sm:$0xf0] }
 0x362   :  { %10324 = vtanh.f32 %v5826_v49  ;;  %v8395_v49 = vor.u32 %v10019_v39, %v8392_v6  ;;  %v10173_v21 = vld [vmem:[#allocation14 + $0x9ec] sm:$0xf]  ;;  %v10103_v10 = vld [vmem:[#allocation14 + $0x7bc] sm:$0xf]  ;;  %v8728_v62 = vld [vmem:[#allocation14 + $0x7d4] sm:$0xf0] }
 0x363   :  { %6157 = vmatpush.bf16.msra.mxu3 %v8087_v19  ;;  %v9914_v19 = vld [vmem:[#allocation14 + $0x1d4] sm:$0xf]  ;;  %v9011_v12 = vor.u32 %v10173_v21, %v9008_v25  ;;  %v8731_v15 = vor.u32 %v10103_v10, %v8728_v62  ;;  %v10281_v22 = vld [vmem:[#allocation14 + $0xd48] sm:$0xf0]  ;;  %v9398_v39 = vld [vmem:[#allocation14 + $0xcf8] sm:$0xf] }
 0x364   :  { %6143 = vmatpush.bf16.msra.mxu2 %v7891_v48  ;;  %6118 = vmatpush.bf16.msra.mxu0 %v9203_v20  ;;  %v9928_v48 = vld [vmem:[#allocation14 + $0x244] sm:$0xf]  ;;  %v7972_v20 = vld [vmem:[#allocation14 + $0x1ec] sm:$0xf0]  ;;  %v9991_v6 = vld [vmem:[#allocation14 + $0x43c] sm:$0xf] }
 0x365   :  { %6079 = vmatpush.bf16.msrb.mxu1 %v8531_v4  ;;  %v8031_v37 = vor.u32 %v9928_v48, %v8028_v24  ;;  %v9510_v4 = vld [vmem:[#allocation14 + $0xdd8] sm:$0xf]  ;;  %v7975_v41 = vor.u32 %v9914_v19, %v7972_v20  ;;  %v5905_v48 = vpop.f32.mrf.mxu3  ;;  %v8419_v24 = vor.u32 %v10029_v60, %v8418_v16  ;;  %v9998_v16 = vld [vmem:[#allocation14 + $0x474] sm:$0xf]  ;;  %v8308_v60 = vld [vmem:[#allocation14 + $0x48c] sm:$0xf0] }
 0x366   :  { %v5892_v9 = vpop.f32.mrf.mxu2  ;;  %v9511_v54 = vor.u32 %v10302_v43, %v9510_v4  ;;  %v10096_v19 = vld [vmem:[#allocation14 + $0x784] sm:$0xf]  ;;  %v8700_v20 = vld [vmem:[#allocation14 + $0x79c] sm:$0xf0]  ;;  %v10159_v4 = vld [vmem:[#allocation14 + $0x97c] sm:$0xf] }
 0x367   :  { %6158 = vmatpush.bf16.msra.mxu3 %v8059_v45  ;;  %v8784_v45 = vld [vmem:[#allocation14 + $0x844] sm:$0xf0]  ;;  %v7950_v21 = vld [vmem:[#allocation14 + $0x1a0] sm:$0xf]  ;;  %v9977_v10 = vld [vmem:[#allocation14 + $0x3cc] sm:$0xf] }
 0x368   :  { %6144 = vmatpush.bf16.msra.mxu2 %v7863_v56  ;;  %6119 = vmatpush.bf16.msra.mxu0 %v9175_v47  ;;  %v9147_v56 = vor.u32 %v10211_v46, %v9146_v53  ;;  %v10325_v17 = vpop.eup %10324  ;;  %v8787_v53 = vor.u32 %v10117_v33, %v8784_v45  ;;  %v9482_v46 = vld [vmem:[#allocation14 + $0xda0] sm:$0xf]  ;;  %v8336_v9 = vld [vmem:[#allocation14 + $0x4c4] sm:$0xf0]  ;;  %v10274_v33 = vld [vmem:[#allocation14 + $0xd10] sm:$0xf0] }
 0x369   :  { %6080 = vmatpush.bf16.msrb.mxu1 %v8503_v31  ;;  %6357 = vst [vmem:[#allocation17 + $0x8] sm:$0xff] %v10325_v17  ;;  %v10180_v31 = vld [vmem:[#allocation14 + $0xa24] sm:$0xf]  ;;  %v10089_v45 = vld [vmem:[#allocation14 + $0x74c] sm:$0xf] }
 0x36a   :  { %v8224_v62 = vld [vmem:[#allocation14 + $0x3e4] sm:$0xf0] }
 0x36b   :  { %6159 = vmatpush.bf16.msra.mxu3 %v8031_v37  ;;  %v10110_v37 = vld [vmem:[#allocation14 + $0x7f4] sm:$0xf] }
 0x36c   :  { %6145 = vmatpush.bf16.msra.mxu2 %v7835_v14  ;;  %v10124_v14 = vld [vmem:[#allocation14 + $0x864] sm:$0xf]  ;;  %6120 = vmatpush.bf16.msra.mxu0 %v9147_v56  ;;  %v8367_v56 = vor.u32 %v10012_v55, %v8364_v57  ;;  %v9370_v55 = vld [vmem:[#allocation14 + $0xcc0] sm:$0xf] }
 0x36d   :  { %6081 = vmatpush.bf16.msrb.mxu1 %v8475_v0  ;;  %v8815_v35 = vor.u32 %v10124_v14, %v8812_v36  ;;  %v9483_v0 = vor.u32 %v10295_v58, %v9482_v46  ;;  %v10166_v14 = vld [vmem:[#allocation14 + $0x9b4] sm:$0xf]  ;;  %v8980_v36 = vld [vmem:[#allocation14 + $0x9cc] sm:$0xf0]  ;;  %v9984_v57 = vld [vmem:[#allocation14 + $0x404] sm:$0xf] }
 0x36e   :  { %v8983_v17 = vor.u32 %v10166_v14, %v8980_v36  ;;  %v8252_v58 = vld [vmem:[#allocation14 + $0x41c] sm:$0xf0]  ;;  %v9342_v36 = vld [vmem:[#allocation14 + $0xc88] sm:$0xf] }
 0x36f   :  { %6160 = vmatpush.bf16.msra.mxu3 %v8003_v13  ;;  %v8339_v13 = vor.u32 %v10005_v5, %v8336_v9 }
 0x370   :  { %6146 = vmatpush.bf16.msra.mxu2 %v7807_v32  ;;  %v10187_v32 = vld [vmem:[#allocation14 + $0xa5c] sm:$0xf]  ;;  %6121 = vmatpush.bf16.msra.mxu0 %v9119_v26  ;;  %v9426_v26 = vld [vmem:[#allocation14 + $0xd30] sm:$0xf] }
 0x371   :  { %v9067_v47 = vor.u32 %v10187_v32, %v9064_v23  ;;  %6082 = vmatpush.bf16.msrb.mxu1 %v8447_v30  ;;  %v8311_v30 = vor.u32 %v9998_v16, %v8308_v60  ;;  %v8952_v32 = vld [vmem:[#allocation14 + $0x994] sm:$0xf0]  ;;  %v9427_v23 = vor.u32 %v10281_v22, %v9426_v26  ;;  %v7922_v16 = vld [vmem:[#allocation14 + $0x168] sm:$0xf]  ;;  %v9904_v60 = vld [vmem:[#allocation14 + $0x180] sm:$0xf0] }
 0x372   :  { %v8955_v48 = vor.u32 %v10159_v4, %v8952_v32  ;;  %v10138_v4 = vld [vmem:[#allocation14 + $0x8d4] sm:$0xf]  ;;  %v8868_v32 = vld [vmem:[#allocation14 + $0x8ec] sm:$0xf0] }
 0x373   :  { %6161 = vmatpush.bf16.msra.mxu3 %v7975_v41  ;;  %v8280_v41 = vld [vmem:[#allocation14 + $0x454] sm:$0xf0] }
 0x374   :  { %6147 = vmatpush.bf16.msra.mxu2 %v7779_v3  ;;  %v9036_v3 = vld [vmem:[#allocation14 + $0xa3c] sm:$0xf0]  ;;  %6122 = vmatpush.bf16.msra.mxu0 %v9091_v38  ;;  %v8672_v38 = vld [vmem:[#allocation14 + $0x764] sm:$0xf0] }
 0x375   :  { %v9039_v11 = vor.u32 %v10180_v31, %v9036_v3  ;;  %6083 = vmatpush.bf16.msrb.mxu1 %v8419_v24  ;;  %v3306_v24 = vperm.slane %v10868_v18, 3  ;;  %v8283_v31 = vor.u32 %v9991_v6, %v8280_v41  ;;  %v10152_v3 = vld [vmem:[#allocation14 + $0x944] sm:$0xf]  ;;  %v8675_v46 = vor.u32 %v10089_v45, %v8672_v38  ;;  %v9911_v18 = vld [vmem:[#allocation14 + $0x1b8] sm:$0xf0] }
 0x376   :  { %6162 = vmatmul.bf16.vlgmr.msra.gmra.mxu3 %v10777_v34  ;;  %v7951_v14 = vor.u32 %v9911_v18, %v7950_v21  ;;  %v9967_v6 = vld [vmem:[#allocation14 + $0x378] sm:$0xf0]  ;;  %v7923_v41 = vor.u32 %v9904_v60, %v7922_v16  ;;  %v9288_v45 = vld [vmem:[#allocation14 + $0xc34] sm:$0xf0]  ;;  %v8871_v38 = vor.u32 %v10138_v4, %v8868_v32  ;;  %v10236_v21 = vld [vmem:[#allocation14 + $0xbe4] sm:$0xf] }
 0x377   :  { %6206 = vmatpush.bf16.msrb.mxu3 %v9067_v47  ;;  %6123 = vmatmul.bf16.vlgmr.msra.gmra.mxu0 %v10815_v63  ;;  %v10894_v47 = vpop.f32.mrf.mxu0  ;;  %v9260_v18 = vld [vmem:[#allocation14 + $0xbfc] sm:$0xf0]  ;;  %v8090_v60 = vld [vmem:[#allocation14 + $0x2b8] sm:$0xf]  ;;  %v9204_v4 = vld [vmem:[#allocation14 + $0xb8c] sm:$0xf0] }
 0x378   :  { %6148 = vmatpush.bf16.msra.mxu2 %v7751_v1  ;;  %6167 = vmatpush.bf16.msrb.mxu0 %v8395_v49  ;;  %v8759_v1 = vor.u32 %v10110_v37, %v8756_v28  ;;  %v10897_v49 = vpop.f32.mrf.mxu1  ;;  %v10267_v37 = vld [vmem:[#allocation14 + $0xcd8] sm:$0xf0]  ;;  %v10082_v28 = vld [vmem:[#allocation14 + $0x714] sm:$0xf]  ;;  %v5955_v5 = vpop.f32.mrf.mxu3  ;;  %v8532_v32 = vld [vmem:[#allocation14 + $0x64c] sm:$0xf0] }
 0x379   :  { %6128 = vmatpush.bf16.msra.mxu1 %v9511_v54  ;;  %v8924_v54 = vld [vmem:[#allocation14 + $0x95c] sm:$0xf0]  ;;  %v9371_v9 = vor.u32 %v10267_v37, %v9370_v55  ;;  %v5865_v37 = vadd.f32 %v10885_v44, %v10872_v59  ;;  %v9953_v59 = vld [vmem:[#allocation14 + $0x308] sm:$0xf0] }
 0x37a   :  { %6084 = vmatmul.bf16.vlgmr.msrb.gmra.mxu1 %v10791_v7 }
 0x37b   :  { %6149 = vmatmul.bf16.vlgmr.msra.gmra.mxu2 %v10782_v52  ;;  %6207 = vmatpush.bf16.msrb.mxu3 %v9039_v11  ;;  %v8644_v11 = vld [vmem:[#allocation14 + $0x72c] sm:$0xf0] }
 0x37c   :  { %6193 = vmatpush.bf16.msrb.mxu2 %v8843_v29  ;;  %v10288_v29 = vld [vmem:[#allocation14 + $0xd80] sm:$0xf0]  ;;  %6168 = vmatpush.bf16.msrb.mxu0 %v8367_v56  ;;  %v8927_v56 = vor.u32 %v10152_v3, %v8924_v54 }
 0x37d   :  { %6129 = vmatpush.bf16.msra.mxu1 %v9483_v0  ;;  %v9455_v8 = vor.u32 %v10288_v29, %v9454_v2  ;;  %v8255_v0 = vor.u32 %v9984_v57, %v8252_v58  ;;  %v8896_v2 = vld [vmem:[#allocation14 + $0x924] sm:$0xf0]  ;;  %v8647_v29 = vor.u32 %v10082_v28, %v8644_v11  ;;  %v9960_v58 = vld [vmem:[#allocation14 + $0x340] sm:$0xf0] }
 0x37e   :  { %v5942_v43 = vpop.f32.mrf.mxu2  ;;  %v8146_v57 = vld [vmem:[#allocation14 + $0x328] sm:$0xf] }
 0x37f   :  { %6208 = vmatpush.bf16.msrb.mxu3 %v9011_v12  ;;  %v5943_v25 = vadd.f32 %v5942_v43, %v3306_v24  ;;  %v10075_v43 = vld [vmem:[#allocation14 + $0x6dc] sm:$0xf]  ;;  %v7894_v24 = vld [vmem:[#allocation14 + $0x130] sm:$0xf] }
 0x380   :  { %6194 = vmatpush.bf16.msrb.mxu2 %v8815_v35  ;;  %6169 = vmatpush.bf16.msrb.mxu0 %v8339_v13  ;;  %v8703_v35 = vor.u32 %v10096_v19, %v8700_v20  ;;  %v5879_v22 = vpop.f32.mrf.mxu1  ;;  %v8227_v19 = vor.u32 %v9977_v10, %v8224_v62  ;;  %v9314_v20 = vld [vmem:[#allocation14 + $0xc50] sm:$0xf]  ;;  %v10061_v62 = vld [vmem:[#allocation14 + $0x66c] sm:$0xf] }
 0x381   :  { %6130 = vmatpush.bf16.msra.mxu1 %v9455_v8  ;;  %v10899_v12 = vadd.f32 %v5955_v5, %v5943_v25  ;;  %v10260_v8 = vld [vmem:[#allocation14 + $0xca0] sm:$0xf0]  ;;  %v8588_v25 = vld [vmem:[#allocation14 + $0x6bc] sm:$0xf0]  ;;  %v8147_v5 = vor.u32 %v9960_v58, %v8146_v57  ;;  %v9946_v22 = vld [vmem:[#allocation14 + $0x2d0] sm:$0xf0] }
 0x383   :  { %6209 = vmatpush.bf16.msrb.mxu3 %v8983_v17  ;;  %v10253_v17 = vld [vmem:[#allocation14 + $0xc68] sm:$0xf0] }
 0x384   :  { %6195 = vmatpush.bf16.msrb.mxu2 %v8787_v53  ;;  %6170 = vmatpush.bf16.msrb.mxu0 %v8311_v30  ;;  %v9399_v53 = vor.u32 %v10274_v33, %v9398_v39  ;;  %v9970_v30 = vld [vmem:[#allocation14 + $0x394] sm:$0xf]  ;;  %v8174_v39 = vld [vmem:[#allocation14 + $0x360] sm:$0xf]  ;;  %v10243_v33 = vld [vmem:[#allocation14 + $0xc1c] sm:$0xf] }
 0x385   :  { %6131 = vmatpush.bf16.msra.mxu1 %v9427_v23  ;;  %v9343_v23 = vor.u32 %v10260_v8, %v9342_v36  ;;  %v8175_v54 = vor.u32 %v9967_v6, %v8174_v39  ;;  %v9291_v55 = vor.u32 %v10243_v33, %v9288_v45  ;;  %v7838_v36 = vld [vmem:[#allocation14 + $0xc0] sm:$0xf]  ;;  %v9883_v8 = vld [vmem:[#allocation14 + $0xd8] sm:$0xf0]  ;;  %v8091_v39 = vor.u32 %v9946_v22, %v8090_v60 }
 0x386   :  { %v5944_v13 = vpop.f32.mrf.mxu2 }
 0x387   :  { %6210 = vmatpush.bf16.msrb.mxu3 %v8955_v48  ;;  %v8616_v48 = vld [vmem:[#allocation14 + $0x6f4] sm:$0xf0]  ;;  %v10229_v13 = vld [vmem:[#allocation14 + $0xbac] sm:$0xf] }
 0x388   :  { %6196 = vmatpush.bf16.msrb.mxu2 %v8759_v1  ;;  %6171 = vmatpush.bf16.msrb.mxu0 %v8283_v31  ;;  %v10145_v1 = vld [vmem:[#allocation14 + $0x90c] sm:$0xf]  ;;  %v8619_v28 = vor.u32 %v10075_v43, %v8616_v48  ;;  %v9939_v43 = vld [vmem:[#allocation14 + $0x298] sm:$0xf0] }
 0x389   :  { %6132 = vmatpush.bf16.msra.mxu1 %v9399_v53  ;;  %v8899_v26 = vor.u32 %v10145_v1, %v8896_v2  ;;  %v9897_v31 = vld [vmem:[#allocation14 + $0x148] sm:$0xf0]  ;;  %v5957_v53 = vpop.f32.mrf.mxu3  ;;  %v9890_v1 = vld [vmem:[#allocation14 + $0x110] sm:$0xf0]  ;;  %v5878_v2 = vadd.f32 %v10897_v49, %v5865_v37  ;;  %v8560_v49 = vld [vmem:[#allocation14 + $0x684] sm:$0xf0] }
 0x38a   :  { %v7895_v11 = vor.u32 %v9897_v31, %v7894_v24  ;;  %v10215_v48 = vld [vmem:[#allocation14 + $0xb3c] sm:$0xf]  ;;  %v9176_v24 = vld [vmem:[#allocation14 + $0xb54] sm:$0xf0]  ;;  %v9869_v53 = vld [vmem:[#allocation14 + $0x68] sm:$0xf0] }
 0x38b   :  { %6211 = vmatpush.bf16.msrb.mxu3 %v8927_v56  ;;  %v10068_v56 = vld [vmem:[#allocation14 + $0x6a4] sm:$0xf]  ;;  %v9179_v58 = vor.u32 %v10215_v48, %v9176_v24  ;;  %v8034_v37 = vld [vmem:[#allocation14 + $0x248] sm:$0xf]  ;;  %v8398_v48 = vld [vmem:[#allocation14 + $0x520] sm:$0xf] }
 0x38c   :  { %6197 = vmatpush.bf16.msrb.mxu2 %v8731_v15  ;;  %v5918_v15 = vpop.f32.mrf.mxu0  ;;  %6172 = vmatpush.bf16.msrb.mxu0 %v8255_v0  ;;  %v7866_v0 = vld [vmem:[#allocation14 + $0xf8] sm:$0xf]  ;;  %v8591_v44 = vor.u32 %v10068_v56, %v8588_v25  ;;  %v10208_v25 = vld [vmem:[#allocation14 + $0xb04] sm:$0xf]  ;;  %v10023_v24 = vld [vmem:[#allocation14 + $0x538] sm:$0xf0] }
 0x38d   :  { %6133 = vmatpush.bf16.msra.mxu1 %v9371_v9  ;;  %v9263_v9 = vor.u32 %v10236_v21, %v9260_v18  ;;  %v7867_v10 = vor.u32 %v9890_v1, %v7866_v0  ;;  %v5891_v15 = vadd.f32 %v10883_v40, %v5878_v2  ;;  %v10040_v18 = vld [vmem:[#allocation14 + $0x5c4] sm:$0xf]  ;;  %v9148_v0 = vld [vmem:[#allocation14 + $0xb1c] sm:$0xf0]  ;;  %v7754_v2 = vld [vmem:[#allocation14 + $0x18] sm:$0xf] }
 0x38e   :  { %v8476_v1 = vld [vmem:[#allocation14 + $0x5dc] sm:$0xf0] }
 0x38f   :  { %6212 = vmatpush.bf16.msrb.mxu3 %v8899_v26  ;;  %v5904_v40 = vadd.f32 %v10888_v61, %v5891_v15 }
 0x390   :  { %6198 = vmatpush.bf16.msrb.mxu2 %v8703_v35  ;;  %v8196_v35 = vld [vmem:[#allocation14 + $0x3ac] sm:$0xf0]  ;;  %6173 = vmatpush.bf16.msrb.mxu0 %v8227_v19  ;;  %v8563_v19 = vor.u32 %v10061_v62, %v8560_v49  ;;  %v10201_v49 = vld [vmem:[#allocation14 + $0xacc] sm:$0xf] }
 0x391   :  { %v8199_v3 = vor.u32 %v9970_v30, %v8196_v35  ;;  %6134 = vmatpush.bf16.msra.mxu1 %v9343_v23  ;;  %v10222_v30 = vld [vmem:[#allocation14 + $0xb74] sm:$0xf]  ;;  %v7810_v23 = vld [vmem:[#allocation14 + $0x88] sm:$0xf]  ;;  %v9876_v35 = vld [vmem:[#allocation14 + $0xa0] sm:$0xf0]  ;;  %v5917_v61 = vadd.f32 %v10894_v47, %v5904_v40 }
 0x392   :  { %v9207_v6 = vor.u32 %v10222_v30, %v9204_v4  ;;  %v7811_v45 = vor.u32 %v9876_v35, %v7810_v23  ;;  %v9862_v47 = vld [vmem:[#allocation14 + $0x30] sm:$0xf0]  ;;  %v8420_v23 = vld [vmem:[#allocation14 + $0x56c] sm:$0xf0]  ;;  %v7978_v40 = vld [vmem:[#allocation14 + $0x1d8] sm:$0xf] }
 0x393   :  { %6213 = vmatpush.bf16.msrb.mxu3 %v8871_v38  ;;  %v10047_v38 = vld [vmem:[#allocation14 + $0x5fc] sm:$0xf]  ;;  %v9092_v35 = vld [vmem:[#allocation14 + $0xaac] sm:$0xf0] }
 0x394   :  { %6199 = vmatpush.bf16.msrb.mxu2 %v8675_v46  ;;  %v9315_v46 = vor.u32 %v10253_v17, %v9314_v20  ;;  %6174 = vmatpush.bf16.msrb.mxu0 %v8199_v3  ;;  %v7839_v20 = vor.u32 %v9883_v8, %v7838_v36  ;;  %v10054_v17 = vld [vmem:[#allocation14 + $0x634] sm:$0xf]  ;;  %v8504_v3 = vld [vmem:[#allocation14 + $0x614] sm:$0xf0]  ;;  %v9120_v36 = vld [vmem:[#allocation14 + $0xae4] sm:$0xf0] }
 0x395   :  { %v8535_v33 = vor.u32 %v10054_v17, %v8532_v32  ;;  %v5929_v57 = vpop.f32.mrf.mxu1  ;;  %v8507_v56 = vor.u32 %v10047_v38, %v8504_v3  ;;  %v10194_v17 = vld [vmem:[#allocation14 + $0xa94] sm:$0xf]  ;;  %v9123_v4 = vor.u32 %v10201_v49, %v9120_v36  ;;  %v10009_v49 = vld [vmem:[#allocation14 + $0x4c8] sm:$0xf0]  ;;  %v9456_v36 = vld [vmem:[#allocation14 + $0xd84] sm:$0xf0] }
 0x396   :  { %6135 = vmatpush.bf16.msra.mxu1 %v9315_v46  ;;  %6214 = vmatmul.bf16.vlgmr.msrb.gmra.mxu3 %v10809_v27  ;;  %v10913_v46 = vpop.f32.mrf.mxu0  ;;  %v10026_v32 = vld [vmem:[#allocation14 + $0x554] sm:$0xf] }
 0x397   :  { %6258 = vmatpush.bf16.msra.mxu3 %v8175_v54  ;;  %6175 = vmatmul.bf16.vlgmr.msrb.gmra.mxu0 %v10795_v51  ;;  %v7782_v54 = vld [vmem:[#allocation14 + $0x50] sm:$0xf] }
 0x398   :  { %6200 = vmatpush.bf16.msrb.mxu2 %v8647_v29  ;;  %6219 = vmatpush.bf16.msra.mxu0 %v9291_v55  ;;  %v8118_v29 = vld [vmem:[#allocation14 + $0x2f0] sm:$0xf]  ;;  %v7783_v21 = vor.u32 %v9869_v53, %v7782_v54  ;;  %v10915_v62 = vpop.f32.mrf.mxu3  ;;  %v9512_v54 = vld [vmem:[#allocation14 + $0xdf4] sm:$0xf0] }
 0x399   :  { %6136 = vmatmul.bf16.vlgmr.msra.gmra.mxu1 %v10822_v50  ;;  %v8119_v26 = vor.u32 %v9953_v59, %v8118_v29  ;;  %v10135_v29 = vld [vmem:[#allocation14 + $0x8b8] sm:$0xf0]  ;;  %v9151_v59 = vor.u32 %v10208_v25, %v9148_v0  ;;  %v8790_v53 = vld [vmem:[#allocation14 + $0x830] sm:$0xf]  ;;  %v10292_v25 = vld [vmem:[#allocation14 + $0xda4] sm:$0xf] }
 0x39a   :  { %6180 = vmatpush.bf16.msrb.mxu1 %v8619_v28  ;;  %v9932_v28 = vld [vmem:[#allocation14 + $0x260] sm:$0xf0]  ;;  %v8370_v0 = vld [vmem:[#allocation14 + $0x4e8] sm:$0xf] }
 0x39b   :  { %6201 = vmatmul.bf16.vlgmr.msrb.gmra.mxu2 %v10799_v42  ;;  %6259 = vmatpush.bf16.msra.mxu3 %v8147_v5  ;;  %v8035_v5 = vor.u32 %v9932_v28, %v8034_v37  ;;  %v8423_v37 = vor.u32 %v10026_v32, %v8420_v23  ;;  %v8399_v28 = vor.u32 %v10023_v24, %v8398_v48  ;;  %v9428_v32 = vld [vmem:[#allocation14 + $0xd4c] sm:$0xf0]  ;;  %v10100_v23 = vld [vmem:[#allocation14 + $0x7a0] sm:$0xf0]  ;;  %v9400_v24 = vld [vmem:[#allocation14 + $0xd14] sm:$0xf0] }
 0x39c   :  { %6245 = vmatpush.bf16.msra.mxu2 %v7951_v14  ;;  %v9232_v14 = vld [vmem:[#allocation14 + $0xbc4] sm:$0xf0]  ;;  %6220 = vmatpush.bf16.msra.mxu0 %v9263_v9  ;;  %v8846_v9 = vld [vmem:[#allocation14 + $0x8a0] sm:$0xf] }
 0x39d   :  { %v9235_v16 = vor.u32 %v10229_v13, %v9232_v14  ;;  %v8479_v13 = vor.u32 %v10040_v18, %v8476_v1  ;;  %v7755_v14 = vor.u32 %v9862_v47, %v7754_v2  ;;  %v8847_v15 = vor.u32 %v10135_v29, %v8846_v9  ;;  %v5931_v30 = vpop.f32.mrf.mxu1  ;;  %v10016_v1 = vld [vmem:[#allocation14 + $0x500] sm:$0xf0]  ;;  %v9484_v2 = vld [vmem:[#allocation14 + $0xdbc] sm:$0xf0]  ;;  %v8762_v47 = vld [vmem:[#allocation14 + $0x7f8] sm:$0xf] }
 0x39e   :  { %6181 = vmatpush.bf16.msrb.mxu1 %v8591_v44  ;;  %v10910_v31 = vpop.f32.mrf.mxu2  ;;  %v8006_v44 = vld [vmem:[#allocation14 + $0x210] sm:$0xf]  ;;  %v5970_v60 = vpop.f32.mrf.mxu0  ;;  %v8371_v9 = vor.u32 %v10016_v1, %v8370_v0  ;;  %v8314_v30 = vld [vmem:[#allocation14 + $0x478] sm:$0xf]  ;;  %v9988_v0 = vld [vmem:[#allocation14 + $0x420] sm:$0xf0] }
 0x39f   :  { %6260 = vmatpush.bf16.msra.mxu3 %v8119_v26  ;;  %v10033_v26 = vld [vmem:[#allocation14 + $0x58c] sm:$0xf]  ;;  %v9014_v29 = vld [vmem:[#allocation14 + $0x9f0] sm:$0xf]  ;;  %v8986_v60 = vld [vmem:[#allocation14 + $0x9b8] sm:$0xf] }
 0x3a0   :  { %6246 = vmatpush.bf16.msra.mxu2 %v7923_v41  ;;  %6221 = vmatpush.bf16.msra.mxu0 %v9235_v16  ;;  %v8062_v41 = vld [vmem:[#allocation14 + $0x280] sm:$0xf]  ;;  %v8448_v16 = vld [vmem:[#allocation14 + $0x5a4] sm:$0xf0] }
 0x3a1   :  { %v8063_v55 = vor.u32 %v9939_v43, %v8062_v41  ;;  %v8451_v41 = vor.u32 %v10033_v26, %v8448_v16  ;;  %v10299_v43 = vld [vmem:[#allocation14 + $0xddc] sm:$0xf]  ;;  %v9372_v1 = vld [vmem:[#allocation14 + $0xcdc] sm:$0xf0] }
 0x3a2   :  { %6182 = vmatpush.bf16.msrb.mxu1 %v8563_v19  ;;  %v8818_v19 = vld [vmem:[#allocation14 + $0x868] sm:$0xf] }
 0x3a3   :  { %6261 = vmatpush.bf16.msra.mxu3 %v8091_v39  ;;  %v9918_v39 = vld [vmem:[#allocation14 + $0x1f0] sm:$0xf0] }
 0x3a4   :  { %6247 = vmatpush.bf16.msra.mxu2 %v7895_v11  ;;  %6222 = vmatpush.bf16.msra.mxu0 %v9207_v6  ;;  %v5930_v11 = vadd.f32 %v5929_v57, %v5917_v61  ;;  %v7979_v3 = vor.u32 %v9918_v39, %v7978_v40  ;;  %v10121_v61 = vld [vmem:[#allocation14 + $0x848] sm:$0xf0]  ;;  %v8958_v39 = vld [vmem:[#allocation14 + $0x980] sm:$0xf] }
 0x3a5   :  { %v8791_v18 = vor.u32 %v10121_v61, %v8790_v53 }
 0x3a6   :  { %6183 = vmatpush.bf16.msrb.mxu1 %v8535_v33  ;;  %10326 = vtanh.f32 %v5930_v11  ;;  %v5996_v8 = vpop.f32.mrf.mxu2  ;;  %v9070_v33 = vld [vmem:[#allocation14 + $0xa60] sm:$0xf]  ;;  %v9042_v11 = vld [vmem:[#allocation14 + $0xa28] sm:$0xf] }
 0x3a7   :  { %6262 = vmatpush.bf16.msra.mxu3 %v8063_v55  ;;  %v9095_v55 = vor.u32 %v10194_v17, %v9092_v35  ;;  %v8734_v8 = vld [vmem:[#allocation14 + $0x7c0] sm:$0xf]  ;;  %v10278_v17 = vld [vmem:[#allocation14 + $0xd34] sm:$0xf] }
 0x3a8   :  { %6248 = vmatpush.bf16.msra.mxu2 %v7867_v10  ;;  %6223 = vmatpush.bf16.msra.mxu0 %v9179_v58  ;;  %v9925_v10 = vld [vmem:[#allocation14 + $0x228] sm:$0xf0]  ;;  %v6009_v58 = vpop.f32.mrf.mxu3 }
 0x3a9   :  { %v8007_v22 = vor.u32 %v9925_v10, %v8006_v44  ;;  %v9487_v44 = vor.u32 %v10292_v25, %v9484_v2  ;;  %v8258_v25 = vld [vmem:[#allocation14 + $0x408] sm:$0xf]  ;;  %v8650_v2 = vld [vmem:[#allocation14 + $0x718] sm:$0xf] }
 0x3aa   :  { %6184 = vmatpush.bf16.msrb.mxu1 %v8507_v56  ;;  %v10184_v56 = vld [vmem:[#allocation14 + $0xa40] sm:$0xf0] }
 0x3ab   :  { %6263 = vmatpush.bf16.msra.mxu3 %v8035_v5  ;;  %v10114_v5 = vld [vmem:[#allocation14 + $0x810] sm:$0xf0] }
 0x3ac   :  { %6249 = vmatpush.bf16.msra.mxu2 %v7839_v20  ;;  %v10128_v20 = vld [vmem:[#allocation14 + $0x880] sm:$0xf0]  ;;  %6224 = vmatpush.bf16.msra.mxu0 %v9151_v59  ;;  %v10327_v6 = vpop.eup %10326  ;;  %v10177_v59 = vld [vmem:[#allocation14 + $0xa08] sm:$0xf0]  ;;  %v8763_v10 = vor.u32 %v10114_v5, %v8762_v47  ;;  %v10086_v47 = vld [vmem:[#allocation14 + $0x730] sm:$0xf0] }
 0x3ad   :  { %6358 = vst [vmem:[#allocation17 + $0x10] sm:$0xff] %v10327_v6  ;;  %v8819_v38 = vor.u32 %v10128_v20, %v8818_v19  ;;  %v9015_v26 = vor.u32 %v10177_v59, %v9014_v29  ;;  %v10163_v6 = vld [vmem:[#allocation14 + $0x998] sm:$0xf0]  ;;  %v8902_v29 = vld [vmem:[#allocation14 + $0x910] sm:$0xf] }
 0x3ae   :  { %6185 = vmatpush.bf16.msrb.mxu1 %v8479_v13  ;;  %v10285_v13 = vld [vmem:[#allocation14 + $0xd6c] sm:$0xf]  ;;  %v8959_v61 = vor.u32 %v10163_v6, %v8958_v39  ;;  %v8622_v6 = vld [vmem:[#allocation14 + $0x6e0] sm:$0xf] }
 0x3af   :  { %6264 = vmatpush.bf16.msra.mxu3 %v8007_v22  ;;  %v10170_v22 = vld [vmem:[#allocation14 + $0x9d0] sm:$0xf0]  ;;  %v9459_v19 = vor.u32 %v10285_v13, %v9456_v36  ;;  %v10149_v59 = vld [vmem:[#allocation14 + $0x928] sm:$0xf0]  ;;  %v8651_v13 = vor.u32 %v10086_v47, %v8650_v2 }
 0x3b0   :  { %6250 = vmatpush.bf16.msra.mxu2 %v7811_v45  ;;  %v10191_v45 = vld [vmem:[#allocation14 + $0xa78] sm:$0xf0]  ;;  %6225 = vmatpush.bf16.msra.mxu0 %v9123_v4  ;;  %v10002_v4 = vld [vmem:[#allocation14 + $0x490] sm:$0xf0]  ;;  %v8987_v35 = vor.u32 %v10170_v22, %v8986_v60  ;;  %v8903_v60 = vor.u32 %v10149_v59, %v8902_v29 }
 0x3b1   :  { %v9071_v57 = vor.u32 %v10191_v45, %v9070_v33  ;;  %v8315_v40 = vor.u32 %v10002_v4, %v8314_v30  ;;  %v10271_v33 = vld [vmem:[#allocation14 + $0xcfc] sm:$0xf]  ;;  %v8286_v45 = vld [vmem:[#allocation14 + $0x440] sm:$0xf]  ;;  %v10250_v4 = vld [vmem:[#allocation14 + $0xc54] sm:$0xf] }
 0x3b2   :  { %6186 = vmatpush.bf16.msrb.mxu1 %v8451_v41  ;;  %v9431_v41 = vor.u32 %v10278_v17, %v9428_v32  ;;  %v10921_v53 = vpop.f32.mrf.mxu0  ;;  %v10142_v17 = vld [vmem:[#allocation14 + $0x8f0] sm:$0xf0]  ;;  %v8202_v32 = vld [vmem:[#allocation14 + $0x398] sm:$0xf]  ;;  %v10051_v29 = vld [vmem:[#allocation14 + $0x618] sm:$0xf0] }
 0x3b3   :  { %6265 = vmatpush.bf16.msra.mxu3 %v7979_v3  ;;  %v8678_v3 = vld [vmem:[#allocation14 + $0x750] sm:$0xf]  ;;  %v10058_v2 = vld [vmem:[#allocation14 + $0x650] sm:$0xf0] }
 0x3b4   :  { %6251 = vmatpush.bf16.msra.mxu2 %v7783_v21  ;;  %v9515_v21 = vor.u32 %v10299_v43, %v9512_v54  ;;  %6226 = vmatpush.bf16.msra.mxu0 %v9095_v55  ;;  %v10093_v54 = vld [vmem:[#allocation14 + $0x768] sm:$0xf0]  ;;  %v10923_v55 = vld [vmem:[#allocation16] sm:$0xff] }
 0x3b5   :  { %v10926_v58 = vpop.f32.mrf.mxu1 }
 0x3b6   :  { %6187 = vmatpush.bf16.msrb.mxu1 %v8423_v37  ;;  %6266 = vmatmul.bf16.vlgmr.msra.gmra.mxu3 %v10777_v34  ;;  %v8706_v34 = vld [vmem:[#allocation14 + $0x788] sm:$0xf] }
 0x3b7   :  { %6310 = vmatpush.bf16.msrb.mxu3 %v9071_v57  ;;  %6227 = vmatmul.bf16.vlgmr.msra.gmra.mxu0 %v10815_v63  ;;  %v8707_v43 = vor.u32 %v10100_v23, %v8706_v34  ;;  %v3307_v57 = vperm.slane %v10923_v55, 4  ;;  %v9974_v34 = vld [vmem:[#allocation14 + $0x3b0] sm:$0xf0]  ;;  %v9316_v23 = vld [vmem:[#allocation14 + $0xc6c] sm:$0xf0] }
 0x3b8   :  { %6252 = vmatpush.bf16.msra.mxu2 %v7755_v14  ;;  %6271 = vmatpush.bf16.msrb.mxu0 %v8399_v28  ;;  %v8342_v14 = vld [vmem:[#allocation14 + $0x4b0] sm:$0xf]  ;;  %v8930_v28 = vld [vmem:[#allocation14 + $0x948] sm:$0xf] }
 0x3b9   :  { %6188 = vmatmul.bf16.vlgmr.msrb.gmra.mxu1 %v10791_v7  ;;  %v8343_v16 = vor.u32 %v10009_v49, %v8342_v14  ;;  %v8230_v14 = vld [vmem:[#allocation14 + $0x3d0] sm:$0xf]  ;;  %v9981_v49 = vld [vmem:[#allocation14 + $0x3e8] sm:$0xf0] }
 0x3ba   :  { %6232 = vmatpush.bf16.msra.mxu1 %v9515_v21  ;;  %v8679_v21 = vor.u32 %v10093_v54, %v8678_v3  ;;  %v9266_v3 = vld [vmem:[#allocation14 + $0xbe8] sm:$0xf]  ;;  %v10240_v54 = vld [vmem:[#allocation14 + $0xc00] sm:$0xf0] }
 0x3bb   :  { %6253 = vmatmul.bf16.vlgmr.msra.gmra.mxu2 %v10782_v52  ;;  %v9043_v52 = vor.u32 %v10184_v56, %v9042_v11  ;;  %v10156_v11 = vld [vmem:[#allocation14 + $0x960] sm:$0xf0]  ;;  %v9403_v56 = vor.u32 %v10271_v33, %v9400_v24 }
 0x3bc   :  { %6297 = vmatpush.bf16.msrb.mxu2 %v8847_v15  ;;  %v10107_v15 = vld [vmem:[#allocation14 + $0x7d8] sm:$0xf0]  ;;  %6272 = vmatpush.bf16.msrb.mxu0 %v8371_v9  ;;  %v8931_v5 = vor.u32 %v10156_v11, %v8930_v28  ;;  %v8259_v9 = vor.u32 %v9988_v0, %v8258_v25  ;;  %v9238_v11 = vld [vmem:[#allocation14 + $0xbb0] sm:$0xf]  ;;  %v9210_v25 = vld [vmem:[#allocation14 + $0xb78] sm:$0xf] }
 0x3bd   :  { %6311 = vmatpush.bf16.msrb.mxu3 %v9043_v52  ;;  %v8735_v20 = vor.u32 %v10107_v15, %v8734_v8  ;;  %v10257_v15 = vld [vmem:[#allocation14 + $0xc8c] sm:$0xf]  ;;  %v5983_v22 = vpop.f32.mrf.mxu1  ;;  %v10226_v0 = vld [vmem:[#allocation14 + $0xb90] sm:$0xf0] }
 0x3be   :  { %6233 = vmatpush.bf16.msra.mxu1 %v9487_v44  ;;  %v6046_v48 = vpop.f32.mrf.mxu2  ;;  %v6059_v44 = vpop.f32.mrf.mxu3  ;;  %v9211_v47 = vor.u32 %v10226_v0, %v9210_v25 }
 0x3bf   :  { %v6047_v52 = vadd.f32 %v6046_v48, %v3307_v57  ;;  %v5969_v48 = vadd.f32 %v10913_v46, %v10899_v12  ;;  %v10072_v57 = vld [vmem:[#allocation14 + $0x6c0] sm:$0xf0]  ;;  %v8566_v12 = vld [vmem:[#allocation14 + $0x670] sm:$0xf]  ;;  %v10065_v46 = vld [vmem:[#allocation14 + $0x688] sm:$0xf0] }
 0x3c0   :  { %6298 = vmatpush.bf16.msrb.mxu2 %v8819_v38  ;;  %6273 = vmatpush.bf16.msrb.mxu0 %v8343_v16  ;;  %v9995_v38 = vld [vmem:[#allocation14 + $0x458] sm:$0xf0]  ;;  %v6022_v16 = vpop.f32.mrf.mxu0 }
 0x3c1   :  { %6312 = vmatpush.bf16.msrb.mxu3 %v9015_v26  ;;  %v8287_v37 = vor.u32 %v9995_v38, %v8286_v45  ;;  %v10928_v36 = vadd.f32 %v6059_v44, %v6047_v52  ;;  %v9344_v26 = vld [vmem:[#allocation14 + $0xca4] sm:$0xf0]  ;;  %v9319_v45 = vor.u32 %v10250_v4, %v9316_v23  ;;  %v10219_v52 = vld [vmem:[#allocation14 + $0xb58] sm:$0xf0] }
 0x3c2   :  { %6234 = vmatpush.bf16.msra.mxu1 %v9459_v19  ;;  %v8231_v19 = vor.u32 %v9981_v49, %v8230_v14  ;;  %v9347_v30 = vor.u32 %v10257_v15, %v9344_v26  ;;  %v9154_v49 = vld [vmem:[#allocation14 + $0xb08] sm:$0xf]  ;;  %v10044_v26 = vld [vmem:[#allocation14 + $0x5e0] sm:$0xf0] }
 0x3c3   :  { %v8482_v15 = vld [vmem:[#allocation14 + $0x5c8] sm:$0xf] }
 0x3c4   :  { %6299 = vmatpush.bf16.msrb.mxu2 %v8791_v18  ;;  %6274 = vmatpush.bf16.msrb.mxu0 %v8315_v40  ;;  %v10264_v18 = vld [vmem:[#allocation14 + $0xcc4] sm:$0xf]  ;;  %v10247_v40 = vld [vmem:[#allocation14 + $0xc38] sm:$0xf0]  ;;  %v8483_v22 = vor.u32 %v10044_v26, %v8482_v15 }
 0x3c5   :  { %6313 = vmatpush.bf16.msrb.mxu3 %v8987_v35  ;;  %v9294_v35 = vld [vmem:[#allocation14 + $0xc20] sm:$0xf] }
 0x3c6   :  { %6235 = vmatpush.bf16.msra.mxu1 %v9431_v41  ;;  %v6048_v8 = vpop.f32.mrf.mxu2  ;;  %v10079_v41 = vld [vmem:[#allocation14 + $0x6f8] sm:$0xf0]  ;;  %v6061_v33 = vpop.f32.mrf.mxu3  ;;  %v9295_v38 = vor.u32 %v10247_v40, %v9294_v35  ;;  %v9098_v40 = vld [vmem:[#allocation14 + $0xa98] sm:$0xf] }
 0x3c7   :  { %v8623_v24 = vor.u32 %v10079_v41, %v8622_v6  ;;  %v10212_v8 = vld [vmem:[#allocation14 + $0xb20] sm:$0xf0]  ;;  %v8426_v6 = vld [vmem:[#allocation14 + $0x558] sm:$0xf]  ;;  %v10030_v41 = vld [vmem:[#allocation14 + $0x570] sm:$0xf0] }
 0x3c8   :  { %6300 = vmatpush.bf16.msrb.mxu2 %v8763_v10  ;;  %6275 = vmatpush.bf16.msrb.mxu0 %v8287_v37  ;;  %v9375_v10 = vor.u32 %v10264_v18, %v9372_v1  ;;  %v5982_v37 = vadd.f32 %v10926_v58, %v5969_v48  ;;  %v8567_v18 = vor.u32 %v10065_v46, %v8566_v12  ;;  %v8538_v1 = vld [vmem:[#allocation14 + $0x638] sm:$0xf]  ;;  %v10303_v33 = vld [vmem:[#allocation14 + $0xdf8] sm:$0xf0]  ;;  %v9406_v46 = vld [vmem:[#allocation14 + $0xd00] sm:$0xf] }
 0x3c9   :  { %6314 = vmatpush.bf16.msrb.mxu3 %v8959_v61  ;;  %v8594_v61 = vld [vmem:[#allocation14 + $0x6a8] sm:$0xf]  ;;  %v9155_v16 = vor.u32 %v10212_v8, %v9154_v49  ;;  %v8427_v48 = vor.u32 %v10030_v41, %v8426_v6 }
 0x3ca   :  { %6236 = vmatpush.bf16.msra.mxu1 %v9403_v56  ;;  %v8595_v28 = vor.u32 %v10072_v57, %v8594_v61  ;;  %v10233_v56 = vld [vmem:[#allocation14 + $0xbc8] sm:$0xf0]  ;;  %v9462_v57 = vld [vmem:[#allocation14 + $0xd70] sm:$0xf] }
 0x3cb   :  { %v9239_v58 = vor.u32 %v10233_v56, %v9238_v11  ;;  %v10282_v11 = vld [vmem:[#allocation14 + $0xd50] sm:$0xf0] }
 0x3cc   :  { %6301 = vmatpush.bf16.msrb.mxu2 %v8735_v20  ;;  %6276 = vmatpush.bf16.msrb.mxu0 %v8259_v9  ;;  %v8874_v20 = vld [vmem:[#allocation14 + $0x8d8] sm:$0xf] }
 0x3cd   :  { %6315 = vmatpush.bf16.msrb.mxu3 %v8931_v5  ;;  %v8875_v39 = vor.u32 %v10142_v17, %v8874_v20  ;;  %v9182_v5 = vld [vmem:[#allocation14 + $0xb40] sm:$0xf]  ;;  %v8454_v17 = vld [vmem:[#allocation14 + $0x590] sm:$0xf] }
 0x3ce   :  { %6237 = vmatpush.bf16.msra.mxu1 %v9375_v10 }
 0x3d0   :  { %6302 = vmatpush.bf16.msrb.mxu2 %v8707_v43  ;;  %6277 = vmatpush.bf16.msrb.mxu0 %v8231_v19  ;;  %v8203_v43 = vor.u32 %v9974_v34, %v8202_v32  ;;  %v10205_v19 = vld [vmem:[#allocation14 + $0xae8] sm:$0xf0] }
 0x3d1   :  { %6316 = vmatpush.bf16.msrb.mxu3 %v8903_v60 }
 0x3d2   :  { %6238 = vmatpush.bf16.msra.mxu1 %v9347_v30  ;;  %v10037_v30 = vld [vmem:[#allocation14 + $0x5a8] sm:$0xf0] }
 0x3d3   :  { %v10942_v44 = vpop.f32.mrf.mxu0  ;;  %v8455_v35 = vor.u32 %v10037_v30, %v8454_v17 }
 0x3d4   :  { %6303 = vmatpush.bf16.msrb.mxu2 %v8679_v21  ;;  %6278 = vmatpush.bf16.msrb.mxu0 %v8203_v43  ;;  %v5995_v21 = vadd.f32 %v10910_v31, %v5982_v37  ;;  %v8510_v31 = vld [vmem:[#allocation14 + $0x600] sm:$0xf]  ;;  %v10289_v37 = vld [vmem:[#allocation14 + $0xd88] sm:$0xf0]  ;;  %v6073_v49 = vadd.f32 %v10942_v44, %v10928_v36 }
 0x3d5   :  { %6317 = vmatpush.bf16.msrb.mxu3 %v8875_v39  ;;  %v10198_v39 = vld [vmem:[#allocation14 + $0xab0] sm:$0xf0]  ;;  %v9518_v43 = vld [vmem:[#allocation14 + $0xde0] sm:$0xf] }
 0x3d6   :  { %6239 = vmatpush.bf16.msra.mxu1 %v9319_v45  ;;  %v6033_v10 = vpop.f32.mrf.mxu1  ;;  %v9099_v45 = vor.u32 %v10198_v39, %v9098_v40 }
 0x3d7   :  { %6279 = vmatmul.bf16.vlgmr.msrb.gmra.mxu0 %v10795_v51  ;;  %v8539_v51 = vor.u32 %v10058_v2, %v8538_v1  ;;  %v10268_v1 = vld [vmem:[#allocation14 + $0xce0] sm:$0xf0] }
 0x3d8   :  { %6304 = vmatpush.bf16.msrb.mxu2 %v8651_v13  ;;  %6323 = vmatpush.bf16.msra.mxu0 %v9295_v38  ;;  %v9183_v13 = vor.u32 %v10219_v52, %v9182_v5  ;;  %v9350_v5 = vld [vmem:[#allocation14 + $0xc90] sm:$0xf]  ;;  %v10261_v52 = vld [vmem:[#allocation14 + $0xca8] sm:$0xf0] }
 0x3d9   :  { %6318 = vmatmul.bf16.vlgmr.msrb.gmra.mxu3 %v10809_v27  ;;  %6240 = vmatmul.bf16.vlgmr.msra.gmra.mxu1 %v10822_v50  ;;  %v6008_v27 = vadd.f32 %v10915_v62, %v5995_v21  ;;  %v8511_v62 = vor.u32 %v10051_v29, %v8510_v31  ;;  %v10944_v60 = vpop.f32.mrf.mxu3  ;;  %v10275_v21 = vld [vmem:[#allocation14 + $0xd18] sm:$0xf0] }
 0x3da   :  { %6284 = vmatpush.bf16.msrb.mxu1 %v8623_v24  ;;  %v9519_v24 = vor.u32 %v10303_v33, %v9518_v43  ;;  %v9407_v0 = vor.u32 %v10275_v21, %v9406_v46 }
 0x3db   :  { %6305 = vmatmul.bf16.vlgmr.msrb.gmra.mxu2 %v10799_v42  ;;  %v9267_v42 = vor.u32 %v10240_v54, %v9266_v3  ;;  %v6021_v59 = vadd.f32 %v10921_v53, %v6008_v27  ;;  %v9126_v53 = vld [vmem:[#allocation14 + $0xad0] sm:$0xf]  ;;  %v6074_v4 = vpop.f32.mrf.mxu0  ;;  %v9490_v3 = vld [vmem:[#allocation14 + $0xda8] sm:$0xf]  ;;  %v10296_v54 = vld [vmem:[#allocation14 + $0xdc0] sm:$0xf0] }
 0x3dc   :  { %v9127_v34 = vor.u32 %v10205_v19, %v9126_v53  ;;  %v9491_v61 = vor.u32 %v10296_v54, %v9490_v3 }
 0x3dd   :  { %6324 = vmatpush.bf16.msra.mxu0 %v9267_v42  ;;  %v6034_v14 = vadd.f32 %v6033_v10, %v6021_v59  ;;  %v9463_v42 = vor.u32 %v10289_v37, %v9462_v57  ;;  %v9351_v59 = vor.u32 %v10261_v52, %v9350_v5  ;;  %v9322_v10 = vld [vmem:[#allocation14 + $0xc58] sm:$0xf] }
 0x3de   :  { %6285 = vmatpush.bf16.msrb.mxu1 %v8595_v28  ;;  %v10939_v9 = vpop.f32.mrf.mxu2  ;;  %v6035_v32 = vpop.f32.mrf.mxu1  ;;  %v9434_v28 = vld [vmem:[#allocation14 + $0xd38] sm:$0xf] }
 0x3df   :  { %10328 = vtanh.f32 %v6034_v14  ;;  %v9435_v56 = vor.u32 %v10282_v11, %v9434_v28 }
 0x3e1   :  { %6325 = vmatpush.bf16.msra.mxu0 %v9239_v58  ;;  %v6113_v38 = vpop.f32.mrf.mxu3 }
 0x3e2   :  { %6286 = vmatpush.bf16.msrb.mxu1 %v8567_v18  ;;  %v3308_v18 = vperm.slane %v10923_v55, 5 }
 0x3e5   :  { %6326 = vmatpush.bf16.msra.mxu0 %v9211_v47  ;;  %v10329_v23 = vpop.eup %10328 }
 0x3e6   :  { %6287 = vmatpush.bf16.msrb.mxu1 %v8539_v51  ;;  %v6100_v20 = vpop.f32.mrf.mxu2  ;;  %6359 = vst [vmem:[#allocation17 + $0x18] sm:$0xff] %v10329_v23 }
 0x3e9   :  { %6327 = vmatpush.bf16.msra.mxu0 %v9183_v13  ;;  %v10254_v13 = vld [vmem:[#allocation14 + $0xc70] sm:$0xf0] }
 0x3ea   :  { %6288 = vmatpush.bf16.msrb.mxu1 %v8511_v62  ;;  %v9323_v62 = vor.u32 %v10254_v13, %v9322_v10 }
 0x3ed   :  { %6328 = vmatpush.bf16.msra.mxu0 %v9155_v16 }
 0x3ee   :  { %6289 = vmatpush.bf16.msrb.mxu1 %v8483_v22 }
 0x3f1   :  { %6329 = vmatpush.bf16.msra.mxu0 %v9127_v34 }
 0x3f2   :  { %6290 = vmatpush.bf16.msrb.mxu1 %v8455_v35 }
 0x3f4   :  { %v6124_v58 = vpop.f32.mrf.mxu0 }
 0x3f5   :  { %6330 = vmatpush.bf16.msra.mxu0 %v9099_v45 }
 0x3f6   :  { %6291 = vmatpush.bf16.msrb.mxu1 %v8427_v48 }
 0x3f7   :  { %v6085_v25 = vpop.f32.mrf.mxu1 }
 0x3f8   :  { %6331 = vmatmul.bf16.vlgmr.msra.gmra.mxu0 %v10815_v63  ;;  %v9378_v63 = vld [vmem:[#allocation14 + $0xcc8] sm:$0xf]  ;;  %v6086_v8 = vadd.f32 %v6085_v25, %v6073_v49 }
 0x3f9   :  { %6292 = vmatmul.bf16.vlgmr.msrb.gmra.mxu1 %v10791_v7  ;;  %v6163_v7 = vpop.f32.mrf.mxu3  ;;  %v9379_v27 = vor.u32 %v10268_v1, %v9378_v63 }
 0x3fa   :  { %6336 = vmatpush.bf16.msra.mxu1 %v9519_v24  ;;  %v6099_v15 = vadd.f32 %v10939_v9, %v6086_v8  ;;  %v3309_v9 = vperm.slane %v10923_v55, 6 }
 0x3fc   :  { %v6126_v31 = vpop.f32.mrf.mxu0  ;;  %v6112_v26 = vadd.f32 %v10944_v60, %v6099_v15 }
 0x3fe   :  { %6337 = vmatpush.bf16.msra.mxu1 %v9491_v61  ;;  %v6150_v12 = vpop.f32.mrf.mxu2  ;;  %v6125_v22 = vadd.f32 %v6124_v58, %v6112_v26 }
 0x3ff   :  { %v6151_v2 = vadd.f32 %v6150_v12, %v3308_v18  ;;  %v6087_v29 = vpop.f32.mrf.mxu1 }
 0x401   :  { %v6164_v47 = vadd.f32 %v6163_v7, %v6151_v2  ;;  %v6165_v14 = vpop.f32.mrf.mxu3 }
 0x402   :  { %6338 = vmatpush.bf16.msra.mxu1 %v9463_v42 }
 0x406   :  { %6339 = vmatpush.bf16.msra.mxu1 %v9435_v56  ;;  %v6152_v51 = vpop.f32.mrf.mxu2 }
 0x40a   :  { %6340 = vmatpush.bf16.msra.mxu1 %v9407_v0 }
 0x40e   :  { %6341 = vmatpush.bf16.msra.mxu1 %v9379_v27 }
 0x412   :  { %6342 = vmatpush.bf16.msra.mxu1 %v9351_v59 }
 0x414   :  { %v6176_v53 = vpop.f32.mrf.mxu0 }
 0x415   :  { %v6177_v33 = vadd.f32 %v6176_v53, %v6164_v47 }
 0x416   :  { %6343 = vmatpush.bf16.msra.mxu1 %v9323_v62  ;;  %v6137_v19 = vpop.f32.mrf.mxu1 }
 0x417   :  { %v6138_v20 = vadd.f32 %v6137_v19, %v6125_v22 }
 0x419   :  { %6344 = vmatmul.bf16.vlgmr.msra.gmra.mxu1 %v10822_v50  ;;  %10330 = vtanh.f32 %v6138_v20  ;;  %v6215_v17 = vpop.f32.mrf.mxu3 }
 0x41c   :  { %v6178_v4 = vpop.f32.mrf.mxu0 }
 0x41e   :  { %v6202_v16 = vpop.f32.mrf.mxu2  ;;  %v6139_v32 = vpop.f32.mrf.mxu1 }
 0x41f   :  { %v10331_v34 = vpop.eup %10330 }
 0x420   :  { %6360 = vst [vmem:[#allocation17 + $0x20] sm:$0xff] %v10331_v34 }
 0x421   :  { %v6217_v36 = vpop.f32.mrf.mxu3 }
 0x426   :  { %v6204_v30 = vpop.f32.mrf.mxu2 }
 0x434   :  { %v6228_v23 = vpop.f32.mrf.mxu0 }
 0x436   :  { %v6189_v50 = vpop.f32.mrf.mxu1 }
 0x437   :  { %v6190_v45 = vadd.f32 %v6189_v50, %v6177_v33 }
 0x439   :  { %v6267_v60 = vpop.f32.mrf.mxu3  ;;  %v6203_v38 = vadd.f32 %v6202_v16, %v6190_v45 }
 0x43b   :  { %v6216_v48 = vadd.f32 %v6215_v17, %v6203_v38 }
 0x43c   :  { %v6230_v6 = vpop.f32.mrf.mxu0 }
 0x43d   :  { %v6229_v3 = vadd.f32 %v6228_v23, %v6216_v48 }
 0x43e   :  { %v6254_v44 = vpop.f32.mrf.mxu2  ;;  %v6191_v41 = vpop.f32.mrf.mxu1 }
 0x43f   :  { %v6255_v35 = vadd.f32 %v6254_v44, %v3309_v9 }
 0x441   :  { %v6268_v40 = vadd.f32 %v6267_v60, %v6255_v35  ;;  %v6269_v43 = vpop.f32.mrf.mxu3 }
 0x446   :  { %v6256_v39 = vpop.f32.mrf.mxu2 }
 0x454   :  { %v6280_v54 = vpop.f32.mrf.mxu0 }
 0x455   :  { %v6281_v18 = vadd.f32 %v6280_v54, %v6268_v40 }
 0x456   :  { %v6241_v61 = vpop.f32.mrf.mxu1 }
 0x457   :  { %v6242_v57 = vadd.f32 %v6241_v61, %v6229_v3 }
 0x459   :  { %10332 = vtanh.f32 %v6242_v57 }
 0x45c   :  { %v6319_v37 = vpop.f32.mrf.mxu3  ;;  %v6282_v42 = vpop.f32.mrf.mxu0 }
 0x45e   :  { %v6306_v24 = vpop.f32.mrf.mxu2  ;;  %v6243_v28 = vpop.f32.mrf.mxu1 }
 0x45f   :  { %v10333_v11 = vpop.eup %10332 }
 0x460   :  { %6361 = vst [vmem:[#allocation17 + $0x28] sm:$0xff] %v10333_v11 }
 0x464   :  { %v6321_v56 = vpop.f32.mrf.mxu3 }
 0x466   :  { %v6308_v55 = vpop.f32.mrf.mxu2 }
 0x475   :  { %v6332_v12 = vpop.f32.mrf.mxu0 }
 0x476   :  { %v6293_v46 = vpop.f32.mrf.mxu1 }
 0x477   :  { %v6294_v25 = vadd.f32 %v6293_v46, %v6281_v18 }
 0x479   :  { %v6307_v0 = vadd.f32 %v6306_v24, %v6294_v25 }
 0x47b   :  { %v6320_v63 = vadd.f32 %v6319_v37, %v6307_v0 }
 0x47d   :  { %v6334_v21 = vpop.f32.mrf.mxu0  ;;  %v6333_v1 = vadd.f32 %v6332_v12, %v6320_v63 }
 0x47e   :  { %v6295_v58 = vpop.f32.mrf.mxu1 }
 0x496   :  { %v6345_v2 = vpop.f32.mrf.mxu1 }
 0x497   :  { %v6346_v7 = vadd.f32 %v6345_v2, %v6333_v1 }
 0x499   :  { %10334 = vtanh.f32 %v6346_v7 }
 0x49e   :  { %v6347_v27 = vpop.f32.mrf.mxu1 }
 0x49f   :  { %v10335_v47 = vpop.eup %10334 }
 0x4a0   :  { %6362 = vst [vmem:[#allocation17 + $0x30] sm:$0xff] %v10335_v47 }
 0x4a1   :  { %6373 = dma.vmem_to_hbm [thread:$0]  %s6369_s8, 896, %s6371_s13, [#allocation4]  }
 0x4a2   :  { %10589 = dma.done.wait [#allocation4], 896  }
 0x4a3   :  { %10590 = vsyncadd [#allocation4], 4294966400 }
 0x4a4   :  { %6378 = vsyncpa [#allocation3], 1 }
 0x4a5   :  { %6379 = vsyncpa [#allocation6], 1 }
 0x4a6   :  { %6380 = vsyncpa [#allocation9], 1 }
 0x4a7   :  { %6381 = vsyncpa [#allocation12], 1 }
 0x4a8   :  { %6382 = vsyncpa [#allocation15], 1 }
 0x4a9   :  { %6383 = vsyncpa [#allocation4], 1 }

</bundles_post_ra>
